<compile_context>
chip_gen: v7x
topology: tpu7x:2x2x1
jax: 0.10.0
libtpu: 0.0.40
codegen_flags: <defaults>
</compile_context>

<pallas_src>
import math

import jax
import jax.numpy as jnp
from jax import lax
from jax.experimental import pallas as pl
from jax.experimental.pallas import tpu as pltpu


_SQRT_2_OVER_PI = 0.7978845608028654


def _gelu_tanh(x):
    return 0.5 * x * (1.0 + jnp.tanh(_SQRT_2_OVER_PI * (x + 0.044715 * x * x * x)))


def _pick_chunk(total, target):
    """Largest divisor of `total` that is <= target."""
    c = min(total, target)
    while total % c:
        c -= 1
    return c


# ----------------------------------------------------------------------------------------
# Kernel
# ----------------------------------------------------------------------------------------
def _make_layer_kernel(heads, dim_head, dim, tq, n_seq, n_ff):
    inner = heads * dim_head
    n_tiles = n_seq // tq            # kv streaming chunks == cache fill chunks == q tiles
    eps = 1e-5                       # nn.LayerNorm default
    f32 = jnp.float32
    bf16 = jnp.bfloat16

    def _ln(z, w_ref, b_ref):        # f32 stats, bf16 output data path
        zf = z.astype(f32)
        mu = jnp.mean(zf, axis=-1, keepdims=True)
        zc = zf - mu
        var = jnp.mean(zc * zc, axis=-1, keepdims=True)
        return (zc * lax.rsqrt(var + eps) * w_ref[...] + b_ref[...]).astype(bf16)

    def kernel(x_ref, ln1w_ref, ln1b_ref, wq_ref, wkv_ref, wo_ref, bo_ref,
               ln2w_ref, ln2b_ref, w1v_ref, b1v_ref, w1g_ref, b1g_ref,
               w2_ref, b2_ref, o_ref, k_cache, v_cache):
        qi = pl.program_id(1)

        # ---- once per batch: LayerNorm + fused K|V projection over the full sequence,
        #      cached lane-dense (n_seq, inner) in VMEM and reused by every query tile ----
        @pl.when(qi == 0)
        def _fill_kv():
            def fill(r, carry):
                rs = pl.multiple_of(r * tq, tq)
                rows = x_ref[0, pl.ds(rs, tq), :]                         # (tq, dim) bf16
                xn = _ln(rows, ln1w_ref, ln1b_ref)
                kv = jnp.dot(xn, wkv_ref[...], preferred_element_type=f32)
                k_cache[pl.ds(rs, tq), :] = kv[:, :inner].astype(bf16)
                v_cache[pl.ds(rs, tq), :] = kv[:, inner:].astype(bf16)
                return carry
            lax.fori_loop(0, n_tiles, fill, 0)

        # ---- per-tile: LayerNorm + Q projection (scale pre-folded into wq) ----
        start_q = pl.multiple_of(qi * tq, tq)
        xq = x_ref[0, pl.ds(start_q, tq), :]                              # (tq, dim) bf16
        xq32 = xq.astype(f32)                                             # residual in f32
        xn_q = _ln(xq, ln1w_ref, ln1b_ref)
        q = jnp.dot(xn_q, wq_ref[...], preferred_element_type=f32).astype(bf16)

        # ---- attention: per head, stream cached K/V chunks with an online softmax ----
        o_parts = []
        for h in range(heads):
            lo = h * dim_head
            q_h = q[:, lo:lo + dim_head]                                  # (tq, dh) bf16

            def kv_step(c, carry, _lo=lo, _q=q_h):
                m, l, acc = carry
                ks = pl.multiple_of(c * tq, tq)
                kc = k_cache[pl.ds(ks, tq), _lo:_lo + dim_head]           # (tq, dh) bf16
                vc = v_cache[pl.ds(ks, tq), _lo:_lo + dim_head]
                s = lax.dot_general(_q, kc, (((1,), (1,)), ((), ())),
                                    preferred_element_type=f32)           # (tq, tq)
                m_new = jnp.maximum(m, jnp.max(s, axis=-1, keepdims=True))
                alpha = jnp.exp(m - m_new)
                p = jnp.exp(s - m_new)
                l_new = alpha * l + jnp.sum(p, axis=-1, keepdims=True)
                acc_new = alpha * acc + jnp.dot(p.astype(bf16), vc,
                                                preferred_element_type=f32)
                return m_new, l_new, acc_new

            m0 = jnp.full((tq, 1), -jnp.inf, f32)
            l0 = jnp.zeros((tq, 1), f32)
            a0 = jnp.zeros((tq, dim_head), f32)
            _, l_fin, acc_fin = lax.fori_loop(0, n_tiles, kv_step, (m0, l0, a0))
            o_parts.append((acc_fin / l_fin).astype(bf16))

        o_dense = jnp.concatenate(o_parts, axis=-1) if heads > 1 else o_parts[0]
        attn = jnp.dot(o_dense, wo_ref[...], preferred_element_type=f32) + bo_ref[...]
        x1 = xq32 + attn                                                  # (tq, dim) f32

        # ---- feed-forward (pre-LN GEGLU), hidden dim streamed in chunks ----
        xn2 = _ln(x1, ln2w_ref, ln2b_ref)

        def ffn_step(c, acc):
            a = jnp.dot(xn2, w1v_ref[c], preferred_element_type=f32) + b1v_ref[c]
            g = jnp.dot(xn2, w1g_ref[c], preferred_element_type=f32) + b1g_ref[c]
            hcol = (a * _gelu_tanh(g)).astype(bf16)                       # (tq, fc)
            return acc + jnp.dot(hcol, w2_ref[c], preferred_element_type=f32)

        ff = lax.fori_loop(0, n_ff, ffn_step, jnp.zeros((tq, dim), f32))
        o_ref[0] = (x1 + ff + b2_ref[...]).astype(o_ref.dtype)

    return kernel


# ----------------------------------------------------------------------------------------
# Wrapper
# ----------------------------------------------------------------------------------------
_SINGLE_BUFFER_OK = None   # lazily probed: does this jax build accept pl.Buffered(1)?


def transformer_layer_pallas(x, params, heads, dim_head, seq_tile=256):
    """One TransformerLayer. x: (B, N, D) bf16 -> (B, N, D) bf16."""
    global _SINGLE_BUFFER_OK
    B, N, D = x.shape
    inner = heads * dim_head
    tq = N if N <= seq_tile else seq_tile
    assert N % tq == 0 and (tq == N or tq % 8 == 0), \
        "sequence length must be divisible by the sequence tile (multiple of 8)"
    n_qt = N // tq
    n_ff = params["w1v"].shape[0]

    weights = (params["ln1_w"], params["ln1_b"], params["wq"], params["wkv"],
               params["wo"], params["bo"], params["ln2_w"], params["ln2_b"],
               params["w1v"], params["b1v"], params["w1g"], params["b1g"],
               params["w2"], params["b2"])

    kernel = _make_layer_kernel(heads, dim_head, D, tq, N, n_ff)

    def build(single_buffer_weights):
        in_specs = [pl.BlockSpec((1, N, D), lambda b, qi: (b, 0, 0))]
        for w in weights:
            idx_map = (lambda b, qi, _nd=w.ndim: (0,) * _nd)
            if single_buffer_weights:
                spec = pl.BlockSpec(w.shape, idx_map, pipeline_mode=pl.Buffered(1))
            else:
                spec = pl.BlockSpec(w.shape, idx_map)
            in_specs.append(spec)

        # explicit scoped-VMEM budget sized to the actual resident footprint (+ headroom)
        w_bytes = sum(int(w.size) * w.dtype.itemsize for w in weights)
        w_bytes *= 1 if single_buffer_weights else 2
        act_bytes = 2 * (N * D * 2) + 2 * (tq * D * 2)        # double-buffered x / out blocks
        scratch_bytes = 2 * N * inner * 2                     # bf16 K/V caches
        vmem_limit = int((w_bytes + act_bytes + scratch_bytes) * 1.25) + (8 << 20)
        vmem_limit = min(max(vmem_limit, 32 << 20), 128 << 20)

        return pl.pallas_call(
            kernel,
            out_shape=jax.ShapeDtypeStruct((B, N, D), jnp.bfloat16),
            grid=(B, n_qt),
            in_specs=in_specs,
            out_specs=pl.BlockSpec((1, tq, D), lambda b, qi: (b, qi, 0)),
            scratch_shapes=[pltpu.VMEM((N, inner), jnp.bfloat16),   # K cache (lane-dense)
                            pltpu.VMEM((N, inner), jnp.bfloat16)],  # V cache (lane-dense)
            compiler_params=pltpu.CompilerParams(
                dimension_semantics=("parallel", "arbitrary"),
                vmem_limit_bytes=vmem_limit),
        )

    if _SINGLE_BUFFER_OK is not False:
        try:
            out = build(True)(x, *weights)
            _SINGLE_BUFFER_OK = True
            return out
        except Exception:
            if _SINGLE_BUFFER_OK:     # single-buffering worked before -> genuine error
                raise
            _SINGLE_BUFFER_OK = False  # fall back to default double buffering
    return build(False)(x, *weights)


def transformer_forward(x, layer_params, heads, dim_head, seq_tile=256):
    # Inter-layer activations in bf16 (halves the per-layer HBM round trip).
    x = x.astype(jnp.bfloat16)
    for p in layer_params:
        x = transformer_layer_pallas(x, p, heads, dim_head, seq_tile)
    # TODO(synk): for deep stacks, fold depth into a grid axis (weights selected via scalar
    # prefetch) so activations never round-trip through HBM between layers.
    return x.astype(jnp.float32)


# ----------------------------------------------------------------------------------------
# Parameters (kernel layout) + pure-JAX reference
# ----------------------------------------------------------------------------------------
def init_params(key, dim, depth, heads, dim_head, ff_chunk_target=1024):
    """Random parameters pre-laid-out for the kernel (weights stored (in, out): x @ W)."""
    mult = heads                       # TransformerLayer passes mult=heads to FeedForward
    inner = heads * dim_head
    hidden = dim * mult
    fc = _pick_chunk(hidden, ff_chunk_target)
    n_ff = hidden // fc
    scale = dim_head ** (-0.5)
    bf16, f32 = jnp.bfloat16, jnp.float32
    layers = []
    for _ in range(depth):
        key, kq, kk, kv, ko, k1, k2, kb = jax.random.split(key, 8)

        def nrm(k, shape, fan_in):
            return jax.random.normal(k, shape, f32) / math.sqrt(float(fan_in))

        wq = nrm(kq, (dim, inner), dim) * scale          # attention scale folded into wq
        wk = nrm(kk, (dim, inner), dim)
        wv = nrm(kv, (dim, inner), dim)
        wo = nrm(ko, (inner, dim), inner)
        w1 = nrm(k1, (dim, 2 * hidden), dim)
        w2 = nrm(k2, (hidden, dim), hidden)
        b_all = 0.02 * jax.random.normal(kb, (2 * dim + 2 * hidden,), f32)
        bo = b_all[:dim].reshape(1, dim)
        b2 = b_all[dim:2 * dim].reshape(1, dim)
        b1v = b_all[2 * dim:2 * dim + hidden]
        b1g = b_all[2 * dim + hidden:]

        def chunk_cols(w):             # (dim, hidden) -> (n_ff, dim, fc)
            return jnp.transpose(w.reshape(dim, n_ff, fc), (1, 0, 2)).astype(bf16)

        layers.append(dict(
            ln1_w=jnp.ones((1, dim), f32), ln1_b=jnp.zeros((1, dim), f32),
            wq=wq.astype(bf16),
            wkv=jnp.concatenate([wk, wv], axis=1).astype(bf16),
            wo=wo.astype(bf16), bo=bo,
            ln2_w=jnp.ones((1, dim), f32), ln2_b=jnp.zeros((1, dim), f32),
            w1v=chunk_cols(w1[:, :hidden]),
            w1g=chunk_cols(w1[:, hidden:]),
            b1v=b1v.reshape(n_ff, 1, fc),
            b1g=b1g.reshape(n_ff, 1, fc),
            w2=w2.reshape(n_ff, fc, dim).astype(bf16),
            b2=b2,
        ))
    return layers


def _reference_forward(x, layer_params, heads, dim_head):
    """Pure-JAX f32 reference matching the PyTorch module (eval semantics)."""
    inner = heads * dim_head
    f32 = jnp.float32
    y = x.astype(f32)
    eps = 1e-5

    def ln(z, w, b):
        mu = z.mean(-1, keepdims=True)
        var = ((z - mu) ** 2).mean(-1, keepdims=True)
        return (z - mu) / jnp.sqrt(var + eps) * w + b

    for p in layer_params:
        B, N, D = y.shape
        xn = ln(y, p["ln1_w"].astype(f32), p["ln1_b"].astype(f32))
        q = xn @ p["wq"].astype(f32)                     # scale already folded into wq
        kv = xn @ p["wkv"].astype(f32)
        k, v = kv[..., :inner], kv[..., inner:]

        def split(t):
            return t.reshape(B, N, heads, dim_head).transpose(0, 2, 1, 3)

        qh, kh, vh = split(q), split(k), split(v)
        s = jnp.einsum('bhqd,bhkd->bhqk', qh, kh)
        patt = jax.nn.softmax(s, axis=-1)
        oh = jnp.einsum('bhqk,bhkd->bhqd', patt, vh)
        o = oh.transpose(0, 2, 1, 3).reshape(B, N, inner)
        attn = o @ p["wo"].astype(f32) + p["bo"].astype(f32)
        y1 = y + attn

        xn2 = ln(y1, p["ln2_w"].astype(f32), p["ln2_b"].astype(f32))
        n_ff, _, fc = p["w1v"].shape
        w1v = jnp.transpose(p["w1v"], (1, 0, 2)).reshape(D, n_ff * fc).astype(f32)
        w1g = jnp.transpose(p["w1g"], (1, 0, 2)).reshape(D, n_ff * fc).astype(f32)
        b1v = p["b1v"].reshape(-1).astype(f32)
        b1g = p["b1g"].reshape(-1).astype(f32)
        w2 = p["w2"].reshape(n_ff * fc, D).astype(f32)
        a = xn2 @ w1v + b1v
        g = xn2 @ w1g + b1g
        h = a * jax.nn.gelu(g, approximate=True)
        ff = h @ w2 + p["b2"].astype(f32)
        y = y1 + ff
    return y


if __name__ == "__main__":
    # Small, module-consistent shapes.
    B, N = 2, 8            # batch, sequence length
    dim = 32               # model dim
    depth = 2
    heads = 4
    dim_head = 8

    key = jax.random.PRNGKey(0)
    key, xkey, pkey = jax.random.split(key, 3)
    x = jax.random.normal(xkey, (B, N, dim), jnp.float32)

    layer_params = init_params(pkey, dim, depth, heads, dim_head)

    out = transformer_forward(x, layer_params, heads, dim_head)
    out = jax.block_until_ready(out)
    assert out.shape == (B, N, dim)

    ref = _reference_forward(x, layer_params, heads, dim_head)
    max_ref = float(jnp.max(jnp.abs(ref)))
    max_err = float(jnp.max(jnp.abs(out - ref)))
    assert max_err < 0.15 + 0.05 * max_ref, f"mismatch vs reference: {max_err}"

    print("KERNEL_OK")
</pallas_src>

<mosaic_0001>
module attributes {stable_mosaic.version = 11 : i64} {
  func.func @kernel(%arg0: i32, %arg1: i32, %arg2: memref<1x8x32xbf16, #tpu.memory_space<vmem>>, %arg3: memref<1x32xf32, #tpu.memory_space<vmem>>, %arg4: memref<1x32xf32, #tpu.memory_space<vmem>>, %arg5: memref<32x32xbf16, #tpu.memory_space<vmem>>, %arg6: memref<32x64xbf16, #tpu.memory_space<vmem>>, %arg7: memref<32x32xbf16, #tpu.memory_space<vmem>>, %arg8: memref<1x32xf32, #tpu.memory_space<vmem>>, %arg9: memref<1x32xf32, #tpu.memory_space<vmem>>, %arg10: memref<1x32xf32, #tpu.memory_space<vmem>>, %arg11: memref<1x32x128xbf16, #tpu.memory_space<vmem>>, %arg12: memref<1x1x128xf32, #tpu.memory_space<vmem>>, %arg13: memref<1x32x128xbf16, #tpu.memory_space<vmem>>, %arg14: memref<1x1x128xf32, #tpu.memory_space<vmem>>, %arg15: memref<1x128x32xbf16, #tpu.memory_space<vmem>>, %arg16: memref<1x32xf32, #tpu.memory_space<vmem>>, %arg17: memref<1x8x32xbf16, #tpu.memory_space<vmem>>, %arg18: memref<8x32xbf16, #tpu.memory_space<vmem>>, %arg19: memref<8x32xbf16, #tpu.memory_space<vmem>>) attributes {dimension_semantics = [#tpu.dimension_semantics<parallel>, #tpu.dimension_semantics<arbitrary>], iteration_bounds = array<i64: 2, 1>, scalar_prefetch = 0 : i64, scratch_operands = 2 : i64, tpu.core_type = #tpu.core_type<tc>, window_params = [{transform_indices = @transform_0, window_bounds = array<i64: 1, 8, 32>}, {pipeline_mode = #tpu.pipeline_mode<synchronous>, transform_indices = @transform_1, window_bounds = array<i64: 1, 32>}, {pipeline_mode = #tpu.pipeline_mode<synchronous>, transform_indices = @transform_2, window_bounds = array<i64: 1, 32>}, {pipeline_mode = #tpu.pipeline_mode<synchronous>, transform_indices = @transform_3, window_bounds = array<i64: 32, 32>}, {pipeline_mode = #tpu.pipeline_mode<synchronous>, transform_indices = @transform_4, window_bounds = array<i64: 32, 64>}, {pipeline_mode = #tpu.pipeline_mode<synchronous>, transform_indices = @transform_5, window_bounds = array<i64: 32, 32>}, {pipeline_mode = #tpu.pipeline_mode<synchronous>, transform_indices = @transform_6, window_bounds = array<i64: 1, 32>}, {pipeline_mode = #tpu.pipeline_mode<synchronous>, transform_indices = @transform_7, window_bounds = array<i64: 1, 32>}, {pipeline_mode = #tpu.pipeline_mode<synchronous>, transform_indices = @transform_8, window_bounds = array<i64: 1, 32>}, {pipeline_mode = #tpu.pipeline_mode<synchronous>, transform_indices = @transform_9, window_bounds = array<i64: 1, 32, 128>}, {pipeline_mode = #tpu.pipeline_mode<synchronous>, transform_indices = @transform_10, window_bounds = array<i64: 1, 1, 128>}, {pipeline_mode = #tpu.pipeline_mode<synchronous>, transform_indices = @transform_11, window_bounds = array<i64: 1, 32, 128>}, {pipeline_mode = #tpu.pipeline_mode<synchronous>, transform_indices = @transform_12, window_bounds = array<i64: 1, 1, 128>}, {pipeline_mode = #tpu.pipeline_mode<synchronous>, transform_indices = @transform_13, window_bounds = array<i64: 1, 128, 32>}, {pipeline_mode = #tpu.pipeline_mode<synchronous>, transform_indices = @transform_14, window_bounds = array<i64: 1, 32>}, {transform_indices = @transform_15, window_bounds = array<i64: 1, 8, 32>}]} {
    %c0_i32 = arith.constant 0 : i32
    %0 = arith.cmpi eq, %arg1, %c0_i32 : i32
    %1 = arith.extui %0 : i1 to i32
    %c0_i32_0 = arith.constant 0 : i32
    %2 = arith.cmpi ne, %1, %c0_i32_0 : i32
    scf.if %2 {
      %c0_i32_96 = arith.constant 0 : i32
      %c8_i32_97 = arith.constant 8 : i32
      %237 = arith.muli %c0_i32_96, %c8_i32_97 : i32
      %238 = tpu.assume_multiple %237, 8 : i32
      %c0_98 = arith.constant 0 : index
      %239 = arith.index_cast %238 : i32 to index
      %c0_99 = arith.constant 0 : index
      %240 = vector.load %arg2[%c0_98, %239, %c0_99] : memref<1x8x32xbf16, #tpu.memory_space<vmem>>, vector<1x8x32xbf16>
      %241 = vector.shape_cast %240 : vector<1x8x32xbf16> to vector<8x32xbf16>
      %242 = arith.extf %241 : vector<8x32xbf16> to vector<8x32xf32>
      %cst_100 = arith.constant dense<0.000000e+00> : vector<8xf32>
      %243 = vector.multi_reduction <add>, %242, %cst_100 [1] : vector<8x32xf32> to vector<8xf32>
      %244 = vector.shape_cast %243 : vector<8xf32> to vector<8x1xf32>
      %cst_101 = arith.constant 3.200000e+01 : f32
      %245 = vector.broadcast %cst_101 : f32 to vector<8x1xf32>
      %246 = arith.divf %244, %245 : vector<8x1xf32>
      %247 = vector.broadcast %246 : vector<8x1xf32> to vector<8x32xf32>
      %248 = arith.subf %242, %247 : vector<8x32xf32>
      %249 = arith.mulf %248, %248 : vector<8x32xf32>
      %cst_102 = arith.constant dense<0.000000e+00> : vector<8xf32>
      %250 = vector.multi_reduction <add>, %249, %cst_102 [1] : vector<8x32xf32> to vector<8xf32>
      %251 = vector.shape_cast %250 : vector<8xf32> to vector<8x1xf32>
      %cst_103 = arith.constant 3.200000e+01 : f32
      %252 = vector.broadcast %cst_103 : f32 to vector<8x1xf32>
      %253 = arith.divf %251, %252 : vector<8x1xf32>
      %cst_104 = arith.constant 9.99999974E-6 : f32
      %254 = vector.broadcast %cst_104 : f32 to vector<8x1xf32>
      %255 = arith.addf %253, %254 : vector<8x1xf32>
      %256 = math.rsqrt %255 : vector<8x1xf32>
      %257 = vector.broadcast %256 : vector<8x1xf32> to vector<8x32xf32>
      %258 = arith.mulf %248, %257 : vector<8x32xf32>
      %c0_105 = arith.constant 0 : index
      %c0_106 = arith.constant 0 : index
      %259 = vector.load %arg3[%c0_105, %c0_106] : memref<1x32xf32, #tpu.memory_space<vmem>>, vector<1x32xf32>
      %260 = vector.broadcast %259 : vector<1x32xf32> to vector<8x32xf32>
      %261 = arith.mulf %258, %260 : vector<8x32xf32>
      %c0_107 = arith.constant 0 : index
      %c0_108 = arith.constant 0 : index
      %262 = vector.load %arg4[%c0_107, %c0_108] : memref<1x32xf32, #tpu.memory_space<vmem>>, vector<1x32xf32>
      %263 = vector.broadcast %262 : vector<1x32xf32> to vector<8x32xf32>
      %264 = arith.addf %261, %263 : vector<8x32xf32>
      %265 = arith.truncf %264 : vector<8x32xf32> to vector<8x32xbf16>
      %c0_109 = arith.constant 0 : index
      %c0_110 = arith.constant 0 : index
      %266 = vector.load %arg6[%c0_109, %c0_110] : memref<32x64xbf16, #tpu.memory_space<vmem>>, vector<32x64xbf16>
      %cst_111 = arith.constant dense<0.000000e+00> : vector<8x64xf32>
      %267 = tpu.matmul %265, %266, %cst_111 {dimension_numbers = #tpu.dot_dimension_numbers<[1], [0], [0], [1], [0, 0, 1, 1], [], []>} : vector<8x32xbf16>, vector<32x64xbf16>, vector<8x64xf32> -> vector<8x64xf32>
      %268 = vector.extract_strided_slice %267 {offsets = [0, 0], sizes = [8, 32], strides = [1, 1]} : vector<8x64xf32> to vector<8x32xf32>
      %269 = arith.truncf %268 : vector<8x32xf32> to vector<8x32xbf16>
      %270 = arith.index_cast %238 : i32 to index
      %c0_112 = arith.constant 0 : index
      %271 = vector.load %arg18[%270, %c0_112] : memref<8x32xbf16, #tpu.memory_space<vmem>>, vector<8x32xbf16>
      tpu.vector_store %arg18[%270, %c0_112], %269 {strides = array<i32>} : memref<8x32xbf16, #tpu.memory_space<vmem>>, vector<8x32xbf16>,
      %272 = vector.extract_strided_slice %267 {offsets = [0, 32], sizes = [8, 32], strides = [1, 1]} : vector<8x64xf32> to vector<8x32xf32>
      %273 = arith.truncf %272 : vector<8x32xf32> to vector<8x32xbf16>
      %274 = arith.index_cast %238 : i32 to index
      %c0_113 = arith.constant 0 : index
      %275 = vector.load %arg19[%274, %c0_113] : memref<8x32xbf16, #tpu.memory_space<vmem>>, vector<8x32xbf16>
      tpu.vector_store %arg19[%274, %c0_113], %273 {strides = array<i32>} : memref<8x32xbf16, #tpu.memory_space<vmem>>, vector<8x32xbf16>,
      %c1_i32_114 = arith.constant 1 : i32
    } else {
    }
    %c8_i32 = arith.constant 8 : i32
    %3 = arith.muli %arg1, %c8_i32 : i32
    %4 = tpu.assume_multiple %3, 8 : i32
    %c0 = arith.constant 0 : index
    %5 = arith.index_cast %4 : i32 to index
    %c0_1 = arith.constant 0 : index
    %6 = vector.load %arg2[%c0, %5, %c0_1] : memref<1x8x32xbf16, #tpu.memory_space<vmem>>, vector<1x8x32xbf16>
    %7 = vector.shape_cast %6 : vector<1x8x32xbf16> to vector<8x32xbf16>
    %8 = arith.extf %7 : vector<8x32xbf16> to vector<8x32xf32>
    %9 = arith.extf %7 : vector<8x32xbf16> to vector<8x32xf32>
    %cst = arith.constant dense<0.000000e+00> : vector<8xf32>
    %10 = vector.multi_reduction <add>, %9, %cst [1] : vector<8x32xf32> to vector<8xf32>
    %11 = vector.shape_cast %10 : vector<8xf32> to vector<8x1xf32>
    %cst_2 = arith.constant 3.200000e+01 : f32
    %12 = vector.broadcast %cst_2 : f32 to vector<8x1xf32>
    %13 = arith.divf %11, %12 : vector<8x1xf32>
    %14 = vector.broadcast %13 : vector<8x1xf32> to vector<8x32xf32>
    %15 = arith.subf %9, %14 : vector<8x32xf32>
    %16 = arith.mulf %15, %15 : vector<8x32xf32>
    %cst_3 = arith.constant dense<0.000000e+00> : vector<8xf32>
    %17 = vector.multi_reduction <add>, %16, %cst_3 [1] : vector<8x32xf32> to vector<8xf32>
    %18 = vector.shape_cast %17 : vector<8xf32> to vector<8x1xf32>
    %cst_4 = arith.constant 3.200000e+01 : f32
    %19 = vector.broadcast %cst_4 : f32 to vector<8x1xf32>
    %20 = arith.divf %18, %19 : vector<8x1xf32>
    %cst_5 = arith.constant 9.99999974E-6 : f32
    %21 = vector.broadcast %cst_5 : f32 to vector<8x1xf32>
    %22 = arith.addf %20, %21 : vector<8x1xf32>
    %23 = math.rsqrt %22 : vector<8x1xf32>
    %24 = vector.broadcast %23 : vector<8x1xf32> to vector<8x32xf32>
    %25 = arith.mulf %15, %24 : vector<8x32xf32>
    %c0_6 = arith.constant 0 : index
    %c0_7 = arith.constant 0 : index
    %26 = vector.load %arg3[%c0_6, %c0_7] : memref<1x32xf32, #tpu.memory_space<vmem>>, vector<1x32xf32>
    %27 = vector.broadcast %26 : vector<1x32xf32> to vector<8x32xf32>
    %28 = arith.mulf %25, %27 : vector<8x32xf32>
    %c0_8 = arith.constant 0 : index
    %c0_9 = arith.constant 0 : index
    %29 = vector.load %arg4[%c0_8, %c0_9] : memref<1x32xf32, #tpu.memory_space<vmem>>, vector<1x32xf32>
    %30 = vector.broadcast %29 : vector<1x32xf32> to vector<8x32xf32>
    %31 = arith.addf %28, %30 : vector<8x32xf32>
    %32 = arith.truncf %31 : vector<8x32xf32> to vector<8x32xbf16>
    %c0_10 = arith.constant 0 : index
    %c0_11 = arith.constant 0 : index
    %33 = vector.load %arg5[%c0_10, %c0_11] : memref<32x32xbf16, #tpu.memory_space<vmem>>, vector<32x32xbf16>
    %cst_12 = arith.constant dense<0.000000e+00> : vector<8x32xf32>
    %34 = tpu.matmul %32, %33, %cst_12 {dimension_numbers = #tpu.dot_dimension_numbers<[1], [0], [0], [1], [0, 0, 1, 1], [], []>} : vector<8x32xbf16>, vector<32x32xbf16>, vector<8x32xf32> -> vector<8x32xf32>
    %35 = arith.truncf %34 : vector<8x32xf32> to vector<8x32xbf16>
    %36 = vector.extract_strided_slice %35 {offsets = [0, 0], sizes = [8, 8], strides = [1, 1]} : vector<8x32xbf16> to vector<8x8xbf16>
    %cst_13 = arith.constant 0xFF800000 : f32
    %37 = vector.broadcast %cst_13 : f32 to vector<8x1xf32>
    %cst_14 = arith.constant 0.000000e+00 : f32
    %38 = vector.broadcast %cst_14 : f32 to vector<8x1xf32>
    %cst_15 = arith.constant 0.000000e+00 : f32
    %39 = vector.broadcast %cst_15 : f32 to vector<8x8xf32>
    %c0_i32_16 = arith.constant 0 : i32
    %c8_i32_17 = arith.constant 8 : i32
    %40 = arith.muli %c0_i32_16, %c8_i32_17 : i32
    %41 = tpu.assume_multiple %40, 8 : i32
    %42 = arith.index_cast %41 : i32 to index
    %c0_18 = arith.constant 0 : index
    %43 = vector.load %arg18[%42, %c0_18] : memref<8x32xbf16, #tpu.memory_space<vmem>>, vector<8x8xbf16>
    %44 = arith.index_cast %41 : i32 to index
    %c0_19 = arith.constant 0 : index
    %45 = vector.load %arg19[%44, %c0_19] : memref<8x32xbf16, #tpu.memory_space<vmem>>, vector<8x8xbf16>
    %cst_20 = arith.constant dense<0.000000e+00> : vector<8x8xf32>
    %46 = tpu.matmul %36, %43, %cst_20 {dimension_numbers = #tpu.dot_dimension_numbers<[1], [1], [0], [0], [0, 0, 1, 0], [], []>} : vector<8x8xbf16>, vector<8x8xbf16>, vector<8x8xf32> -> vector<8x8xf32>
    %cst_21 = arith.constant dense<0xFF800000> : vector<8xf32>
    %47 = vector.multi_reduction <maximumf>, %46, %cst_21 [1] : vector<8x8xf32> to vector<8xf32>
    %48 = vector.shape_cast %47 : vector<8xf32> to vector<8x1xf32>
    %49 = arith.maximumf %37, %48 : vector<8x1xf32>
    %50 = arith.subf %37, %49 : vector<8x1xf32>
    %51 = math.exp %50 : vector<8x1xf32>
    %52 = vector.broadcast %49 : vector<8x1xf32> to vector<8x8xf32>
    %53 = arith.subf %46, %52 : vector<8x8xf32>
    %54 = math.exp %53 : vector<8x8xf32>
    %55 = arith.mulf %51, %38 : vector<8x1xf32>
    %cst_22 = arith.constant dense<0.000000e+00> : vector<8xf32>
    %56 = vector.multi_reduction <add>, %54, %cst_22 [1] : vector<8x8xf32> to vector<8xf32>
    %57 = vector.shape_cast %56 : vector<8xf32> to vector<8x1xf32>
    %58 = arith.addf %55, %57 : vector<8x1xf32>
    %59 = vector.broadcast %51 : vector<8x1xf32> to vector<8x8xf32>
    %60 = arith.mulf %59, %39 : vector<8x8xf32>
    %61 = arith.truncf %54 : vector<8x8xf32> to vector<8x8xbf16>
    %cst_23 = arith.constant dense<0.000000e+00> : vector<8x8xf32>
    %62 = tpu.matmul %61, %45, %cst_23 {dimension_numbers = #tpu.dot_dimension_numbers<[1], [0], [0], [1], [0, 0, 1, 1], [], []>} : vector<8x8xbf16>, vector<8x8xbf16>, vector<8x8xf32> -> vector<8x8xf32>
    %63 = arith.addf %60, %62 : vector<8x8xf32>
    %c1_i32 = arith.constant 1 : i32
    %64 = vector.broadcast %58 : vector<8x1xf32> to vector<8x8xf32>
    %65 = arith.divf %63, %64 : vector<8x8xf32>
    %66 = arith.truncf %65 : vector<8x8xf32> to vector<8x8xbf16>
    %67 = vector.extract_strided_slice %35 {offsets = [0, 8], sizes = [8, 8], strides = [1, 1]} : vector<8x32xbf16> to vector<8x8xbf16>
    %cst_24 = arith.constant 0xFF800000 : f32
    %68 = vector.broadcast %cst_24 : f32 to vector<8x1xf32>
    %cst_25 = arith.constant 0.000000e+00 : f32
    %69 = vector.broadcast %cst_25 : f32 to vector<8x1xf32>
    %cst_26 = arith.constant 0.000000e+00 : f32
    %70 = vector.broadcast %cst_26 : f32 to vector<8x8xf32>
    %c0_i32_27 = arith.constant 0 : i32
    %c8_i32_28 = arith.constant 8 : i32
    %71 = arith.muli %c0_i32_27, %c8_i32_28 : i32
    %72 = tpu.assume_multiple %71, 8 : i32
    %73 = arith.index_cast %72 : i32 to index
    %c8 = arith.constant 8 : index
    %74 = vector.load %arg18[%73, %c8] : memref<8x32xbf16, #tpu.memory_space<vmem>>, vector<8x8xbf16>
    %75 = arith.index_cast %72 : i32 to index
    %c8_29 = arith.constant 8 : index
    %76 = vector.load %arg19[%75, %c8_29] : memref<8x32xbf16, #tpu.memory_space<vmem>>, vector<8x8xbf16>
    %cst_30 = arith.constant dense<0.000000e+00> : vector<8x8xf32>
    %77 = tpu.matmul %67, %74, %cst_30 {dimension_numbers = #tpu.dot_dimension_numbers<[1], [1], [0], [0], [0, 0, 1, 0], [], []>} : vector<8x8xbf16>, vector<8x8xbf16>, vector<8x8xf32> -> vector<8x8xf32>
    %cst_31 = arith.constant dense<0xFF800000> : vector<8xf32>
    %78 = vector.multi_reduction <maximumf>, %77, %cst_31 [1] : vector<8x8xf32> to vector<8xf32>
    %79 = vector.shape_cast %78 : vector<8xf32> to vector<8x1xf32>
    %80 = arith.maximumf %68, %79 : vector<8x1xf32>
    %81 = arith.subf %68, %80 : vector<8x1xf32>
    %82 = math.exp %81 : vector<8x1xf32>
    %83 = vector.broadcast %80 : vector<8x1xf32> to vector<8x8xf32>
    %84 = arith.subf %77, %83 : vector<8x8xf32>
    %85 = math.exp %84 : vector<8x8xf32>
    %86 = arith.mulf %82, %69 : vector<8x1xf32>
    %cst_32 = arith.constant dense<0.000000e+00> : vector<8xf32>
    %87 = vector.multi_reduction <add>, %85, %cst_32 [1] : vector<8x8xf32> to vector<8xf32>
    %88 = vector.shape_cast %87 : vector<8xf32> to vector<8x1xf32>
    %89 = arith.addf %86, %88 : vector<8x1xf32>
    %90 = vector.broadcast %82 : vector<8x1xf32> to vector<8x8xf32>
    %91 = arith.mulf %90, %70 : vector<8x8xf32>
    %92 = arith.truncf %85 : vector<8x8xf32> to vector<8x8xbf16>
    %cst_33 = arith.constant dense<0.000000e+00> : vector<8x8xf32>
    %93 = tpu.matmul %92, %76, %cst_33 {dimension_numbers = #tpu.dot_dimension_numbers<[1], [0], [0], [1], [0, 0, 1, 1], [], []>} : vector<8x8xbf16>, vector<8x8xbf16>, vector<8x8xf32> -> vector<8x8xf32>
    %94 = arith.addf %91, %93 : vector<8x8xf32>
    %c1_i32_34 = arith.constant 1 : i32
    %95 = vector.broadcast %89 : vector<8x1xf32> to vector<8x8xf32>
    %96 = arith.divf %94, %95 : vector<8x8xf32>
    %97 = arith.truncf %96 : vector<8x8xf32> to vector<8x8xbf16>
    %98 = vector.extract_strided_slice %35 {offsets = [0, 16], sizes = [8, 8], strides = [1, 1]} : vector<8x32xbf16> to vector<8x8xbf16>
    %cst_35 = arith.constant 0xFF800000 : f32
    %99 = vector.broadcast %cst_35 : f32 to vector<8x1xf32>
    %cst_36 = arith.constant 0.000000e+00 : f32
    %100 = vector.broadcast %cst_36 : f32 to vector<8x1xf32>
    %cst_37 = arith.constant 0.000000e+00 : f32
    %101 = vector.broadcast %cst_37 : f32 to vector<8x8xf32>
    %c0_i32_38 = arith.constant 0 : i32
    %c8_i32_39 = arith.constant 8 : i32
    %102 = arith.muli %c0_i32_38, %c8_i32_39 : i32
    %103 = tpu.assume_multiple %102, 8 : i32
    %104 = arith.index_cast %103 : i32 to index
    %c16 = arith.constant 16 : index
    %105 = vector.load %arg18[%104, %c16] : memref<8x32xbf16, #tpu.memory_space<vmem>>, vector<8x8xbf16>
    %106 = arith.index_cast %103 : i32 to index
    %c16_40 = arith.constant 16 : index
    %107 = vector.load %arg19[%106, %c16_40] : memref<8x32xbf16, #tpu.memory_space<vmem>>, vector<8x8xbf16>
    %cst_41 = arith.constant dense<0.000000e+00> : vector<8x8xf32>
    %108 = tpu.matmul %98, %105, %cst_41 {dimension_numbers = #tpu.dot_dimension_numbers<[1], [1], [0], [0], [0, 0, 1, 0], [], []>} : vector<8x8xbf16>, vector<8x8xbf16>, vector<8x8xf32> -> vector<8x8xf32>
    %cst_42 = arith.constant dense<0xFF800000> : vector<8xf32>
    %109 = vector.multi_reduction <maximumf>, %108, %cst_42 [1] : vector<8x8xf32> to vector<8xf32>
    %110 = vector.shape_cast %109 : vector<8xf32> to vector<8x1xf32>
    %111 = arith.maximumf %99, %110 : vector<8x1xf32>
    %112 = arith.subf %99, %111 : vector<8x1xf32>
    %113 = math.exp %112 : vector<8x1xf32>
    %114 = vector.broadcast %111 : vector<8x1xf32> to vector<8x8xf32>
    %115 = arith.subf %108, %114 : vector<8x8xf32>
    %116 = math.exp %115 : vector<8x8xf32>
    %117 = arith.mulf %113, %100 : vector<8x1xf32>
    %cst_43 = arith.constant dense<0.000000e+00> : vector<8xf32>
    %118 = vector.multi_reduction <add>, %116, %cst_43 [1] : vector<8x8xf32> to vector<8xf32>
    %119 = vector.shape_cast %118 : vector<8xf32> to vector<8x1xf32>
    %120 = arith.addf %117, %119 : vector<8x1xf32>
    %121 = vector.broadcast %113 : vector<8x1xf32> to vector<8x8xf32>
    %122 = arith.mulf %121, %101 : vector<8x8xf32>
    %123 = arith.truncf %116 : vector<8x8xf32> to vector<8x8xbf16>
    %cst_44 = arith.constant dense<0.000000e+00> : vector<8x8xf32>
    %124 = tpu.matmul %123, %107, %cst_44 {dimension_numbers = #tpu.dot_dimension_numbers<[1], [0], [0], [1], [0, 0, 1, 1], [], []>} : vector<8x8xbf16>, vector<8x8xbf16>, vector<8x8xf32> -> vector<8x8xf32>
    %125 = arith.addf %122, %124 : vector<8x8xf32>
    %c1_i32_45 = arith.constant 1 : i32
    %126 = vector.broadcast %120 : vector<8x1xf32> to vector<8x8xf32>
    %127 = arith.divf %125, %126 : vector<8x8xf32>
    %128 = arith.truncf %127 : vector<8x8xf32> to vector<8x8xbf16>
    %129 = vector.extract_strided_slice %35 {offsets = [0, 24], sizes = [8, 8], strides = [1, 1]} : vector<8x32xbf16> to vector<8x8xbf16>
    %cst_46 = arith.constant 0xFF800000 : f32
    %130 = vector.broadcast %cst_46 : f32 to vector<8x1xf32>
    %cst_47 = arith.constant 0.000000e+00 : f32
    %131 = vector.broadcast %cst_47 : f32 to vector<8x1xf32>
    %cst_48 = arith.constant 0.000000e+00 : f32
    %132 = vector.broadcast %cst_48 : f32 to vector<8x8xf32>
    %c0_i32_49 = arith.constant 0 : i32
    %c8_i32_50 = arith.constant 8 : i32
    %133 = arith.muli %c0_i32_49, %c8_i32_50 : i32
    %134 = tpu.assume_multiple %133, 8 : i32
    %135 = arith.index_cast %134 : i32 to index
    %c24 = arith.constant 24 : index
    %136 = vector.load %arg18[%135, %c24] : memref<8x32xbf16, #tpu.memory_space<vmem>>, vector<8x8xbf16>
    %137 = arith.index_cast %134 : i32 to index
    %c24_51 = arith.constant 24 : index
    %138 = vector.load %arg19[%137, %c24_51] : memref<8x32xbf16, #tpu.memory_space<vmem>>, vector<8x8xbf16>
    %cst_52 = arith.constant dense<0.000000e+00> : vector<8x8xf32>
    %139 = tpu.matmul %129, %136, %cst_52 {dimension_numbers = #tpu.dot_dimension_numbers<[1], [1], [0], [0], [0, 0, 1, 0], [], []>} : vector<8x8xbf16>, vector<8x8xbf16>, vector<8x8xf32> -> vector<8x8xf32>
    %cst_53 = arith.constant dense<0xFF800000> : vector<8xf32>
    %140 = vector.multi_reduction <maximumf>, %139, %cst_53 [1] : vector<8x8xf32> to vector<8xf32>
    %141 = vector.shape_cast %140 : vector<8xf32> to vector<8x1xf32>
    %142 = arith.maximumf %130, %141 : vector<8x1xf32>
    %143 = arith.subf %130, %142 : vector<8x1xf32>
    %144 = math.exp %143 : vector<8x1xf32>
    %145 = vector.broadcast %142 : vector<8x1xf32> to vector<8x8xf32>
    %146 = arith.subf %139, %145 : vector<8x8xf32>
    %147 = math.exp %146 : vector<8x8xf32>
    %148 = arith.mulf %144, %131 : vector<8x1xf32>
    %cst_54 = arith.constant dense<0.000000e+00> : vector<8xf32>
    %149 = vector.multi_reduction <add>, %147, %cst_54 [1] : vector<8x8xf32> to vector<8xf32>
    %150 = vector.shape_cast %149 : vector<8xf32> to vector<8x1xf32>
    %151 = arith.addf %148, %150 : vector<8x1xf32>
    %152 = vector.broadcast %144 : vector<8x1xf32> to vector<8x8xf32>
    %153 = arith.mulf %152, %132 : vector<8x8xf32>
    %154 = arith.truncf %147 : vector<8x8xf32> to vector<8x8xbf16>
    %cst_55 = arith.constant dense<0.000000e+00> : vector<8x8xf32>
    %155 = tpu.matmul %154, %138, %cst_55 {dimension_numbers = #tpu.dot_dimension_numbers<[1], [0], [0], [1], [0, 0, 1, 1], [], []>} : vector<8x8xbf16>, vector<8x8xbf16>, vector<8x8xf32> -> vector<8x8xf32>
    %156 = arith.addf %153, %155 : vector<8x8xf32>
    %c1_i32_56 = arith.constant 1 : i32
    %157 = vector.broadcast %151 : vector<8x1xf32> to vector<8x8xf32>
    %158 = arith.divf %156, %157 : vector<8x8xf32>
    %159 = arith.truncf %158 : vector<8x8xf32> to vector<8x8xbf16>
    %160 = tpu.concatenate %66, %97, %128, %159 in 1 : vector<8x8xbf16>, vector<8x8xbf16>, vector<8x8xbf16>, vector<8x8xbf16> -> vector<8x32xbf16>
    %c0_57 = arith.constant 0 : index
    %c0_58 = arith.constant 0 : index
    %161 = vector.load %arg7[%c0_57, %c0_58] : memref<32x32xbf16, #tpu.memory_space<vmem>>, vector<32x32xbf16>
    %cst_59 = arith.constant dense<0.000000e+00> : vector<8x32xf32>
    %162 = tpu.matmul %160, %161, %cst_59 {dimension_numbers = #tpu.dot_dimension_numbers<[1], [0], [0], [1], [0, 0, 1, 1], [], []>} : vector<8x32xbf16>, vector<32x32xbf16>, vector<8x32xf32> -> vector<8x32xf32>
    %c0_60 = arith.constant 0 : index
    %c0_61 = arith.constant 0 : index
    %163 = vector.load %arg8[%c0_60, %c0_61] : memref<1x32xf32, #tpu.memory_space<vmem>>, vector<1x32xf32>
    %164 = vector.broadcast %163 : vector<1x32xf32> to vector<8x32xf32>
    %165 = arith.addf %162, %164 : vector<8x32xf32>
    %166 = arith.addf %8, %165 : vector<8x32xf32>
    %cst_62 = arith.constant dense<0.000000e+00> : vector<8xf32>
    %167 = vector.multi_reduction <add>, %166, %cst_62 [1] : vector<8x32xf32> to vector<8xf32>
    %168 = vector.shape_cast %167 : vector<8xf32> to vector<8x1xf32>
    %cst_63 = arith.constant 3.200000e+01 : f32
    %169 = vector.broadcast %cst_63 : f32 to vector<8x1xf32>
    %170 = arith.divf %168, %169 : vector<8x1xf32>
    %171 = vector.broadcast %170 : vector<8x1xf32> to vector<8x32xf32>
    %172 = arith.subf %166, %171 : vector<8x32xf32>
    %173 = arith.mulf %172, %172 : vector<8x32xf32>
    %cst_64 = arith.constant dense<0.000000e+00> : vector<8xf32>
    %174 = vector.multi_reduction <add>, %173, %cst_64 [1] : vector<8x32xf32> to vector<8xf32>
    %175 = vector.shape_cast %174 : vector<8xf32> to vector<8x1xf32>
    %cst_65 = arith.constant 3.200000e+01 : f32
    %176 = vector.broadcast %cst_65 : f32 to vector<8x1xf32>
    %177 = arith.divf %175, %176 : vector<8x1xf32>
    %cst_66 = arith.constant 9.99999974E-6 : f32
    %178 = vector.broadcast %cst_66 : f32 to vector<8x1xf32>
    %179 = arith.addf %177, %178 : vector<8x1xf32>
    %180 = math.rsqrt %179 : vector<8x1xf32>
    %181 = vector.broadcast %180 : vector<8x1xf32> to vector<8x32xf32>
    %182 = arith.mulf %172, %181 : vector<8x32xf32>
    %c0_67 = arith.constant 0 : index
    %c0_68 = arith.constant 0 : index
    %183 = vector.load %arg9[%c0_67, %c0_68] : memref<1x32xf32, #tpu.memory_space<vmem>>, vector<1x32xf32>
    %184 = vector.broadcast %183 : vector<1x32xf32> to vector<8x32xf32>
    %185 = arith.mulf %182, %184 : vector<8x32xf32>
    %c0_69 = arith.constant 0 : index
    %c0_70 = arith.constant 0 : index
    %186 = vector.load %arg10[%c0_69, %c0_70] : memref<1x32xf32, #tpu.memory_space<vmem>>, vector<1x32xf32>
    %187 = vector.broadcast %186 : vector<1x32xf32> to vector<8x32xf32>
    %188 = arith.addf %185, %187 : vector<8x32xf32>
    %189 = arith.truncf %188 : vector<8x32xf32> to vector<8x32xbf16>
    %cst_71 = arith.constant 0.000000e+00 : f32
    %190 = vector.broadcast %cst_71 : f32 to vector<8x32xf32>
    %c0_i32_72 = arith.constant 0 : i32
    %191 = arith.index_cast %c0_i32_72 : i32 to index
    %c0_73 = arith.constant 0 : index
    %c0_74 = arith.constant 0 : index
    %192 = vector.load %arg11[%191, %c0_73, %c0_74] : memref<1x32x128xbf16, #tpu.memory_space<vmem>>, vector<1x32x128xbf16>
    %193 = vector.shape_cast %192 : vector<1x32x128xbf16> to vector<32x128xbf16>
    %cst_75 = arith.constant dense<0.000000e+00> : vector<8x128xf32>
    %194 = tpu.matmul %189, %193, %cst_75 {dimension_numbers = #tpu.dot_dimension_numbers<[1], [0], [0], [1], [0, 0, 1, 1], [], []>} : vector<8x32xbf16>, vector<32x128xbf16>, vector<8x128xf32> -> vector<8x128xf32>
    %195 = arith.index_cast %c0_i32_72 : i32 to index
    %c0_76 = arith.constant 0 : index
    %c0_77 = arith.constant 0 : index
    %196 = vector.load %arg12[%195, %c0_76, %c0_77] : memref<1x1x128xf32, #tpu.memory_space<vmem>>, vector<1x1x128xf32>
    %197 = vector.shape_cast %196 : vector<1x1x128xf32> to vector<1x128xf32>
    %198 = vector.broadcast %197 : vector<1x128xf32> to vector<8x128xf32>
    %199 = arith.addf %194, %198 : vector<8x128xf32>
    %200 = arith.index_cast %c0_i32_72 : i32 to index
    %c0_78 = arith.constant 0 : index
    %c0_79 = arith.constant 0 : index
    %201 = vector.load %arg13[%200, %c0_78, %c0_79] : memref<1x32x128xbf16, #tpu.memory_space<vmem>>, vector<1x32x128xbf16>
    %202 = vector.shape_cast %201 : vector<1x32x128xbf16> to vector<32x128xbf16>
    %cst_80 = arith.constant dense<0.000000e+00> : vector<8x128xf32>
    %203 = tpu.matmul %189, %202, %cst_80 {dimension_numbers = #tpu.dot_dimension_numbers<[1], [0], [0], [1], [0, 0, 1, 1], [], []>} : vector<8x32xbf16>, vector<32x128xbf16>, vector<8x128xf32> -> vector<8x128xf32>
    %204 = arith.index_cast %c0_i32_72 : i32 to index
    %c0_81 = arith.constant 0 : index
    %c0_82 = arith.constant 0 : index
    %205 = vector.load %arg14[%204, %c0_81, %c0_82] : memref<1x1x128xf32, #tpu.memory_space<vmem>>, vector<1x1x128xf32>
    %206 = vector.shape_cast %205 : vector<1x1x128xf32> to vector<1x128xf32>
    %207 = vector.broadcast %206 : vector<1x128xf32> to vector<8x128xf32>
    %208 = arith.addf %203, %207 : vector<8x128xf32>
    %cst_83 = arith.constant 5.000000e-01 : f32
    %209 = vector.broadcast %cst_83 : f32 to vector<8x128xf32>
    %210 = arith.mulf %209, %208 : vector<8x128xf32>
    %cst_84 = arith.constant 4.471500e-02 : f32
    %211 = vector.broadcast %cst_84 : f32 to vector<8x128xf32>
    %212 = arith.mulf %211, %208 : vector<8x128xf32>
    %213 = arith.mulf %212, %208 : vector<8x128xf32>
    %214 = arith.mulf %213, %208 : vector<8x128xf32>
    %215 = arith.addf %208, %214 : vector<8x128xf32>
    %cst_85 = arith.constant 0.797884583 : f32
    %216 = vector.broadcast %cst_85 : f32 to vector<8x128xf32>
    %217 = arith.mulf %216, %215 : vector<8x128xf32>
    %218 = math.tanh %217 : vector<8x128xf32>
    %cst_86 = arith.constant 1.000000e+00 : f32
    %219 = vector.broadcast %cst_86 : f32 to vector<8x128xf32>
    %220 = arith.addf %219, %218 : vector<8x128xf32>
    %221 = arith.mulf %210, %220 : vector<8x128xf32>
    %222 = arith.mulf %199, %221 : vector<8x128xf32>
    %223 = arith.truncf %222 : vector<8x128xf32> to vector<8x128xbf16>
    %224 = arith.index_cast %c0_i32_72 : i32 to index
    %c0_87 = arith.constant 0 : index
    %c0_88 = arith.constant 0 : index
    %225 = vector.load %arg15[%224, %c0_87, %c0_88] : memref<1x128x32xbf16, #tpu.memory_space<vmem>>, vector<1x128x32xbf16>
    %226 = vector.shape_cast %225 : vector<1x128x32xbf16> to vector<128x32xbf16>
    %cst_89 = arith.constant dense<0.000000e+00> : vector<8x32xf32>
    %227 = tpu.matmul %223, %226, %cst_89 {dimension_numbers = #tpu.dot_dimension_numbers<[1], [0], [0], [1], [0, 0, 1, 1], [], []>} : vector<8x128xbf16>, vector<128x32xbf16>, vector<8x32xf32> -> vector<8x32xf32>
    %228 = arith.addf %190, %227 : vector<8x32xf32>
    %c1_i32_90 = arith.constant 1 : i32
    %229 = arith.addf %166, %228 : vector<8x32xf32>
    %c0_91 = arith.constant 0 : index
    %c0_92 = arith.constant 0 : index
    %230 = vector.load %arg16[%c0_91, %c0_92] : memref<1x32xf32, #tpu.memory_space<vmem>>, vector<1x32xf32>
    %231 = vector.broadcast %230 : vector<1x32xf32> to vector<8x32xf32>
    %232 = arith.addf %229, %231 : vector<8x32xf32>
    %233 = arith.truncf %232 : vector<8x32xf32> to vector<8x32xbf16>
    %c0_93 = arith.constant 0 : index
    %c0_94 = arith.constant 0 : index
    %c0_95 = arith.constant 0 : index
    %234 = vector.load %arg17[%c0_93, %c0_94, %c0_95] : memref<1x8x32xbf16, #tpu.memory_space<vmem>>, vector<1x8x32xbf16>
    %235 = vector.shape_cast %234 : vector<1x8x32xbf16> to vector<8x32xbf16>
    %236 = vector.shape_cast %233 : vector<8x32xbf16> to vector<1x8x32xbf16>
    tpu.vector_store %arg17[%c0_93, %c0_94, %c0_95], %236 {strides = array<i32>} : memref<1x8x32xbf16, #tpu.memory_space<vmem>>, vector<1x8x32xbf16>,
    return
  }
  func.func @transform_0(%arg0: i32, %arg1: i32) -> (i32, i32, i32) {
    %c0_i32 = arith.constant 0 : i32
    %c0_i32_0 = arith.constant 0 : i32
    %c0_i32_1 = arith.constant 0 : i32
    return %arg0, %c0_i32, %c0_i32_0 : i32, i32, i32
  }
  func.func @transform_1(%arg0: i32, %arg1: i32) -> (i32, i32) {
    %c0_i32 = arith.constant 0 : i32
    %c0_i32_0 = arith.constant 0 : i32
    %c0_i32_1 = arith.constant 0 : i32
    return %c0_i32, %c0_i32_0 : i32, i32
  }
  func.func @transform_2(%arg0: i32, %arg1: i32) -> (i32, i32) {
    %c0_i32 = arith.constant 0 : i32
    %c0_i32_0 = arith.constant 0 : i32
    %c0_i32_1 = arith.constant 0 : i32
    return %c0_i32, %c0_i32_0 : i32, i32
  }
  func.func @transform_3(%arg0: i32, %arg1: i32) -> (i32, i32) {
    %c0_i32 = arith.constant 0 : i32
    %c0_i32_0 = arith.constant 0 : i32
    %c0_i32_1 = arith.constant 0 : i32
    return %c0_i32, %c0_i32_0 : i32, i32
  }
  func.func @transform_4(%arg0: i32, %arg1: i32) -> (i32, i32) {
    %c0_i32 = arith.constant 0 : i32
    %c0_i32_0 = arith.constant 0 : i32
    %c0_i32_1 = arith.constant 0 : i32
    return %c0_i32, %c0_i32_0 : i32, i32
  }
  func.func @transform_5(%arg0: i32, %arg1: i32) -> (i32, i32) {
    %c0_i32 = arith.constant 0 : i32
    %c0_i32_0 = arith.constant 0 : i32
    %c0_i32_1 = arith.constant 0 : i32
    return %c0_i32, %c0_i32_0 : i32, i32
  }
  func.func @transform_6(%arg0: i32, %arg1: i32) -> (i32, i32) {
    %c0_i32 = arith.constant 0 : i32
    %c0_i32_0 = arith.constant 0 : i32
    %c0_i32_1 = arith.constant 0 : i32
    return %c0_i32, %c0_i32_0 : i32, i32
  }
  func.func @transform_7(%arg0: i32, %arg1: i32) -> (i32, i32) {
    %c0_i32 = arith.constant 0 : i32
    %c0_i32_0 = arith.constant 0 : i32
    %c0_i32_1 = arith.constant 0 : i32
    return %c0_i32, %c0_i32_0 : i32, i32
  }
  func.func @transform_8(%arg0: i32, %arg1: i32) -> (i32, i32) {
    %c0_i32 = arith.constant 0 : i32
    %c0_i32_0 = arith.constant 0 : i32
    %c0_i32_1 = arith.constant 0 : i32
    return %c0_i32, %c0_i32_0 : i32, i32
  }
  func.func @transform_9(%arg0: i32, %arg1: i32) -> (i32, i32, i32) {
    %c0_i32 = arith.constant 0 : i32
    %c0_i32_0 = arith.constant 0 : i32
    %c0_i32_1 = arith.constant 0 : i32
    %c0_i32_2 = arith.constant 0 : i32
    return %c0_i32, %c0_i32_0, %c0_i32_1 : i32, i32, i32
  }
  func.func @transform_10(%arg0: i32, %arg1: i32) -> (i32, i32, i32) {
    %c0_i32 = arith.constant 0 : i32
    %c0_i32_0 = arith.constant 0 : i32
    %c0_i32_1 = arith.constant 0 : i32
    %c0_i32_2 = arith.constant 0 : i32
    return %c0_i32, %c0_i32_0, %c0_i32_1 : i32, i32, i32
  }
  func.func @transform_11(%arg0: i32, %arg1: i32) -> (i32, i32, i32) {
    %c0_i32 = arith.constant 0 : i32
    %c0_i32_0 = arith.constant 0 : i32
    %c0_i32_1 = arith.constant 0 : i32
    %c0_i32_2 = arith.constant 0 : i32
    return %c0_i32, %c0_i32_0, %c0_i32_1 : i32, i32, i32
  }
  func.func @transform_12(%arg0: i32, %arg1: i32) -> (i32, i32, i32) {
    %c0_i32 = arith.constant 0 : i32
    %c0_i32_0 = arith.constant 0 : i32
    %c0_i32_1 = arith.constant 0 : i32
    %c0_i32_2 = arith.constant 0 : i32
    return %c0_i32, %c0_i32_0, %c0_i32_1 : i32, i32, i32
  }
  func.func @transform_13(%arg0: i32, %arg1: i32) -> (i32, i32, i32) {
    %c0_i32 = arith.constant 0 : i32
    %c0_i32_0 = arith.constant 0 : i32
    %c0_i32_1 = arith.constant 0 : i32
    %c0_i32_2 = arith.constant 0 : i32
    return %c0_i32, %c0_i32_0, %c0_i32_1 : i32, i32, i32
  }
  func.func @transform_14(%arg0: i32, %arg1: i32) -> (i32, i32) {
    %c0_i32 = arith.constant 0 : i32
    %c0_i32_0 = arith.constant 0 : i32
    %c0_i32_1 = arith.constant 0 : i32
    return %c0_i32, %c0_i32_0 : i32, i32
  }
  func.func @transform_15(%arg0: i32, %arg1: i32) -> (i32, i32, i32) {
    %c0_i32 = arith.constant 0 : i32
    %c0_i32_0 = arith.constant 0 : i32
    return %arg0, %arg1, %c0_i32 : i32, i32, i32
  }
}

module attributes {stable_mosaic.version = 11 : i64} {
  func.func @kernel(%arg0: i32, %arg1: i32, %arg2: memref<1x8x32xbf16, #tpu.memory_space<vmem>>, %arg3: memref<1x32xf32, #tpu.memory_space<vmem>>, %arg4: memref<1x32xf32, #tpu.memory_space<vmem>>, %arg5: memref<32x32xbf16, #tpu.memory_space<vmem>>, %arg6: memref<32x64xbf16, #tpu.memory_space<vmem>>, %arg7: memref<32x32xbf16, #tpu.memory_space<vmem>>, %arg8: memref<1x32xf32, #tpu.memory_space<vmem>>, %arg9: memref<1x32xf32, #tpu.memory_space<vmem>>, %arg10: memref<1x32xf32, #tpu.memory_space<vmem>>, %arg11: memref<1x32x128xbf16, #tpu.memory_space<vmem>>, %arg12: memref<1x1x128xf32, #tpu.memory_space<vmem>>, %arg13: memref<1x32x128xbf16, #tpu.memory_space<vmem>>, %arg14: memref<1x1x128xf32, #tpu.memory_space<vmem>>, %arg15: memref<1x128x32xbf16, #tpu.memory_space<vmem>>, %arg16: memref<1x32xf32, #tpu.memory_space<vmem>>, %arg17: memref<1x8x32xbf16, #tpu.memory_space<vmem>>, %arg18: memref<8x32xbf16, #tpu.memory_space<vmem>>, %arg19: memref<8x32xbf16, #tpu.memory_space<vmem>>) attributes {dimension_semantics = [#tpu.dimension_semantics<parallel>, #tpu.dimension_semantics<arbitrary>], iteration_bounds = array<i64: 2, 1>, scalar_prefetch = 0 : i64, scratch_operands = 2 : i64, tpu.core_type = #tpu.core_type<tc>, window_params = [{transform_indices = @transform_0, window_bounds = array<i64: 1, 8, 32>}, {pipeline_mode = #tpu.pipeline_mode<synchronous>, transform_indices = @transform_1, window_bounds = array<i64: 1, 32>}, {pipeline_mode = #tpu.pipeline_mode<synchronous>, transform_indices = @transform_2, window_bounds = array<i64: 1, 32>}, {pipeline_mode = #tpu.pipeline_mode<synchronous>, transform_indices = @transform_3, window_bounds = array<i64: 32, 32>}, {pipeline_mode = #tpu.pipeline_mode<synchronous>, transform_indices = @transform_4, window_bounds = array<i64: 32, 64>}, {pipeline_mode = #tpu.pipeline_mode<synchronous>, transform_indices = @transform_5, window_bounds = array<i64: 32, 32>}, {pipeline_mode = #tpu.pipeline_mode<synchronous>, transform_indices = @transform_6, window_bounds = array<i64: 1, 32>}, {pipeline_mode = #tpu.pipeline_mode<synchronous>, transform_indices = @transform_7, window_bounds = array<i64: 1, 32>}, {pipeline_mode = #tpu.pipeline_mode<synchronous>, transform_indices = @transform_8, window_bounds = array<i64: 1, 32>}, {pipeline_mode = #tpu.pipeline_mode<synchronous>, transform_indices = @transform_9, window_bounds = array<i64: 1, 32, 128>}, {pipeline_mode = #tpu.pipeline_mode<synchronous>, transform_indices = @transform_10, window_bounds = array<i64: 1, 1, 128>}, {pipeline_mode = #tpu.pipeline_mode<synchronous>, transform_indices = @transform_11, window_bounds = array<i64: 1, 32, 128>}, {pipeline_mode = #tpu.pipeline_mode<synchronous>, transform_indices = @transform_12, window_bounds = array<i64: 1, 1, 128>}, {pipeline_mode = #tpu.pipeline_mode<synchronous>, transform_indices = @transform_13, window_bounds = array<i64: 1, 128, 32>}, {pipeline_mode = #tpu.pipeline_mode<synchronous>, transform_indices = @transform_14, window_bounds = array<i64: 1, 32>}, {transform_indices = @transform_15, window_bounds = array<i64: 1, 8, 32>}]} {
    %c0_i32 = arith.constant 0 : i32
    %0 = arith.cmpi eq, %arg1, %c0_i32 : i32
    %1 = arith.extui %0 : i1 to i32
    %c0_i32_0 = arith.constant 0 : i32
    %2 = arith.cmpi ne, %1, %c0_i32_0 : i32
    scf.if %2 {
      %c0_i32_96 = arith.constant 0 : i32
      %c8_i32_97 = arith.constant 8 : i32
      %237 = arith.muli %c0_i32_96, %c8_i32_97 : i32
      %238 = tpu.assume_multiple %237, 8 : i32
      %c0_98 = arith.constant 0 : index
      %239 = arith.index_cast %238 : i32 to index
      %c0_99 = arith.constant 0 : index
      %240 = vector.load %arg2[%c0_98, %239, %c0_99] : memref<1x8x32xbf16, #tpu.memory_space<vmem>>, vector<1x8x32xbf16>
      %241 = vector.shape_cast %240 : vector<1x8x32xbf16> to vector<8x32xbf16>
      %242 = arith.extf %241 : vector<8x32xbf16> to vector<8x32xf32>
      %cst_100 = arith.constant dense<0.000000e+00> : vector<8xf32>
      %243 = vector.multi_reduction <add>, %242, %cst_100 [1] : vector<8x32xf32> to vector<8xf32>
      %244 = vector.shape_cast %243 : vector<8xf32> to vector<8x1xf32>
      %cst_101 = arith.constant 3.200000e+01 : f32
      %245 = vector.broadcast %cst_101 : f32 to vector<8x1xf32>
      %246 = arith.divf %244, %245 : vector<8x1xf32>
      %247 = vector.broadcast %246 : vector<8x1xf32> to vector<8x32xf32>
      %248 = arith.subf %242, %247 : vector<8x32xf32>
      %249 = arith.mulf %248, %248 : vector<8x32xf32>
      %cst_102 = arith.constant dense<0.000000e+00> : vector<8xf32>
      %250 = vector.multi_reduction <add>, %249, %cst_102 [1] : vector<8x32xf32> to vector<8xf32>
      %251 = vector.shape_cast %250 : vector<8xf32> to vector<8x1xf32>
      %cst_103 = arith.constant 3.200000e+01 : f32
      %252 = vector.broadcast %cst_103 : f32 to vector<8x1xf32>
      %253 = arith.divf %251, %252 : vector<8x1xf32>
      %cst_104 = arith.constant 9.99999974E-6 : f32
      %254 = vector.broadcast %cst_104 : f32 to vector<8x1xf32>
      %255 = arith.addf %253, %254 : vector<8x1xf32>
      %256 = math.rsqrt %255 : vector<8x1xf32>
      %257 = vector.broadcast %256 : vector<8x1xf32> to vector<8x32xf32>
      %258 = arith.mulf %248, %257 : vector<8x32xf32>
      %c0_105 = arith.constant 0 : index
      %c0_106 = arith.constant 0 : index
      %259 = vector.load %arg3[%c0_105, %c0_106] : memref<1x32xf32, #tpu.memory_space<vmem>>, vector<1x32xf32>
      %260 = vector.broadcast %259 : vector<1x32xf32> to vector<8x32xf32>
      %261 = arith.mulf %258, %260 : vector<8x32xf32>
      %c0_107 = arith.constant 0 : index
      %c0_108 = arith.constant 0 : index
      %262 = vector.load %arg4[%c0_107, %c0_108] : memref<1x32xf32, #tpu.memory_space<vmem>>, vector<1x32xf32>
      %263 = vector.broadcast %262 : vector<1x32xf32> to vector<8x32xf32>
      %264 = arith.addf %261, %263 : vector<8x32xf32>
      %265 = arith.truncf %264 : vector<8x32xf32> to vector<8x32xbf16>
      %c0_109 = arith.constant 0 : index
      %c0_110 = arith.constant 0 : index
      %266 = vector.load %arg6[%c0_109, %c0_110] : memref<32x64xbf16, #tpu.memory_space<vmem>>, vector<32x64xbf16>
      %cst_111 = arith.constant dense<0.000000e+00> : vector<8x64xf32>
      %267 = tpu.matmul %265, %266, %cst_111 {dimension_numbers = #tpu.dot_dimension_numbers<[1], [0], [0], [1], [0, 0, 1, 1], [], []>} : vector<8x32xbf16>, vector<32x64xbf16>, vector<8x64xf32> -> vector<8x64xf32>
      %268 = vector.extract_strided_slice %267 {offsets = [0, 0], sizes = [8, 32], strides = [1, 1]} : vector<8x64xf32> to vector<8x32xf32>
      %269 = arith.truncf %268 : vector<8x32xf32> to vector<8x32xbf16>
      %270 = arith.index_cast %238 : i32 to index
      %c0_112 = arith.constant 0 : index
      %271 = vector.load %arg18[%270, %c0_112] : memref<8x32xbf16, #tpu.memory_space<vmem>>, vector<8x32xbf16>
      tpu.vector_store %arg18[%270, %c0_112], %269 {strides = array<i32>} : memref<8x32xbf16, #tpu.memory_space<vmem>>, vector<8x32xbf16>,
      %272 = vector.extract_strided_slice %267 {offsets = [0, 32], sizes = [8, 32], strides = [1, 1]} : vector<8x64xf32> to vector<8x32xf32>
      %273 = arith.truncf %272 : vector<8x32xf32> to vector<8x32xbf16>
      %274 = arith.index_cast %238 : i32 to index
      %c0_113 = arith.constant 0 : index
      %275 = vector.load %arg19[%274, %c0_113] : memref<8x32xbf16, #tpu.memory_space<vmem>>, vector<8x32xbf16>
      tpu.vector_store %arg19[%274, %c0_113], %273 {strides = array<i32>} : memref<8x32xbf16, #tpu.memory_space<vmem>>, vector<8x32xbf16>,
      %c1_i32_114 = arith.constant 1 : i32
    } else {
    }
    %c8_i32 = arith.constant 8 : i32
    %3 = arith.muli %arg1, %c8_i32 : i32
    %4 = tpu.assume_multiple %3, 8 : i32
    %c0 = arith.constant 0 : index
    %5 = arith.index_cast %4 : i32 to index
    %c0_1 = arith.constant 0 : index
    %6 = vector.load %arg2[%c0, %5, %c0_1] : memref<1x8x32xbf16, #tpu.memory_space<vmem>>, vector<1x8x32xbf16>
    %7 = vector.shape_cast %6 : vector<1x8x32xbf16> to vector<8x32xbf16>
    %8 = arith.extf %7 : vector<8x32xbf16> to vector<8x32xf32>
    %9 = arith.extf %7 : vector<8x32xbf16> to vector<8x32xf32>
    %cst = arith.constant dense<0.000000e+00> : vector<8xf32>
    %10 = vector.multi_reduction <add>, %9, %cst [1] : vector<8x32xf32> to vector<8xf32>
    %11 = vector.shape_cast %10 : vector<8xf32> to vector<8x1xf32>
    %cst_2 = arith.constant 3.200000e+01 : f32
    %12 = vector.broadcast %cst_2 : f32 to vector<8x1xf32>
    %13 = arith.divf %11, %12 : vector<8x1xf32>
    %14 = vector.broadcast %13 : vector<8x1xf32> to vector<8x32xf32>
    %15 = arith.subf %9, %14 : vector<8x32xf32>
    %16 = arith.mulf %15, %15 : vector<8x32xf32>
    %cst_3 = arith.constant dense<0.000000e+00> : vector<8xf32>
    %17 = vector.multi_reduction <add>, %16, %cst_3 [1] : vector<8x32xf32> to vector<8xf32>
    %18 = vector.shape_cast %17 : vector<8xf32> to vector<8x1xf32>
    %cst_4 = arith.constant 3.200000e+01 : f32
    %19 = vector.broadcast %cst_4 : f32 to vector<8x1xf32>
    %20 = arith.divf %18, %19 : vector<8x1xf32>
    %cst_5 = arith.constant 9.99999974E-6 : f32
    %21 = vector.broadcast %cst_5 : f32 to vector<8x1xf32>
    %22 = arith.addf %20, %21 : vector<8x1xf32>
    %23 = math.rsqrt %22 : vector<8x1xf32>
    %24 = vector.broadcast %23 : vector<8x1xf32> to vector<8x32xf32>
    %25 = arith.mulf %15, %24 : vector<8x32xf32>
    %c0_6 = arith.constant 0 : index
    %c0_7 = arith.constant 0 : index
    %26 = vector.load %arg3[%c0_6, %c0_7] : memref<1x32xf32, #tpu.memory_space<vmem>>, vector<1x32xf32>
    %27 = vector.broadcast %26 : vector<1x32xf32> to vector<8x32xf32>
    %28 = arith.mulf %25, %27 : vector<8x32xf32>
    %c0_8 = arith.constant 0 : index
    %c0_9 = arith.constant 0 : index
    %29 = vector.load %arg4[%c0_8, %c0_9] : memref<1x32xf32, #tpu.memory_space<vmem>>, vector<1x32xf32>
    %30 = vector.broadcast %29 : vector<1x32xf32> to vector<8x32xf32>
    %31 = arith.addf %28, %30 : vector<8x32xf32>
    %32 = arith.truncf %31 : vector<8x32xf32> to vector<8x32xbf16>
    %c0_10 = arith.constant 0 : index
    %c0_11 = arith.constant 0 : index
    %33 = vector.load %arg5[%c0_10, %c0_11] : memref<32x32xbf16, #tpu.memory_space<vmem>>, vector<32x32xbf16>
    %cst_12 = arith.constant dense<0.000000e+00> : vector<8x32xf32>
    %34 = tpu.matmul %32, %33, %cst_12 {dimension_numbers = #tpu.dot_dimension_numbers<[1], [0], [0], [1], [0, 0, 1, 1], [], []>} : vector<8x32xbf16>, vector<32x32xbf16>, vector<8x32xf32> -> vector<8x32xf32>
    %35 = arith.truncf %34 : vector<8x32xf32> to vector<8x32xbf16>
    %36 = vector.extract_strided_slice %35 {offsets = [0, 0], sizes = [8, 8], strides = [1, 1]} : vector<8x32xbf16> to vector<8x8xbf16>
    %cst_13 = arith.constant 0xFF800000 : f32
    %37 = vector.broadcast %cst_13 : f32 to vector<8x1xf32>
    %cst_14 = arith.constant 0.000000e+00 : f32
    %38 = vector.broadcast %cst_14 : f32 to vector<8x1xf32>
    %cst_15 = arith.constant 0.000000e+00 : f32
    %39 = vector.broadcast %cst_15 : f32 to vector<8x8xf32>
    %c0_i32_16 = arith.constant 0 : i32
    %c8_i32_17 = arith.constant 8 : i32
    %40 = arith.muli %c0_i32_16, %c8_i32_17 : i32
    %41 = tpu.assume_multiple %40, 8 : i32
    %42 = arith.index_cast %41 : i32 to index
    %c0_18 = arith.constant 0 : index
    %43 = vector.load %arg18[%42, %c0_18] : memref<8x32xbf16, #tpu.memory_space<vmem>>, vector<8x8xbf16>
    %44 = arith.index_cast %41 : i32 to index
    %c0_19 = arith.constant 0 : index
    %45 = vector.load %arg19[%44, %c0_19] : memref<8x32xbf16, #tpu.memory_space<vmem>>, vector<8x8xbf16>
    %cst_20 = arith.constant dense<0.000000e+00> : vector<8x8xf32>
    %46 = tpu.matmul %36, %43, %cst_20 {dimension_numbers = #tpu.dot_dimension_numbers<[1], [1], [0], [0], [0, 0, 1, 0], [], []>} : vector<8x8xbf16>, vector<8x8xbf16>, vector<8x8xf32> -> vector<8x8xf32>
    %cst_21 = arith.constant dense<0xFF800000> : vector<8xf32>
    %47 = vector.multi_reduction <maximumf>, %46, %cst_21 [1] : vector<8x8xf32> to vector<8xf32>
    %48 = vector.shape_cast %47 : vector<8xf32> to vector<8x1xf32>
    %49 = arith.maximumf %37, %48 : vector<8x1xf32>
    %50 = arith.subf %37, %49 : vector<8x1xf32>
    %51 = math.exp %50 : vector<8x1xf32>
    %52 = vector.broadcast %49 : vector<8x1xf32> to vector<8x8xf32>
    %53 = arith.subf %46, %52 : vector<8x8xf32>
    %54 = math.exp %53 : vector<8x8xf32>
    %55 = arith.mulf %51, %38 : vector<8x1xf32>
    %cst_22 = arith.constant dense<0.000000e+00> : vector<8xf32>
    %56 = vector.multi_reduction <add>, %54, %cst_22 [1] : vector<8x8xf32> to vector<8xf32>
    %57 = vector.shape_cast %56 : vector<8xf32> to vector<8x1xf32>
    %58 = arith.addf %55, %57 : vector<8x1xf32>
    %59 = vector.broadcast %51 : vector<8x1xf32> to vector<8x8xf32>
    %60 = arith.mulf %59, %39 : vector<8x8xf32>
    %61 = arith.truncf %54 : vector<8x8xf32> to vector<8x8xbf16>
    %cst_23 = arith.constant dense<0.000000e+00> : vector<8x8xf32>
    %62 = tpu.matmul %61, %45, %cst_23 {dimension_numbers = #tpu.dot_dimension_numbers<[1], [0], [0], [1], [0, 0, 1, 1], [], []>} : vector<8x8xbf16>, vector<8x8xbf16>, vector<8x8xf32> -> vector<8x8xf32>
    %63 = arith.addf %60, %62 : vector<8x8xf32>
    %c1_i32 = arith.constant 1 : i32
    %64 = vector.broadcast %58 : vector<8x1xf32> to vector<8x8xf32>
    %65 = arith.divf %63, %64 : vector<8x8xf32>
    %66 = arith.truncf %65 : vector<8x8xf32> to vector<8x8xbf16>
    %67 = vector.extract_strided_slice %35 {offsets = [0, 8], sizes = [8, 8], strides = [1, 1]} : vector<8x32xbf16> to vector<8x8xbf16>
    %cst_24 = arith.constant 0xFF800000 : f32
    %68 = vector.broadcast %cst_24 : f32 to vector<8x1xf32>
    %cst_25 = arith.constant 0.000000e+00 : f32
    %69 = vector.broadcast %cst_25 : f32 to vector<8x1xf32>
    %cst_26 = arith.constant 0.000000e+00 : f32
    %70 = vector.broadcast %cst_26 : f32 to vector<8x8xf32>
    %c0_i32_27 = arith.constant 0 : i32
    %c8_i32_28 = arith.constant 8 : i32
    %71 = arith.muli %c0_i32_27, %c8_i32_28 : i32
    %72 = tpu.assume_multiple %71, 8 : i32
    %73 = arith.index_cast %72 : i32 to index
    %c8 = arith.constant 8 : index
    %74 = vector.load %arg18[%73, %c8] : memref<8x32xbf16, #tpu.memory_space<vmem>>, vector<8x8xbf16>
    %75 = arith.index_cast %72 : i32 to index
    %c8_29 = arith.constant 8 : index
    %76 = vector.load %arg19[%75, %c8_29] : memref<8x32xbf16, #tpu.memory_space<vmem>>, vector<8x8xbf16>
    %cst_30 = arith.constant dense<0.000000e+00> : vector<8x8xf32>
    %77 = tpu.matmul %67, %74, %cst_30 {dimension_numbers = #tpu.dot_dimension_numbers<[1], [1], [0], [0], [0, 0, 1, 0], [], []>} : vector<8x8xbf16>, vector<8x8xbf16>, vector<8x8xf32> -> vector<8x8xf32>
    %cst_31 = arith.constant dense<0xFF800000> : vector<8xf32>
    %78 = vector.multi_reduction <maximumf>, %77, %cst_31 [1] : vector<8x8xf32> to vector<8xf32>
    %79 = vector.shape_cast %78 : vector<8xf32> to vector<8x1xf32>
    %80 = arith.maximumf %68, %79 : vector<8x1xf32>
    %81 = arith.subf %68, %80 : vector<8x1xf32>
    %82 = math.exp %81 : vector<8x1xf32>
    %83 = vector.broadcast %80 : vector<8x1xf32> to vector<8x8xf32>
    %84 = arith.subf %77, %83 : vector<8x8xf32>
    %85 = math.exp %84 : vector<8x8xf32>
    %86 = arith.mulf %82, %69 : vector<8x1xf32>
    %cst_32 = arith.constant dense<0.000000e+00> : vector<8xf32>
    %87 = vector.multi_reduction <add>, %85, %cst_32 [1] : vector<8x8xf32> to vector<8xf32>
    %88 = vector.shape_cast %87 : vector<8xf32> to vector<8x1xf32>
    %89 = arith.addf %86, %88 : vector<8x1xf32>
    %90 = vector.broadcast %82 : vector<8x1xf32> to vector<8x8xf32>
    %91 = arith.mulf %90, %70 : vector<8x8xf32>
    %92 = arith.truncf %85 : vector<8x8xf32> to vector<8x8xbf16>
    %cst_33 = arith.constant dense<0.000000e+00> : vector<8x8xf32>
    %93 = tpu.matmul %92, %76, %cst_33 {dimension_numbers = #tpu.dot_dimension_numbers<[1], [0], [0], [1], [0, 0, 1, 1], [], []>} : vector<8x8xbf16>, vector<8x8xbf16>, vector<8x8xf32> -> vector<8x8xf32>
    %94 = arith.addf %91, %93 : vector<8x8xf32>
    %c1_i32_34 = arith.constant 1 : i32
    %95 = vector.broadcast %89 : vector<8x1xf32> to vector<8x8xf32>
    %96 = arith.divf %94, %95 : vector<8x8xf32>
    %97 = arith.truncf %96 : vector<8x8xf32> to vector<8x8xbf16>
    %98 = vector.extract_strided_slice %35 {offsets = [0, 16], sizes = [8, 8], strides = [1, 1]} : vector<8x32xbf16> to vector<8x8xbf16>
    %cst_35 = arith.constant 0xFF800000 : f32
    %99 = vector.broadcast %cst_35 : f32 to vector<8x1xf32>
    %cst_36 = arith.constant 0.000000e+00 : f32
    %100 = vector.broadcast %cst_36 : f32 to vector<8x1xf32>
    %cst_37 = arith.constant 0.000000e+00 : f32
    %101 = vector.broadcast %cst_37 : f32 to vector<8x8xf32>
    %c0_i32_38 = arith.constant 0 : i32
    %c8_i32_39 = arith.constant 8 : i32
    %102 = arith.muli %c0_i32_38, %c8_i32_39 : i32
    %103 = tpu.assume_multiple %102, 8 : i32
    %104 = arith.index_cast %103 : i32 to index
    %c16 = arith.constant 16 : index
    %105 = vector.load %arg18[%104, %c16] : memref<8x32xbf16, #tpu.memory_space<vmem>>, vector<8x8xbf16>
    %106 = arith.index_cast %103 : i32 to index
    %c16_40 = arith.constant 16 : index
    %107 = vector.load %arg19[%106, %c16_40] : memref<8x32xbf16, #tpu.memory_space<vmem>>, vector<8x8xbf16>
    %cst_41 = arith.constant dense<0.000000e+00> : vector<8x8xf32>
    %108 = tpu.matmul %98, %105, %cst_41 {dimension_numbers = #tpu.dot_dimension_numbers<[1], [1], [0], [0], [0, 0, 1, 0], [], []>} : vector<8x8xbf16>, vector<8x8xbf16>, vector<8x8xf32> -> vector<8x8xf32>
    %cst_42 = arith.constant dense<0xFF800000> : vector<8xf32>
    %109 = vector.multi_reduction <maximumf>, %108, %cst_42 [1] : vector<8x8xf32> to vector<8xf32>
    %110 = vector.shape_cast %109 : vector<8xf32> to vector<8x1xf32>
    %111 = arith.maximumf %99, %110 : vector<8x1xf32>
    %112 = arith.subf %99, %111 : vector<8x1xf32>
    %113 = math.exp %112 : vector<8x1xf32>
    %114 = vector.broadcast %111 : vector<8x1xf32> to vector<8x8xf32>
    %115 = arith.subf %108, %114 : vector<8x8xf32>
    %116 = math.exp %115 : vector<8x8xf32>
    %117 = arith.mulf %113, %100 : vector<8x1xf32>
    %cst_43 = arith.constant dense<0.000000e+00> : vector<8xf32>
    %118 = vector.multi_reduction <add>, %116, %cst_43 [1] : vector<8x8xf32> to vector<8xf32>
    %119 = vector.shape_cast %118 : vector<8xf32> to vector<8x1xf32>
    %120 = arith.addf %117, %119 : vector<8x1xf32>
    %121 = vector.broadcast %113 : vector<8x1xf32> to vector<8x8xf32>
    %122 = arith.mulf %121, %101 : vector<8x8xf32>
    %123 = arith.truncf %116 : vector<8x8xf32> to vector<8x8xbf16>
    %cst_44 = arith.constant dense<0.000000e+00> : vector<8x8xf32>
    %124 = tpu.matmul %123, %107, %cst_44 {dimension_numbers = #tpu.dot_dimension_numbers<[1], [0], [0], [1], [0, 0, 1, 1], [], []>} : vector<8x8xbf16>, vector<8x8xbf16>, vector<8x8xf32> -> vector<8x8xf32>
    %125 = arith.addf %122, %124 : vector<8x8xf32>
    %c1_i32_45 = arith.constant 1 : i32
    %126 = vector.broadcast %120 : vector<8x1xf32> to vector<8x8xf32>
    %127 = arith.divf %125, %126 : vector<8x8xf32>
    %128 = arith.truncf %127 : vector<8x8xf32> to vector<8x8xbf16>
    %129 = vector.extract_strided_slice %35 {offsets = [0, 24], sizes = [8, 8], strides = [1, 1]} : vector<8x32xbf16> to vector<8x8xbf16>
    %cst_46 = arith.constant 0xFF800000 : f32
    %130 = vector.broadcast %cst_46 : f32 to vector<8x1xf32>
    %cst_47 = arith.constant 0.000000e+00 : f32
    %131 = vector.broadcast %cst_47 : f32 to vector<8x1xf32>
    %cst_48 = arith.constant 0.000000e+00 : f32
    %132 = vector.broadcast %cst_48 : f32 to vector<8x8xf32>
    %c0_i32_49 = arith.constant 0 : i32
    %c8_i32_50 = arith.constant 8 : i32
    %133 = arith.muli %c0_i32_49, %c8_i32_50 : i32
    %134 = tpu.assume_multiple %133, 8 : i32
    %135 = arith.index_cast %134 : i32 to index
    %c24 = arith.constant 24 : index
    %136 = vector.load %arg18[%135, %c24] : memref<8x32xbf16, #tpu.memory_space<vmem>>, vector<8x8xbf16>
    %137 = arith.index_cast %134 : i32 to index
    %c24_51 = arith.constant 24 : index
    %138 = vector.load %arg19[%137, %c24_51] : memref<8x32xbf16, #tpu.memory_space<vmem>>, vector<8x8xbf16>
    %cst_52 = arith.constant dense<0.000000e+00> : vector<8x8xf32>
    %139 = tpu.matmul %129, %136, %cst_52 {dimension_numbers = #tpu.dot_dimension_numbers<[1], [1], [0], [0], [0, 0, 1, 0], [], []>} : vector<8x8xbf16>, vector<8x8xbf16>, vector<8x8xf32> -> vector<8x8xf32>
    %cst_53 = arith.constant dense<0xFF800000> : vector<8xf32>
    %140 = vector.multi_reduction <maximumf>, %139, %cst_53 [1] : vector<8x8xf32> to vector<8xf32>
    %141 = vector.shape_cast %140 : vector<8xf32> to vector<8x1xf32>
    %142 = arith.maximumf %130, %141 : vector<8x1xf32>
    %143 = arith.subf %130, %142 : vector<8x1xf32>
    %144 = math.exp %143 : vector<8x1xf32>
    %145 = vector.broadcast %142 : vector<8x1xf32> to vector<8x8xf32>
    %146 = arith.subf %139, %145 : vector<8x8xf32>
    %147 = math.exp %146 : vector<8x8xf32>
    %148 = arith.mulf %144, %131 : vector<8x1xf32>
    %cst_54 = arith.constant dense<0.000000e+00> : vector<8xf32>
    %149 = vector.multi_reduction <add>, %147, %cst_54 [1] : vector<8x8xf32> to vector<8xf32>
    %150 = vector.shape_cast %149 : vector<8xf32> to vector<8x1xf32>
    %151 = arith.addf %148, %150 : vector<8x1xf32>
    %152 = vector.broadcast %144 : vector<8x1xf32> to vector<8x8xf32>
    %153 = arith.mulf %152, %132 : vector<8x8xf32>
    %154 = arith.truncf %147 : vector<8x8xf32> to vector<8x8xbf16>
    %cst_55 = arith.constant dense<0.000000e+00> : vector<8x8xf32>
    %155 = tpu.matmul %154, %138, %cst_55 {dimension_numbers = #tpu.dot_dimension_numbers<[1], [0], [0], [1], [0, 0, 1, 1], [], []>} : vector<8x8xbf16>, vector<8x8xbf16>, vector<8x8xf32> -> vector<8x8xf32>
    %156 = arith.addf %153, %155 : vector<8x8xf32>
    %c1_i32_56 = arith.constant 1 : i32
    %157 = vector.broadcast %151 : vector<8x1xf32> to vector<8x8xf32>
    %158 = arith.divf %156, %157 : vector<8x8xf32>
    %159 = arith.truncf %158 : vector<8x8xf32> to vector<8x8xbf16>
    %160 = tpu.concatenate %66, %97, %128, %159 in 1 : vector<8x8xbf16>, vector<8x8xbf16>, vector<8x8xbf16>, vector<8x8xbf16> -> vector<8x32xbf16>
    %c0_57 = arith.constant 0 : index
    %c0_58 = arith.constant 0 : index
    %161 = vector.load %arg7[%c0_57, %c0_58] : memref<32x32xbf16, #tpu.memory_space<vmem>>, vector<32x32xbf16>
    %cst_59 = arith.constant dense<0.000000e+00> : vector<8x32xf32>
    %162 = tpu.matmul %160, %161, %cst_59 {dimension_numbers = #tpu.dot_dimension_numbers<[1], [0], [0], [1], [0, 0, 1, 1], [], []>} : vector<8x32xbf16>, vector<32x32xbf16>, vector<8x32xf32> -> vector<8x32xf32>
    %c0_60 = arith.constant 0 : index
    %c0_61 = arith.constant 0 : index
    %163 = vector.load %arg8[%c0_60, %c0_61] : memref<1x32xf32, #tpu.memory_space<vmem>>, vector<1x32xf32>
    %164 = vector.broadcast %163 : vector<1x32xf32> to vector<8x32xf32>
    %165 = arith.addf %162, %164 : vector<8x32xf32>
    %166 = arith.addf %8, %165 : vector<8x32xf32>
    %cst_62 = arith.constant dense<0.000000e+00> : vector<8xf32>
    %167 = vector.multi_reduction <add>, %166, %cst_62 [1] : vector<8x32xf32> to vector<8xf32>
    %168 = vector.shape_cast %167 : vector<8xf32> to vector<8x1xf32>
    %cst_63 = arith.constant 3.200000e+01 : f32
    %169 = vector.broadcast %cst_63 : f32 to vector<8x1xf32>
    %170 = arith.divf %168, %169 : vector<8x1xf32>
    %171 = vector.broadcast %170 : vector<8x1xf32> to vector<8x32xf32>
    %172 = arith.subf %166, %171 : vector<8x32xf32>
    %173 = arith.mulf %172, %172 : vector<8x32xf32>
    %cst_64 = arith.constant dense<0.000000e+00> : vector<8xf32>
    %174 = vector.multi_reduction <add>, %173, %cst_64 [1] : vector<8x32xf32> to vector<8xf32>
    %175 = vector.shape_cast %174 : vector<8xf32> to vector<8x1xf32>
    %cst_65 = arith.constant 3.200000e+01 : f32
    %176 = vector.broadcast %cst_65 : f32 to vector<8x1xf32>
    %177 = arith.divf %175, %176 : vector<8x1xf32>
    %cst_66 = arith.constant 9.99999974E-6 : f32
    %178 = vector.broadcast %cst_66 : f32 to vector<8x1xf32>
    %179 = arith.addf %177, %178 : vector<8x1xf32>
    %180 = math.rsqrt %179 : vector<8x1xf32>
    %181 = vector.broadcast %180 : vector<8x1xf32> to vector<8x32xf32>
    %182 = arith.mulf %172, %181 : vector<8x32xf32>
    %c0_67 = arith.constant 0 : index
    %c0_68 = arith.constant 0 : index
    %183 = vector.load %arg9[%c0_67, %c0_68] : memref<1x32xf32, #tpu.memory_space<vmem>>, vector<1x32xf32>
    %184 = vector.broadcast %183 : vector<1x32xf32> to vector<8x32xf32>
    %185 = arith.mulf %182, %184 : vector<8x32xf32>
    %c0_69 = arith.constant 0 : index
    %c0_70 = arith.constant 0 : index
    %186 = vector.load %arg10[%c0_69, %c0_70] : memref<1x32xf32, #tpu.memory_space<vmem>>, vector<1x32xf32>
    %187 = vector.broadcast %186 : vector<1x32xf32> to vector<8x32xf32>
    %188 = arith.addf %185, %187 : vector<8x32xf32>
    %189 = arith.truncf %188 : vector<8x32xf32> to vector<8x32xbf16>
    %cst_71 = arith.constant 0.000000e+00 : f32
    %190 = vector.broadcast %cst_71 : f32 to vector<8x32xf32>
    %c0_i32_72 = arith.constant 0 : i32
    %191 = arith.index_cast %c0_i32_72 : i32 to index
    %c0_73 = arith.constant 0 : index
    %c0_74 = arith.constant 0 : index
    %192 = vector.load %arg11[%191, %c0_73, %c0_74] : memref<1x32x128xbf16, #tpu.memory_space<vmem>>, vector<1x32x128xbf16>
    %193 = vector.shape_cast %192 : vector<1x32x128xbf16> to vector<32x128xbf16>
    %cst_75 = arith.constant dense<0.000000e+00> : vector<8x128xf32>
    %194 = tpu.matmul %189, %193, %cst_75 {dimension_numbers = #tpu.dot_dimension_numbers<[1], [0], [0], [1], [0, 0, 1, 1], [], []>} : vector<8x32xbf16>, vector<32x128xbf16>, vector<8x128xf32> -> vector<8x128xf32>
    %195 = arith.index_cast %c0_i32_72 : i32 to index
    %c0_76 = arith.constant 0 : index
    %c0_77 = arith.constant 0 : index
    %196 = vector.load %arg12[%195, %c0_76, %c0_77] : memref<1x1x128xf32, #tpu.memory_space<vmem>>, vector<1x1x128xf32>
    %197 = vector.shape_cast %196 : vector<1x1x128xf32> to vector<1x128xf32>
    %198 = vector.broadcast %197 : vector<1x128xf32> to vector<8x128xf32>
    %199 = arith.addf %194, %198 : vector<8x128xf32>
    %200 = arith.index_cast %c0_i32_72 : i32 to index
    %c0_78 = arith.constant 0 : index
    %c0_79 = arith.constant 0 : index
    %201 = vector.load %arg13[%200, %c0_78, %c0_79] : memref<1x32x128xbf16, #tpu.memory_space<vmem>>, vector<1x32x128xbf16>
    %202 = vector.shape_cast %201 : vector<1x32x128xbf16> to vector<32x128xbf16>
    %cst_80 = arith.constant dense<0.000000e+00> : vector<8x128xf32>
    %203 = tpu.matmul %189, %202, %cst_80 {dimension_numbers = #tpu.dot_dimension_numbers<[1], [0], [0], [1], [0, 0, 1, 1], [], []>} : vector<8x32xbf16>, vector<32x128xbf16>, vector<8x128xf32> -> vector<8x128xf32>
    %204 = arith.index_cast %c0_i32_72 : i32 to index
    %c0_81 = arith.constant 0 : index
    %c0_82 = arith.constant 0 : index
    %205 = vector.load %arg14[%204, %c0_81, %c0_82] : memref<1x1x128xf32, #tpu.memory_space<vmem>>, vector<1x1x128xf32>
    %206 = vector.shape_cast %205 : vector<1x1x128xf32> to vector<1x128xf32>
    %207 = vector.broadcast %206 : vector<1x128xf32> to vector<8x128xf32>
    %208 = arith.addf %203, %207 : vector<8x128xf32>
    %cst_83 = arith.constant 5.000000e-01 : f32
    %209 = vector.broadcast %cst_83 : f32 to vector<8x128xf32>
    %210 = arith.mulf %209, %208 : vector<8x128xf32>
    %cst_84 = arith.constant 4.471500e-02 : f32
    %211 = vector.broadcast %cst_84 : f32 to vector<8x128xf32>
    %212 = arith.mulf %211, %208 : vector<8x128xf32>
    %213 = arith.mulf %212, %208 : vector<8x128xf32>
    %214 = arith.mulf %213, %208 : vector<8x128xf32>
    %215 = arith.addf %208, %214 : vector<8x128xf32>
    %cst_85 = arith.constant 0.797884583 : f32
    %216 = vector.broadcast %cst_85 : f32 to vector<8x128xf32>
    %217 = arith.mulf %216, %215 : vector<8x128xf32>
    %218 = math.tanh %217 : vector<8x128xf32>
    %cst_86 = arith.constant 1.000000e+00 : f32
    %219 = vector.broadcast %cst_86 : f32 to vector<8x128xf32>
    %220 = arith.addf %219, %218 : vector<8x128xf32>
    %221 = arith.mulf %210, %220 : vector<8x128xf32>
    %222 = arith.mulf %199, %221 : vector<8x128xf32>
    %223 = arith.truncf %222 : vector<8x128xf32> to vector<8x128xbf16>
    %224 = arith.index_cast %c0_i32_72 : i32 to index
    %c0_87 = arith.constant 0 : index
    %c0_88 = arith.constant 0 : index
    %225 = vector.load %arg15[%224, %c0_87, %c0_88] : memref<1x128x32xbf16, #tpu.memory_space<vmem>>, vector<1x128x32xbf16>
    %226 = vector.shape_cast %225 : vector<1x128x32xbf16> to vector<128x32xbf16>
    %cst_89 = arith.constant dense<0.000000e+00> : vector<8x32xf32>
    %227 = tpu.matmul %223, %226, %cst_89 {dimension_numbers = #tpu.dot_dimension_numbers<[1], [0], [0], [1], [0, 0, 1, 1], [], []>} : vector<8x128xbf16>, vector<128x32xbf16>, vector<8x32xf32> -> vector<8x32xf32>
    %228 = arith.addf %190, %227 : vector<8x32xf32>
    %c1_i32_90 = arith.constant 1 : i32
    %229 = arith.addf %166, %228 : vector<8x32xf32>
    %c0_91 = arith.constant 0 : index
    %c0_92 = arith.constant 0 : index
    %230 = vector.load %arg16[%c0_91, %c0_92] : memref<1x32xf32, #tpu.memory_space<vmem>>, vector<1x32xf32>
    %231 = vector.broadcast %230 : vector<1x32xf32> to vector<8x32xf32>
    %232 = arith.addf %229, %231 : vector<8x32xf32>
    %233 = arith.truncf %232 : vector<8x32xf32> to vector<8x32xbf16>
    %c0_93 = arith.constant 0 : index
    %c0_94 = arith.constant 0 : index
    %c0_95 = arith.constant 0 : index
    %234 = vector.load %arg17[%c0_93, %c0_94, %c0_95] : memref<1x8x32xbf16, #tpu.memory_space<vmem>>, vector<1x8x32xbf16>
    %235 = vector.shape_cast %234 : vector<1x8x32xbf16> to vector<8x32xbf16>
    %236 = vector.shape_cast %233 : vector<8x32xbf16> to vector<1x8x32xbf16>
    tpu.vector_store %arg17[%c0_93, %c0_94, %c0_95], %236 {strides = array<i32>} : memref<1x8x32xbf16, #tpu.memory_space<vmem>>, vector<1x8x32xbf16>,
    return
  }
  func.func @transform_0(%arg0: i32, %arg1: i32) -> (i32, i32, i32) {
    %c0_i32 = arith.constant 0 : i32
    %c0_i32_0 = arith.constant 0 : i32
    %c0_i32_1 = arith.constant 0 : i32
    return %arg0, %c0_i32, %c0_i32_0 : i32, i32, i32
  }
  func.func @transform_1(%arg0: i32, %arg1: i32) -> (i32, i32) {
    %c0_i32 = arith.constant 0 : i32
    %c0_i32_0 = arith.constant 0 : i32
    %c0_i32_1 = arith.constant 0 : i32
    return %c0_i32, %c0_i32_0 : i32, i32
  }
  func.func @transform_2(%arg0: i32, %arg1: i32) -> (i32, i32) {
    %c0_i32 = arith.constant 0 : i32
    %c0_i32_0 = arith.constant 0 : i32
    %c0_i32_1 = arith.constant 0 : i32
    return %c0_i32, %c0_i32_0 : i32, i32
  }
  func.func @transform_3(%arg0: i32, %arg1: i32) -> (i32, i32) {
    %c0_i32 = arith.constant 0 : i32
    %c0_i32_0 = arith.constant 0 : i32
    %c0_i32_1 = arith.constant 0 : i32
    return %c0_i32, %c0_i32_0 : i32, i32
  }
  func.func @transform_4(%arg0: i32, %arg1: i32) -> (i32, i32) {
    %c0_i32 = arith.constant 0 : i32
    %c0_i32_0 = arith.constant 0 : i32
    %c0_i32_1 = arith.constant 0 : i32
    return %c0_i32, %c0_i32_0 : i32, i32
  }
  func.func @transform_5(%arg0: i32, %arg1: i32) -> (i32, i32) {
    %c0_i32 = arith.constant 0 : i32
    %c0_i32_0 = arith.constant 0 : i32
    %c0_i32_1 = arith.constant 0 : i32
    return %c0_i32, %c0_i32_0 : i32, i32
  }
  func.func @transform_6(%arg0: i32, %arg1: i32) -> (i32, i32) {
    %c0_i32 = arith.constant 0 : i32
    %c0_i32_0 = arith.constant 0 : i32
    %c0_i32_1 = arith.constant 0 : i32
    return %c0_i32, %c0_i32_0 : i32, i32
  }
  func.func @transform_7(%arg0: i32, %arg1: i32) -> (i32, i32) {
    %c0_i32 = arith.constant 0 : i32
    %c0_i32_0 = arith.constant 0 : i32
    %c0_i32_1 = arith.constant 0 : i32
    return %c0_i32, %c0_i32_0 : i32, i32
  }
  func.func @transform_8(%arg0: i32, %arg1: i32) -> (i32, i32) {
    %c0_i32 = arith.constant 0 : i32
    %c0_i32_0 = arith.constant 0 : i32
    %c0_i32_1 = arith.constant 0 : i32
    return %c0_i32, %c0_i32_0 : i32, i32
  }
  func.func @transform_9(%arg0: i32, %arg1: i32) -> (i32, i32, i32) {
    %c0_i32 = arith.constant 0 : i32
    %c0_i32_0 = arith.constant 0 : i32
    %c0_i32_1 = arith.constant 0 : i32
    %c0_i32_2 = arith.constant 0 : i32
    return %c0_i32, %c0_i32_0, %c0_i32_1 : i32, i32, i32
  }
  func.func @transform_10(%arg0: i32, %arg1: i32) -> (i32, i32, i32) {
    %c0_i32 = arith.constant 0 : i32
    %c0_i32_0 = arith.constant 0 : i32
    %c0_i32_1 = arith.constant 0 : i32
    %c0_i32_2 = arith.constant 0 : i32
    return %c0_i32, %c0_i32_0, %c0_i32_1 : i32, i32, i32
  }
  func.func @transform_11(%arg0: i32, %arg1: i32) -> (i32, i32, i32) {
    %c0_i32 = arith.constant 0 : i32
    %c0_i32_0 = arith.constant 0 : i32
    %c0_i32_1 = arith.constant 0 : i32
    %c0_i32_2 = arith.constant 0 : i32
    return %c0_i32, %c0_i32_0, %c0_i32_1 : i32, i32, i32
  }
  func.func @transform_12(%arg0: i32, %arg1: i32) -> (i32, i32, i32) {
    %c0_i32 = arith.constant 0 : i32
    %c0_i32_0 = arith.constant 0 : i32
    %c0_i32_1 = arith.constant 0 : i32
    %c0_i32_2 = arith.constant 0 : i32
    return %c0_i32, %c0_i32_0, %c0_i32_1 : i32, i32, i32
  }
  func.func @transform_13(%arg0: i32, %arg1: i32) -> (i32, i32, i32) {
    %c0_i32 = arith.constant 0 : i32
    %c0_i32_0 = arith.constant 0 : i32
    %c0_i32_1 = arith.constant 0 : i32
    %c0_i32_2 = arith.constant 0 : i32
    return %c0_i32, %c0_i32_0, %c0_i32_1 : i32, i32, i32
  }
  func.func @transform_14(%arg0: i32, %arg1: i32) -> (i32, i32) {
    %c0_i32 = arith.constant 0 : i32
    %c0_i32_0 = arith.constant 0 : i32
    %c0_i32_1 = arith.constant 0 : i32
    return %c0_i32, %c0_i32_0 : i32, i32
  }
  func.func @transform_15(%arg0: i32, %arg1: i32) -> (i32, i32, i32) {
    %c0_i32 = arith.constant 0 : i32
    %c0_i32_0 = arith.constant 0 : i32
    return %arg0, %arg1, %c0_i32 : i32, i32, i32
  }
}

</mosaic_0001>

<bundles_post_ra>
// kernel: tpu_custom_call.1
= control target key start
LH: loop header
LB: loop body
LE: loop exit
PB: predicated region body
PF: predicated region fallthrough
CT: control target
= control target key end

     0   :  { %s2574_s0 = inlined_call_operand.hbm [shape: bf16[2,8,32], index: 0, kind: input, shape index: {}]   ;;  %s2575_s1 = inlined_call_operand.vmem [shape: f32[1,32], index: 1, kind: input, shape index: {}]   ;;  %s2576_s2 = inlined_call_operand.vmem [shape: f32[1,32], index: 2, kind: input, shape index: {}]   ;;  %s2577_s3 = inlined_call_operand.vmem [shape: bf16[32,32], index: 3, kind: input, shape index: {}]   ;;  %s2578_s4 = inlined_call_operand.vmem [shape: bf16[32,64], index: 4, kind: input, shape index: {}]   ;;  %s2579_s5 = inlined_call_operand.vmem [shape: bf16[32,32], index: 5, kind: input, shape index: {}]   ;;  %s2580_s6 = inlined_call_operand.vmem [shape: f32[1,32], index: 6, kind: input, shape index: {}]   ;;  %s2581_s7 = inlined_call_operand.vmem [shape: f32[1,32], index: 7, kind: input, shape index: {}]   ;;  %s2582_s8 = inlined_call_operand.vmem [shape: f32[1,32], index: 8, kind: input, shape index: {}]   ;;  %s2583_s9 = inlined_call_operand.vmem [shape: bf16[1,32,128], index: 9, kind: input, shape index: {}]   ;;  %s2584_s10 = inlined_call_operand.vmem [shape: f32[1,1,128], index: 10, kind: input, shape index: {}]   ;;  %s2585_s11 = inlined_call_operand.vmem [shape: bf16[1,32,128], index: 11, kind: input, shape index: {}]   ;;  %s2586_s12 = inlined_call_operand.vmem [shape: f32[1,1,128], index: 12, kind: input, shape index: {}]   ;;  %s2587_s13 = inlined_call_operand.vmem [shape: bf16[1,128,32], index: 13, kind: input, shape index: {}]   ;;  %s2588_s14 = inlined_call_operand.vmem [shape: f32[1,32], index: 14, kind: input, shape index: {}]   ;;  %s2589_s15 = inlined_call_operand.hbm [shape: bf16[2,8,32], index: 15, kind: output, shape index: {}]  }
   0x1   :  { %2595 = sst [smem:[#allocation14_spill]] %s2584_s10 }
   0x2   :  { %2596 = sst [smem:[#allocation15_spill]] %s2588_s14 }
   0x3   :  { %2597 = sst [smem:[#allocation16_spill]] %s2589_s15 }
   0x4   :  { %20 = vsyncpa [#allocation5], 0 }
   0x5   :  { %22 = vsyncpa [#allocation5 + $0x1], 0 }
   0x6   :  { %23 = vsyncpa [#allocation6], 0 }
   0x7   :  { %25 = vsyncpa [#allocation6 + $0x1], 0  ;;  %s2204_s18 = smov 0   ;;  %s2206_s19 = smov 0  }
   0x8   :  { %s2208_s20 = smov 0   ;;  %s2210_s21 = smov 0  }
   0x9   :  { %s2212_s22 = smov 0   ;;  %s2214_s23 = smov 0  }
   0xa LB: > { %2598 = sst [smem:[#allocation10_spill]] %s2091_s18  ;;  %s1670_s24 = sadd.s32 4294967295, %s2111_s23   ;;  %s2111_s23 = sphi %s2214_s23, %s31_s23   ;;  %s2107_s22 = sphi %s2212_s22, %s2618_s22   ;;  %s2103_s21 = sphi %s2210_s21, %s2617_s21   ;;  %s2099_s20 = sphi %s2208_s20, %s2621_s20   ;;  %s2095_s19 = sphi %s2206_s19, %s2620_s19   ;;  %s2091_s18 = sphi %s2204_s18, %s2619_s18  }
   0xb   : > { %2599 = sst [smem:[#allocation11_spill]] %s2107_s22  ;;  %s1671_s25 = sadd.s32 4294967294, %s2111_s23  }
   0xc   : > { %s43_s26 = sadd.s32 1, %s2107_s22  ;;  %s50_s27 = sadd.s32 1, %s2099_s20 }
   0xd   : > { %p45_p0 = scmp.ge.s32.totalorder %s43_s26, 2  ;;  %p57_p1 = scmp.ne.s32.totalorder %s2099_s20, %s2095_s19 }
   0xe   : > { %p58_p2 = scmp.eq.s32.totalorder %s2111_s23, 0  ;;  %p63_p3 = scmp.ne.s32.totalorder %s2095_s19, %s2091_s18 }
   0xf   : > { %s2623_s26 = smov (%p45_p0, %s43_s26), 0  ;;  %p64_p5 = scmp.eq.s32.totalorder %s1670_s24, 0 }
  0x10   : > { %2600 = sst [smem:[#allocation12_spill]] %s2623_s26  ;;  %p2245_p4 = por %p58_p2, %p57_p1 }
  0x11   : > { %s47_s29 = ssub.s32 %s2107_s22, %s2623_s26  ;;  %p383_p6 = scmp.eq.s32.totalorder %s1670_s24, 1 }
  0x12   : > { %p48_p7 = scmp.eq.s32.totalorder %s47_s29, 0  ;;  %p2251_p8 = por %p64_p5, %p63_p3 }
  0x13   : > { %p2255_p9 = por %p383_p6, %p57_p1  ;;  %p389_p10 = scmp.eq.s32.totalorder %s1671_s25, 1 }
  0x14   : > { %s2260_s17 = scalar_select %p48_p7, %s2099_s20, %s50_s27  }
  0x15   : > { %s2603_s16 = scalar_select %p2255_p9, 1, 0 }
  0x16   : > { %2604 = sst [smem:[#allocation13_spill]] %s2260_s17  ;;  %p2262_p11 = por %p389_p10, %p63_p3 }
  0x17   : > { %p1888_p13 = scmp.lt.s32.totalorder %s2111_s23, 2  ;;  %s451_s24 = sand.u32 1, %s2099_s20  }
  0x18   : > { %s2605_s18 = scalar_select %p2262_p11, 1, 0 }
  0x19   : > { %s1674_s29 = sshll.u32 %s451_s24, 2  ;;  %s1675_s26 = sshll.u32 %s2107_s22, 6 }
  0x1a   : > { %s2273_s10 = scalar_lea.hbm %s2574_s0, %s1675_s26  ;;  %s455_s25 = scalar_lea.vmem [#allocation4], %s1674_s29 }
  0x1b   : > { %s462_s27 = sshll.u32 %s455_s25, 4  ;;  %p2279_p0 = pnand %p1888_p13, %p2245_p4  ;;  %s2275_s27 = int_to_ptr.vmem [resolvable:$true] %s462_s27 }
  0x1c   : > { %s452_s14 = scalar_lea.sflag [#allocation5], %s451_s24  ;;  %s1999_s15 = scalar_lea.hbm %s2273_s10, 64 }
  0x1d   : > { %p2000_p3 = scmp.ne.s32.totalorder %s2273_s10, %s1999_s15  ;;  %p2001_p5 = pneg %p2279_p0 }
  0x1e   : > { %s2004_s28 = scalar_lea.hbm %s2574_s0, 128  ;;  %p2005_p4 = scmp.lt.u32.totalorder %s2273_s10, %s2574_s0 }
  0x1f   : > { %p2002_p6 = pnand %p2001_p5, %p2000_p3  ;;  %p2006_p10 = scmp.lt.u32.totalorder %s2004_s28, %s1999_s15 }
  0x20   : > { %p2008_p12 = scmp.lt.u32.totalorder %s1999_s15, %s2273_s10 }
  0x21   : > { %p2003_p7 = pneg %p2002_p6  ;;  %p2007_p13 = por %p2006_p10, %p2005_p4 }
  0x23   : > { %p2009_p1 = por %p2008_p12, %p2007_p13 }
  0x25   : > { %p2010_p2 = pnand %p2009_p1, %p2003_p7 }
  0x27   : > { %2013 = shalt.err (!%p2010_p2)
}
  0x28   : > { %s2014_s24 = scalar_lea.vmem %s2275_s27, 64  ;;  %s2113_s26 = smov [#allocation4]  }
  0x29   : > { %p2015_p3 = scmp.ne.s32.totalorder %s2275_s27, %s2014_s24  ;;  %s2019_s29 = sshll.u32 %s2113_s26, 4  ;;  %s2020_s29 = int_to_ptr.vmem [resolvable:$false] %s2019_s29 }
  0x2a   : > { %s2021_s22 = scalar_lea.vmem %s2020_s29, 128  ;;  %p2022_p9 = scmp.lt.s32.totalorder %s2275_s27, %s2020_s29 }
  0x2b   : > { %p2017_p6 = pnand %p2015_p3, %p2001_p5  ;;  %p2023_p4 = scmp.lt.s32.totalorder %s2021_s22, %s2014_s24 }
  0x2d   : > { %p2018_p11 = pneg %p2017_p6  ;;  %p2024_p10 = por %p2023_p4, %p2022_p9 }
  0x2f   : > { %p2025_p12 = pnand %p2024_p10, %p2018_p11 }
  0x31   : > { %2028 = shalt.err (!%p2025_p12)
}
  0x32   : > { %1883 = dma.hbm_to_vmem [thread:$0]  (!%p2279_p0), %s2273_s10, 64, %s2275_s27, %s452_s14  }
  0x33   : > { %p2607_p1 = scmp.lt.s32.totalorder %s2111_s23, 3  ;;  %p2608_p2 = scmp.ge.s32.totalorder %s2111_s23, 1 }
  0x35   : > { %p468_p5 = pnand %p2608_p2, %p2607_p1 }
  0x36   : > { %s2315_s15 = sand.u32 (!%p468_p5), 1, %s2095_s19  }
  0x37   : > { %471 = sbr.rel (%p468_p5) target bundleno = 2456 (0x998), region = 80  ;;  %s1677_s28 = sshll.u32 (!%p468_p5), %s2315_s15, 2 }
  0x38   : > { %s474_s25 = scalar_lea.sflag (!%p468_p5), [#allocation5], %s2315_s15  ;;  %s477_s17 = scalar_lea.vmem (!%p468_p5), [#allocation4], %s1677_s28 }
  0x3e   : > { %2082 = dma.done.wait (%p2251_p8), %s474_s25, 64  }
  0x3f   : > { %2084 = vsyncadd (%p2251_p8), %s474_s25, 4294967232  ;;  %vm531_vm0 = vcmask 261120   ;;  %v529_v0 = vld [vmem:[%s477_s17] sm:$0xf]  ;;  %v1947_v16 = vld [vmem:[%s2578_s4] sm:$0xff]   ;;  %v2114_v17 = vmov 0.0  }
  0x40   : > { %v637_v1 = vld [vmem:[%s477_s17] sm:$0xf]  ;;  %v530_v2 = vunpack.c.l.bf16 %v529_v0  ;;  %1768 = vmatprep.subr.bf16.mxu0 %v2114_v17  ;;  %1790 = vmatprep.subr.bf16.mxu1 %v2114_v17  ;;  %vm2115_vm1 = vmmov 0   ;;  %v1679_v26 = vld [vmem:[%s2575_s1] ss:$0 sm:$0xff]  ;;  %vm623_vm2 = vcmask 257024  }
  0x41   : > { %v2325_v3 = vunpack.c.l.bf16 %v637_v1  ;;  %1769 = vmatpush3.bf16.msra.mxu0 %v1947_v16  ;;  %v1948_v18 = vld [vmem:[%s2578_s4 + $0x8] sm:$0xff]   ;;  %1772 = vmatprep.mubr.msk.bf16.mxu0 %vm2115_vm1, %v2114_v17  ;;  %v1680_v28 = vld [vmem:[%s2576_s2] ss:$0 sm:$0xff]  ;;  %vm733_vm3 = vcmask 64512   ;;  %s2116_s27 = smov 120   ;;  %s2117_s14 = smov 112  }
  0x42   : > { %v532_v4 = vsel %vm531_vm0, %v530_v2, 0.0  ;;  %1770 = vmatprep.subr.bf16.mxu0 %v2114_v17  ;;  %1792 = vmatprep.mubr.msk.bf16.mxu1 %vm2115_vm1, %v2114_v17  ;;  %v1949_v33 = vld [vmem:[%s2577_s3] sm:$0xff]   ;;  %v1950_v36 = vld [vmem:[%s2577_s3 + $0x8] sm:$0xff]   ;;  %s2118_s24 = smov 104   ;;  %s2119_s26 = smov 96   ;;  %vm798_vm4 = vcmask 1043456  }
  0x43   : > { %v640_v5 = vsel %vm531_vm0, %v2325_v3, 0.0  ;;  %533 = vadd.xlane.f32.xlu0 %v532_v4  ;;  %s2120_s10 = smov 8   ;;  %s2121_s30 = smov 16   ;;  %vm1216_vm5 = vcmask 130048   ;;  %vm1219_vm6 = vcmask 195584  }
  0x44   : > { %s2609_s22 = sld [smem:[#allocation14_spill]]  ;;  %s2611_s29 = sld [smem:[#allocation16_spill]] }
  0x45   : > { %1771 = vmatpush3.bf16.msra.mxu0 %v1948_v18  ;;  %s1575_s25 = scalar_lea.sflag [#allocation6], %s2315_s15  ;;  %p2612_p9 = scmp.ne.s32.totalorder %s2603_s16, 0 }
  0x46   : > { %1776 = vmatprep.subr.bf16.mxu0 %v2114_v17 }
  0x47   : > { %641 = vadd.xlane.f32.xlu0 %v640_v5 }
  0xd0   : > { %v534_v6 = vpop.xlane.xlu0 %533 }
  0xd1   : > { %v536_v7 = vmul.f32 0.03125, %v534_v6 }
  0xd3   : > { %v537_v8 = vsub.f32 %v530_v2, %v536_v7 }
  0xd4   : > { %v642_v9 = vpop.xlane.xlu0 %641 }
  0xd5   : > { %v644_v10 = vmul.f32 0.03125, %v642_v9  ;;  %v538_v11 = vmul.f32 %v537_v8, %v537_v8 }
  0xd7   : > { %v645_v12 = vsub.f32 %v2325_v3, %v644_v10  ;;  %v539_v13 = vsel %vm531_vm0, %v538_v11, 0.0 }
  0xd8   : > { %540 = vadd.xlane.f32.xlu1 %v539_v13 }
  0xd9   : > { %v646_v14 = vmul.f32 %v645_v12, %v645_v12 }
  0xdb   : > { %v647_v15 = vsel %vm531_vm0, %v646_v14, 0.0 }
  0xdc   : > { %648 = vadd.xlane.f32.xlu1 %v647_v15 }
 0x165   : > { %v541_v19 = vpop.xlane.xlu1 %540 }
 0x166   : > { %v542_v20 = vmul.f32 0.03125, %v541_v19 }
 0x168   : > { %v543_v21 = vadd.f32 1e-05, %v542_v20 }
 0x169   : > { %v649_v22 = vpop.xlane.xlu1 %648 }
 0x16a   : > { %1967 = vrsqrt.f32 %v543_v21  ;;  %v650_v23 = vmul.f32 0.03125, %v649_v22 }
 0x16c   : > { %v651_v24 = vadd.f32 1e-05, %v650_v23 }
 0x16e   : > { %1969 = vrsqrt.f32 %v651_v24 }
 0x174   : > { %v1968_v25 = vpop.eup %1967 }
 0x175   : > { %v545_v27 = vmul.f32 %v1968_v25, %v537_v8 }
 0x177   : > { %v553_v29 = vmul.f32 %v1679_v26, %v545_v27 }
 0x178   : > { %v1970_v30 = vpop.eup %1969 }
 0x179   : > { %v653_v31 = vmul.f32 %v1970_v30, %v645_v12  ;;  %v561_v32 = vadd.f32 %v1680_v28, %v553_v29 }
 0x17b   : > { %v562_v34 = vpack.c.bf16 %v561_v32, %v561_v32  ;;  %v661_v35 = vmul.f32 %v1679_v26, %v653_v31 }
 0x17d   : > { %1773 = vmatmul.mubr.msk.bf16.vlgmr.msra.gmra.mrb[0].mxu0 %vm531_vm0, %v562_v34  ;;  %v669_v37 = vadd.f32 %v1680_v28, %v661_v35 }
 0x17e   : > { %1777 = vmatpush3.bf16.msra.mxu0 %v1949_v33  ;;  %1780 = vmatprep.mubr.msk.bf16.mxu0 %vm2115_vm1, %v2114_v17 }
 0x17f   : > { %1778 = vmatprep.subr.bf16.mxu0 %v2114_v17  ;;  %v670_v38 = vpack.c.bf16 %v669_v37, %v669_v37 }
 0x182   : > { %1779 = vmatpush3.bf16.msra.mxu0 %v1950_v36 }
 0x183   : > { %1784 = vmatprep.subr.bf16.mxu0 %v2114_v17 }
 0x185   : > { %1781 = vmatmul.mubr.msk.bf16.vlgmr.msra.gmra.mrb[4].mxu0 %vm531_vm0, %v670_v38 }
 0x186   : > { %1786 = vmatprep.mubr.msk.bf16.mxu0 %vm2115_vm1, %v2114_v17 }
 0x250   : > { %v616_v39 = vpop.f32.mrb[0].mxu0 }
 0x251   : > { %v622_v40 = vpack.c.bf16 %v616_v39, %v616_v39  ;;  %v1774_v41 = vpop.f32.mrb[1].mxu0 }
 0x252   : > { %v619_v42 = vpop.f32.mrb[2].mxu0 }
 0x253   : > { %624 = vst.msk [vmem:[#allocation2] sm:$0xf] %vm623_vm2, %v622_v40  ;;  %v1775_v43 = vpop.f32.mrb[3].mxu0 }
 0x258   : > { %v724_v44 = vpop.f32.mrb[4].mxu0 }
 0x259   : > { %v730_v45 = vpack.c.bf16 %v724_v44, %v724_v44  ;;  %v1782_v46 = vpop.f32.mrb[5].mxu0 }
 0x25a   : > { %v727_v47 = vpop.f32.mrb[6].mxu0  ;;  %v731_v48 = vld [vmem:[#allocation2] sm:$0xf] }
 0x25b   : > { %847 = vrot.lane.b32.xlu1 %v730_v45, %s2116_s27  ;;  %v1783_v49 = vpop.f32.mrb[7].mxu0  ;;  %v738_v50 = vsel %vm733_vm3, %v731_v48, 0  ;;  %v1692_v51 = vcombine.low %v731_v48, %v731_v48 }
 0x25c   : > { %1785 = vmatpush3.bf16.xpose.msra.mxu0 %v738_v50 }
 0x25d   : > { %852 = vrot.lane.b32.xlu0 %v1692_v51, %s2116_s27  ;;  %1796 = vmatprep.subr.bf16.mxu0 %v2114_v17 }
 0x25f   : > { %972 = vrot.lane.b32.xlu1 %v1692_v51, %s2117_s14 }
 0x261   : > { %1089 = vrot.lane.b32.xlu0 %v1692_v51, %s2118_s24 }
 0x263   : > { %970 = vrot.lane.b32.xlu1 %v730_v45, %s2117_s14  ;;  %1787 = vmatmul.mubr.msk.bf16.vlgmr.msra.gmra.mrb[8].mxu0 %vm733_vm3, %v730_v45 }
 0x264   : > { %1798 = vmatprep.mubr.msk.bf16.mxu0 %vm2115_vm1, %v2114_v17 }
 0x265   : > { %628 = vrot.lane.b32.xlu0 %v622_v40, %s2119_s26 }
 0x267   : > { %1087 = vrot.lane.b32.xlu1 %v730_v45, %s2118_s24 }
 0x2cd   : > { %v848_v52 = vpop.permute.xlu1 %847 }
 0x2cf   : > { %v853_v53 = vpop.permute.xlu0 %852 }
 0x2d0   : > { %v858_v54 = vsel %vm733_vm3, %v853_v53, 0 }
 0x2d1   : > { %1797 = vmatpush3.bf16.xpose.msra.mxu0 %v858_v54  ;;  %v973_v56 = vpop.permute.xlu1 %972 }
 0x2d2   : > { %1808 = vmatprep.subr.bf16.mxu0 %v2114_v17  ;;  %v978_v58 = vsel %vm733_vm3, %v973_v56, 0 }
 0x2d3   : > { %v1090_v55 = vpop.permute.xlu0 %1089 }
 0x2d4   : > { %v1095_v61 = vsel %vm733_vm3, %v1090_v55, 0 }
 0x2d5   : > { %v971_v59 = vpop.permute.xlu1 %970 }
 0x2d7   : > { %v629_v57 = vpop.permute.xlu0 %628 }
 0x2d8   : > { %631 = vst.msk [vmem:[#allocation3] sm:$0xf] %vm623_vm2, %v629_v57  ;;  %1799 = vmatmul.mubr.msk.bf16.vlgmr.msra.gmra.mrb[12].mxu0 %vm733_vm3, %v848_v52 }
 0x2d9   : > { %1809 = vmatpush3.bf16.xpose.msra.mxu0 %v978_v58  ;;  %1810 = vmatprep.mubr.msk.bf16.mxu0 %vm2115_vm1, %v2114_v17  ;;  %v1088_v63 = vpop.permute.xlu1 %1087 }
 0x2da   : > { %1820 = vmatprep.subr.bf16.mxu0 %v2114_v17 }
 0x2df   : > { %v732_v60 = vld [vmem:[#allocation3] sm:$0xf] }
 0x2e0   : > { %1811 = vmatmul.mubr.msk.bf16.vlgmr.msra.gmra.mrb[16].mxu0 %vm733_vm3, %v971_v59  ;;  %v800_v62 = vsel %vm798_vm4, %v732_v60, 0  ;;  %v1694_v6 = vcombine.low %v732_v60, %v732_v60 }
 0x2e1   : > { %1791 = vmatpush3.bf16.msra.mxu1 %v800_v62  ;;  %1821 = vmatpush3.bf16.xpose.msra.mxu0 %v1095_v61 }
 0x2e2   : > { %1822 = vmatprep.mubr.msk.bf16.mxu0 %vm2115_vm1, %v2114_v17  ;;  %1802 = vmatprep.subr.bf16.mxu1 %v2114_v17 }
 0x2e3   : > { %1832 = vmatprep.subr.bf16.mxu0 %v2114_v17 }
 0x2e8   : > { %1823 = vmatmul.mubr.msk.bf16.vlgmr.msra.gmra.mrb[20].mxu0 %vm733_vm3, %v1088_v63 }
 0x2e9   : > { %1836 = vmatprep.mubr.msk.bf16.mxu0 %vm2115_vm1, %v2114_v17 }
 0x336   : > { %v774_v0 = vpop.f32.mrb[8].mxu0 }
 0x337   : > { %v1788_v1 = vpop.f32.mrb[9].mxu0  ;;  %v780_v2 = vsel %vm733_vm3, %v774_v0, -inf }
 0x338   : > { %781 = vmax.xlane.f32.xlu1 %v780_v2  ;;  %v777_v4 = vpop.f32.mrb[10].mxu0 }
 0x339   : > { %v1789_v5 = vpop.f32.mrb[11].mxu0 }
 0x349   : > { %918 = vrot.lane.b32.xlu1 %v1694_v6, %s2116_s27  ;;  %s2122_s27 = smov 24  }
 0x34d   : > { %1152 = vrot.lane.b32.xlu1 %v1694_v6, %s2118_s24 }
 0x3ab   : > { %v894_v7 = vpop.f32.mrb[12].mxu0 }
 0x3ac   : > { %v1800_v8 = vpop.f32.mrb[13].mxu0  ;;  %v900_v9 = vsel %vm733_vm3, %v894_v7, -inf }
 0x3ad   : > { %901 = vmax.xlane.f32.xlu0 %v900_v9  ;;  %v897_v10 = vpop.f32.mrb[14].mxu0 }
 0x3ae   : > { %v1801_v11 = vpop.f32.mrb[15].mxu0 }
 0x3b3   : > { %v1014_v12 = vpop.f32.mrb[16].mxu0 }
 0x3b4   : > { %v1812_v13 = vpop.f32.mrb[17].mxu0  ;;  %v1020_v14 = vsel %vm733_vm3, %v1014_v12, -inf }
 0x3b5   : > { %1021 = vmax.xlane.f32.xlu0 %v1020_v14  ;;  %v1017_v15 = vpop.f32.mrb[18].mxu0 }
 0x3b6   : > { %v1813_v16 = vpop.f32.mrb[19].mxu0 }
 0x3bb   : > { %v1131_v18 = vpop.f32.mrb[20].mxu0 }
 0x3bc   : > { %v1824_v19 = vpop.f32.mrb[21].mxu0  ;;  %v1137_v20 = vsel %vm733_vm3, %v1131_v18, -inf }
 0x3bd   : > { %1138 = vmax.xlane.f32.xlu0 %v1137_v20  ;;  %v1134_v21 = vpop.f32.mrb[22].mxu0 }
 0x3be   : > { %v1825_v22 = vpop.f32.mrb[23].mxu0 }
 0x3c5   : > { %v782_v23 = vpop.xlane.xlu1 %781 }
 0x3c6   : > { %v786_v24 = vsub.f32 %v774_v0, %v782_v23  ;;  %v783_v53 = vsub.f32 -inf, %v782_v23 }
 0x3c8   : > { %v787_v25 = vmul.f32 1.442695, %v786_v24  ;;  %v784_v54 = vmul.f32 1.442695, %v783_v53 }
 0x3c9   : > { %v919_v27 = vpop.permute.xlu1 %918 }
 0x3ca   : > { %1971 = vpow2.f32 %v787_v25  ;;  %v924_v29 = vsel %vm798_vm4, %v919_v27, 0 }
 0x3cd   : > { %v1153_v46 = vpop.permute.xlu1 %1152 }
 0x3ce   : > { %v1158_v49 = vsel %vm798_vm4, %v1153_v46, 0 }
 0x3d3   : > { %1035 = vrot.lane.b32.xlu0 %v1694_v6, %s2117_s14 }
 0x3d4   : > { %v1972_v26 = vpop.eup %1971 }
 0x3d5   : > { %v794_v28 = vpack.c.bf16 %v1972_v26, %v1972_v26  ;;  %v790_v44 = vsel %vm733_vm3, %v1972_v26, 0.0  ;;  %v1953_v26 = vld [vmem:[%s2579_s5] sm:$0xff]  }
 0x3d6   : > { %1833 = vmatpush3.bf16.msra.mxu0 %v1953_v26  ;;  %v1966_v26 = vld [vmem:[%s2587_s13 + $0x38] sm:$0xff]  }
 0x3d7   : > { %1793 = vmatmul.mubr.msk.bf16.vlgmr.msra.gmra.mrb[0].mxu1 %vm733_vm3, %v794_v28  ;;  %1834 = vmatprep.subr.bf16.mxu0 %v2114_v17 }
 0x3d8   : > { %1803 = vmatpush3.bf16.msra.mxu1 %v924_v29  ;;  %1804 = vmatprep.mubr.msk.bf16.mxu1 %vm2115_vm1, %v2114_v17 }
 0x3d9   : > { %1814 = vmatprep.subr.bf16.mxu1 %v2114_v17 }
 0x43a   : > { %v902_v30 = vpop.xlane.xlu0 %901 }
 0x43b   : > { %v906_v31 = vsub.f32 %v894_v7, %v902_v30  ;;  %v903_v4 = vsub.f32 -inf, %v902_v30  ;;  %v1954_v30 = vld [vmem:[%s2579_s5 + $0x8] sm:$0xff]  }
 0x43c   : > { %1835 = vmatpush3.bf16.msra.mxu0 %v1954_v30 }
 0x43d   : > { %v907_v32 = vmul.f32 1.442695, %v906_v31  ;;  %v904_v5 = vmul.f32 1.442695, %v903_v4  ;;  %1848 = vmatprep.subr.bf16.mxu0 %v2114_v17 }
 0x43f   : > { %1973 = vpow2.f32 %v907_v32 }
 0x442   : > { %v1022_v33 = vpop.xlane.xlu0 %1021 }
 0x443   : > { %v1026_v34 = vsub.f32 %v1014_v12, %v1022_v33  ;;  %v1023_v6 = vsub.f32 -inf, %v1022_v33 }
 0x445   : > { %v1027_v35 = vmul.f32 1.442695, %v1026_v34  ;;  %v1024_v7 = vmul.f32 1.442695, %v1023_v6  ;;  %v1957_v6 = vld [vmem:[%s2583_s9 + $0x8] sm:$0xff]  }
 0x447   : > { %1975 = vpow2.f32 %v1027_v35 }
 0x449   : > { %v1974_v36 = vpop.eup %1973 }
 0x44a   : > { %v1139_v37 = vpop.xlane.xlu0 %1138  ;;  %v910_v39 = vsel %vm733_vm3, %v1974_v36, 0.0  ;;  %v914_v40 = vpack.c.bf16 %v1974_v36, %v1974_v36 }
 0x44b   : > { %v1143_v38 = vsub.f32 %v1131_v18, %v1139_v37  ;;  %911 = vadd.xlane.f32.xlu1 %v910_v39  ;;  %v1140_v8 = vsub.f32 -inf, %v1139_v37 }
 0x44c   : > { %1805 = vmatmul.mubr.msk.bf16.vlgmr.msra.gmra.mrb[4].mxu1 %vm733_vm3, %v914_v40 }
 0x44d   : > { %v1144_v41 = vmul.f32 1.442695, %v1143_v38  ;;  %1816 = vmatprep.mubr.msk.bf16.mxu1 %vm2115_vm1, %v2114_v17  ;;  %v1141_v10 = vmul.f32 1.442695, %v1140_v8 }
 0x44e   : > { %v1036_v42 = vpop.permute.xlu0 %1035 }
 0x44f   : > { %v1041_v43 = vsel %vm798_vm4, %v1036_v42, 0  ;;  %1977 = vpow2.f32 %v1144_v41  ;;  %791 = vadd.xlane.f32.xlu1 %v790_v44 }
 0x450   : > { %1815 = vmatpush3.bf16.msra.mxu1 %v1041_v43  ;;  %1979 = vpow2.f32 %v784_v54 }
 0x451   : > { %1826 = vmatprep.subr.bf16.mxu1 %v2114_v17  ;;  %v1976_v45 = vpop.eup %1975 }
 0x452   : > { %v1030_v47 = vsel %vm733_vm3, %v1976_v45, 0.0  ;;  %v1034_v48 = vpack.c.bf16 %v1976_v45, %v1976_v45 }
 0x453   : > { %1031 = vadd.xlane.f32.xlu0 %v1030_v47 }
 0x454   : > { %1817 = vmatmul.mubr.msk.bf16.vlgmr.msra.gmra.mrb[8].mxu1 %vm733_vm3, %v1034_v48 }
 0x455   : > { %1827 = vmatpush3.bf16.msra.mxu1 %v1158_v49  ;;  %1828 = vmatprep.mubr.msk.bf16.mxu1 %vm2115_vm1, %v2114_v17 }
 0x456   : > { %1840 = vmatprep.subr.bf16.mxu1 %v2114_v17 }
 0x459   : > { %v1978_v50 = vpop.eup %1977 }
 0x45a   : > { %v1147_v51 = vsel %vm733_vm3, %v1978_v50, 0.0  ;;  %v1151_v52 = vpack.c.bf16 %v1978_v50, %v1978_v50  ;;  %v1980_v55 = vpop.eup %1979 }
 0x45b   : > { %1148 = vadd.xlane.f32.xlu0 %v1147_v51  ;;  %v789_v56 = vmul.f32 0.0, %v1980_v55  ;;  %v1700_v55 = vld [vmem:[%s2580_s6] ss:$0 sm:$0xff] }
 0x45c   : > { %1829 = vmatmul.mubr.msk.bf16.vlgmr.msra.gmra.mrb[12].mxu1 %vm733_vm3, %v1151_v52 }
 0x45d   : > { %1844 = vmatprep.mubr.msk.bf16.mxu1 %vm2115_vm1, %v2114_v17 }
 0x4aa   : > { %v836_v57 = vpop.f32.mrb[0].mxu1 }
 0x4ab   : > { %v842_v58 = vadd.f32 %v836_v57, %v789_v56  ;;  %v1794_v59 = vpop.f32.mrb[1].mxu1 }
 0x4ac   : > { %v839_v60 = vpop.f32.mrb[2].mxu1 }
 0x4ad   : > { %v1795_v61 = vpop.f32.mrb[3].mxu1 }
 0x4d8   : > { %v912_v62 = vpop.xlane.xlu1 %911 }
 0x4dc   : > { %v792_v63 = vpop.xlane.xlu1 %791 }
 0x4dd   : > { %v793_v0 = vadd.f32 %v792_v63, %v789_v56 }
 0x4df   : > { %1981 = vrcp.f32 %v793_v0 }
 0x4e0   : > { %1983 = vpow2.f32 %v904_v5  ;;  %v1032_v14 = vpop.xlane.xlu0 %1031  ;;  %v1955_v5 = vld [vmem:[%s2583_s9] sm:$0xff]  }
 0x4e1   : > { %1985 = vpow2.f32 %v1024_v7  ;;  %1841 = vmatpush3.bf16.msra.mxu1 %v1955_v5  ;;  %v1958_v7 = vld [vmem:[%s2585_s11 + $0x8] sm:$0xff]  }
 0x4e2   : > { %1987 = vpow2.f32 %v1141_v10  ;;  %1842 = vmatprep.subr.bf16.mxu1 %v2114_v17 }
 0x4e5   : > { %1843 = vmatpush3.bf16.msra.mxu1 %v1957_v6 }
 0x4e6   : > { %1856 = vmatprep.subr.bf16.mxu1 %v2114_v17 }
 0x4e8   : > { %v1149_v20 = vpop.xlane.xlu0 %1148 }
 0x4e9   : > { %v1982_v1 = vpop.eup %1981 }
 0x4ea   : > { %v2426_v2 = vmul.f32 %v1982_v1, %v842_v58  ;;  %v1984_v9 = vpop.eup %1983 }
 0x4eb   : > { %v909_v11 = vmul.f32 0.0, %v1984_v9  ;;  %v1986_v13 = vpop.eup %1985 }
 0x4ec   : > { %v1029_v15 = vmul.f32 0.0, %v1986_v13  ;;  %v1988_v18 = vpop.eup %1987  ;;  %v845_v50 = vpack.c.bf16 %v2426_v2, %v2426_v2 }
 0x4ed   : > { %v913_v12 = vadd.f32 %v912_v62, %v909_v11  ;;  %v1146_v24 = vmul.f32 0.0, %v1988_v18 }
 0x4ee   : > { %v1033_v16 = vadd.f32 %v1032_v14, %v1029_v15  ;;  %v1705_v14 = vld [vmem:[%s2582_s8] ss:$0 sm:$0xff] }
 0x4ef   : > { %1989 = vrcp.f32 %v913_v12  ;;  %v1150_v29 = vadd.f32 %v1149_v20, %v1146_v24  ;;  %v1704_v12 = vld [vmem:[%s2581_s7] ss:$0 sm:$0xff]  ;;  %v1960_v20 = vld [vmem:[%s2587_s13 + $0x8] sm:$0xff]  }
 0x4f0   : > { %1991 = vrcp.f32 %v1033_v16 }
 0x4f1   : > { %1993 = vrcp.f32 %v1150_v29 }
 0x4f9   : > { %v1990_v23 = vpop.eup %1989 }
 0x4fa   : > { %v1992_v35 = vpop.eup %1991 }
 0x4fb   : > { %v1994_v43 = vpop.eup %1993 }
 0x51f   : > { %v960_v19 = vpop.f32.mrb[4].mxu1 }
 0x520   : > { %v966_v21 = vadd.f32 %v960_v19, %v909_v11  ;;  %v1806_v22 = vpop.f32.mrb[5].mxu1  ;;  %v1959_v19 = vld [vmem:[%s2587_s13] sm:$0xff]  }
 0x521   : > { %v963_v25 = vpop.f32.mrb[6].mxu1  ;;  %v1962_v22 = vld [vmem:[%s2587_s13 + $0x18] sm:$0xff]  }
 0x522   : > { %v968_v27 = vmul.f32 %v1990_v23, %v966_v21  ;;  %v1807_v28 = vpop.f32.mrb[7].mxu1  ;;  %v1961_v21 = vld [vmem:[%s2587_s13 + $0x10] sm:$0xff]   ;;  %v1963_v23 = vld [vmem:[%s2587_s13 + $0x20] sm:$0xff]  }
 0x523   : > { %v1965_v25 = vld [vmem:[%s2587_s13 + $0x30] sm:$0xff]  }
 0x524   : > { %v969_v31 = vpack.c.bf16 %v968_v27, %v968_v27  ;;  %v1710_v27 = vld [vmem:[%s2586_s12] ss:$0 sm:$0xff] }
 0x526   : > { %1205 = vrot.lane.b32.xlu0 %v969_v31, %s2120_s10  ;;  %s2610_s10 = sld [smem:[#allocation15_spill]] }
 0x527   : > { %v1077_v32 = vpop.f32.mrb[8].mxu1 }
 0x528   : > { %v1083_v33 = vadd.f32 %v1077_v32, %v1029_v15  ;;  %v1818_v34 = vpop.f32.mrb[9].mxu1 }
 0x529   : > { %v1080_v36 = vpop.f32.mrb[10].mxu1 }
 0x52a   : > { %v1085_v37 = vmul.f32 %v1992_v35, %v1083_v33  ;;  %v1819_v38 = vpop.f32.mrb[11].mxu1 }
 0x52c   : > { %v1086_v39 = vpack.c.bf16 %v1085_v37, %v1085_v37 }
 0x52e   : > { %1208 = vrot.lane.b32.xlu1 %v1086_v39, %s2121_s30  ;;  %s1724_s30 = sshll.u32 %s2103_s21, 6 }
 0x52f   : > { %v1194_v40 = vpop.f32.mrb[12].mxu1 }
 0x530   : > { %v1200_v41 = vadd.f32 %v1194_v40, %v1146_v24  ;;  %v1830_v42 = vpop.f32.mrb[13].mxu1  ;;  %v1964_v24 = vld [vmem:[%s2587_s13 + $0x28] sm:$0xff]  }
 0x531   : > { %v1197_v44 = vpop.f32.mrb[14].mxu1  ;;  %v1706_v42 = vld [vmem:[%s2609_s22] ss:$0 sm:$0xff]  ;;  %s2524_s22 = scalar_lea.hbm %s2611_s29, %s1724_s30 }
 0x532   : > { %v1202_v45 = vmul.f32 %v1994_v43, %v1200_v41  ;;  %v1831_v46 = vpop.f32.mrb[15].mxu1 }
 0x534   : > { %v1203_v47 = vpack.c.bf16 %v1202_v45, %v1202_v45 }
 0x536   : > { %1211 = vrot.lane.b32.xlu1 %v1203_v47, %s2122_s27  ;;  %s523_s27 = scalar_lea.vmem [#allocation7], %s1677_s28  ;;  %s2123_s28 = smov [#allocation7]  }
 0x537   : > { %s1589_s14 = sshll.u32 %s523_s27, 4  ;;  %s2033_s17 = sshll.u32 %s2123_s28, 4  ;;  %s2526_s14 = int_to_ptr.vmem [resolvable:$true] %s1589_s14  ;;  %s2034_s17 = int_to_ptr.vmem [resolvable:$false] %s2033_s17 }
 0x538   : > { %s2029_s21 = scalar_lea.vmem %s2526_s14, 64  ;;  %p2036_p7 = scmp.lt.s32.totalorder %s2526_s14, %s2034_s17 }
 0x539   : > { %p2030_p8 = scmp.ne.s32.totalorder %s2526_s14, %s2029_s21 }
 0x53b   : > { %p2031_p11 = pnand %p2030_p8, %p2612_p9 }
 0x53d   : > { %p2032_p0 = pneg %p2031_p11 }
 0x598   : > { %v1206_v48 = vpop.permute.xlu0 %1205 }
 0x599   : > { %v1215_v51 = vsel %vm733_vm3, %v845_v50, %v1206_v48  ;;  %v1722_v50 = vld [vmem:[%s2610_s10] ss:$0 sm:$0xff]  ;;  %s2035_s10 = scalar_lea.vmem %s2034_s17, 128 }
 0x59a   : > { %p2037_p13 = scmp.lt.s32.totalorder %s2035_s10, %s2029_s21 }
 0x59c   : > { %p2038_p3 = por %p2037_p13, %p2036_p7 }
 0x59e   : > { %p2039_p6 = pnand %p2038_p3, %p2032_p0 }
 0x5a0   : > { %v1209_v49 = vpop.permute.xlu1 %1208 }
 0x5a1   : > { %v1218_v52 = vsel %vm1216_vm5, %v1215_v51, %v1209_v49 }
 0x5a8   : > { %v1212_v53 = vpop.permute.xlu1 %1211 }
 0x5a9   : > { %v1221_v54 = vsel %vm1219_vm6, %v1218_v52, %v1212_v53 }
 0x5aa   : > { %1837 = vmatmul.mubr.msk.bf16.vlgmr.msra.gmra.mrb[24].mxu0 %vm531_vm0, %v1221_v54 }
 0x5ab   : > { %1852 = vmatprep.mubr.msk.bf16.mxu0 %vm2115_vm1, %v2114_v17 }
 0x67d   : > { %v1281_v56 = vpop.f32.mrb[24].mxu0 }
 0x67e   : > { %v1282_v57 = vadd.f32 %v1700_v55, %v1281_v56  ;;  %v1838_v58 = vpop.f32.mrb[25].mxu0 }
 0x67f   : > { %v1284_v59 = vpop.f32.mrb[26].mxu0 }
 0x680   : > { %v2446_v60 = vadd.f32 %v1282_v57, %v2325_v3  ;;  %v1839_v61 = vpop.f32.mrb[27].mxu0  ;;  %v1956_v3 = vld [vmem:[%s2585_s11] sm:$0xff]  }
 0x681   : > { %1849 = vmatpush3.bf16.msra.mxu0 %v1956_v3 }
 0x682   : > { %v1288_v62 = vsel %vm531_vm0, %v2446_v60, 0.0  ;;  %1850 = vmatprep.subr.bf16.mxu0 %v2114_v17 }
 0x683   : > { %1289 = vadd.xlane.f32.xlu1 %v1288_v62 }
 0x685   : > { %1851 = vmatpush3.bf16.msra.mxu0 %v1958_v7 }
 0x710   : > { %v1290_v63 = vpop.xlane.xlu1 %1289 }
 0x711   : > { %v1291_v0 = vmul.f32 0.03125, %v1290_v63 }
 0x713   : > { %v1292_v1 = vsub.f32 %v2446_v60, %v1291_v0 }
 0x715   : > { %v1293_v2 = vmul.f32 %v1292_v1, %v1292_v1 }
 0x717   : > { %v1294_v4 = vsel %vm531_vm0, %v1293_v2, 0.0 }
 0x718   : > { %1295 = vadd.xlane.f32.xlu0 %v1294_v4 }
 0x7a5   : > { %v1296_v8 = vpop.xlane.xlu0 %1295 }
 0x7a6   : > { %v1297_v9 = vmul.f32 0.03125, %v1296_v8 }
 0x7a8   : > { %v1298_v10 = vadd.f32 1e-05, %v1297_v9 }
 0x7aa   : > { %1995 = vrsqrt.f32 %v1298_v10 }
 0x7b4   : > { %v1996_v11 = vpop.eup %1995 }
 0x7b5   : > { %v1300_v13 = vmul.f32 %v1996_v11, %v1292_v1 }
 0x7b7   : > { %v1308_v15 = vmul.f32 %v1704_v12, %v1300_v13 }
 0x7b9   : > { %v1316_v16 = vadd.f32 %v1705_v14, %v1308_v15 }
 0x7bb   : > { %v1317_v18 = vpack.c.bf16 %v1316_v16, %v1316_v16 }
 0x7bd   : > { %1845 = vmatmul.mubr.msk.bf16.vlgmr.msra.gmra.mrb[16].mxu1 %vm531_vm0, %v1317_v18  ;;  %1853 = vmatmul.mubr.msk.bf16.vlgmr.msra.gmra.mrb[28].mxu0 %vm531_vm0, %v1317_v18 }
 0x7be   : > { %1872 = vmatprep.mubr.msk.bf16.mxu1 %vm2115_vm1, %v2114_v17  ;;  %1857 = vmatpush3.bf16.msra.mxu1 %v1959_v19 }
 0x7bf   : > { %1858 = vmatprep.subr.bf16.mxu1 %v2114_v17 }
 0x7c2   : > { %1859 = vmatpush3.bf16.msra.mxu1 %v1960_v20 }
 0x7c3   : > { %1860 = vmatprep.subr.bf16.mxu1 %v2114_v17 }
 0x7c6   : > { %1861 = vmatpush3.bf16.msra.mxu1 %v1961_v21 }
 0x7c7   : > { %1862 = vmatprep.subr.bf16.mxu1 %v2114_v17 }
 0x7ca   : > { %1863 = vmatpush3.bf16.msra.mxu1 %v1962_v22 }
 0x7cb   : > { %1864 = vmatprep.subr.bf16.mxu1 %v2114_v17 }
 0x7ce   : > { %1865 = vmatpush3.bf16.msra.mxu1 %v1963_v23 }
 0x7cf   : > { %1866 = vmatprep.subr.bf16.mxu1 %v2114_v17 }
 0x7d2   : > { %1867 = vmatpush3.bf16.msra.mxu1 %v1964_v24 }
 0x7d3   : > { %1868 = vmatprep.subr.bf16.mxu1 %v2114_v17 }
 0x7d6   : > { %1869 = vmatpush3.bf16.msra.mxu1 %v1965_v25 }
 0x7d7   : > { %1870 = vmatprep.subr.bf16.mxu1 %v2114_v17 }
 0x7da   : > { %1871 = vmatpush3.bf16.msra.mxu1 %v1966_v26 }
 0x890   : > { %v1378_v28 = vpop.f32.mrb[16].mxu1  ;;  %v1441_v29 = vpop.f32.mrb[28].mxu0 }
 0x891   : > { %v1442_v30 = vadd.f32 %v1710_v27, %v1441_v29  ;;  %v1846_v31 = vpop.f32.mrb[17].mxu1  ;;  %v1854_v32 = vpop.f32.mrb[29].mxu0  ;;  %v1379_v45 = vadd.f32 %v1706_v42, %v1378_v28 }
 0x892   : > { %v1381_v33 = vpop.f32.mrb[18].mxu1  ;;  %v1444_v34 = vpop.f32.mrb[30].mxu0 }
 0x893   : > { %v1448_v35 = vmul.f32 0.044715, %v1442_v30  ;;  %v1847_v36 = vpop.f32.mrb[19].mxu1  ;;  %v1855_v37 = vpop.f32.mrb[31].mxu0  ;;  %v1447_v43 = vmul.f32 0.5, %v1442_v30 }
 0x895   : > { %v1449_v38 = vmul.f32 %v1448_v35, %v1442_v30 }
 0x897   : > { %v1450_v39 = vmul.f32 %v1449_v38, %v1442_v30 }
 0x899   : > { %v1451_v40 = vadd.f32 %v1450_v39, %v1442_v30 }
 0x89b   : > { %v1452_v41 = vmul.f32 0.7978846, %v1451_v40 }
 0x89d   : > { %1997 = vtanh.f32 %v1452_v41 }
 0x8a7   : > { %v1998_v17 = vpop.eup %1997 }
 0x8a8   : > { %v1454_v44 = vadd.f32 1.0, %v1998_v17 }
 0x8aa   : > { %v1455_v46 = vmul.f32 %v1454_v44, %v1447_v43 }
 0x8ac   : > { %v1456_v47 = vmul.f32 %v1455_v46, %v1379_v45 }
 0x8ae   : > { %v1457_v48 = vpack.c.bf16 %v1456_v47, %v1456_v47 }
 0x8b0   : > { %1873 = vmatmul.mubr.bf16.vlgmr.msra.gmra.mrb[20].mxu1 %v1457_v48 }
 0x983   : > { %v1556_v49 = vpop.f32.mrb[20].mxu1 }
 0x984   : > { %v1562_v51 = vadd.f32 %v1556_v49, %v2446_v60  ;;  %v1874_v52 = vpop.f32.mrb[21].mxu1 }
 0x985   : > { %v1559_v53 = vpop.f32.mrb[22].mxu1 }
 0x986   : > { %v1570_v54 = vadd.f32 %v1722_v50, %v1562_v51  ;;  %v1875_v55 = vpop.f32.mrb[23].mxu1 }
 0x988   : > { %v1571_v56 = vpack.c.bf16 %v1570_v54, %v1570_v54 }
 0x98a   : > { %1573 = vst.msk [vmem:[%s523_s27] sm:$0xf] %vm623_vm2, %v1571_v56 }
 0x98b   : > { %2042 = shalt.err (!%p2039_p6)
}
 0x98c   : > { %s2043_s15 = scalar_lea.hbm %s2524_s22, 64  ;;  %s2047_s24 = scalar_lea.hbm %s2611_s29, 128 }
 0x98d   : > { %p2044_p4 = scmp.ne.s32.totalorder %s2524_s22, %s2043_s15  ;;  %p2048_p1 = scmp.lt.u32.totalorder %s2524_s22, %s2611_s29 }
 0x98e   : > { %p2049_p2 = scmp.lt.u32.totalorder %s2047_s24, %s2043_s15  ;;  %p2051_p8 = scmp.lt.u32.totalorder %s2043_s15, %s2524_s22 }
 0x98f   : > { %p2045_p10 = pnand %p2044_p4, %p2612_p9 }
 0x990   : > { %p2050_p5 = por %p2049_p2, %p2048_p1 }
 0x991   : > { %p2046_p12 = pneg %p2045_p10 }
 0x992   : > { %p2052_p11 = por %p2051_p8, %p2050_p5 }
 0x994   : > { %p2053_p0 = pnand %p2052_p11, %p2046_p12 }
 0x996   : > { %2056 = shalt.err (!%p2053_p0)
}
 0x997   : > { %1878 = dma.vmem_to_hbm [thread:$0]  (%p2612_p9), %s2526_s14, 64, %s2524_s22, %s1575_s25  }
 0x998 PF: > { %s2613_s21 = sld [smem:[#allocation10_spill]]  ;;  %p2614_p7 = scmp.ne.s32.totalorder %s2605_s18, 0 }
 0x999   : > { %p2615_p13 = scmp.ge.s32.totalorder %s2111_s23, 2 }
 0x99b   : > { %p1885_p3 = pnand %p2615_p13, %p2614_p7 }
 0x99e   : > { %s1601_s17 = sand.u32 1, %s2613_s21  }
 0x99f   : > { %s1602_s10 = scalar_lea.sflag [#allocation6], %s1601_s17 }
 0x9a0   : > { %2086 = dma.done.wait (!%p1885_p3), %s1602_s10, 64  }
 0x9a1   : > { %2088 = vsyncadd (!%p1885_p3), %s1602_s10, 4294967232  ;;  %s31_s23 = sadd.s32 1, %s2111_s23   ;;  %s2616_s16 = sld [smem:[#allocation13_spill]] }
 0x9a2   : > { %p28_p6 = scmp.ge.s32.totalorder %s31_s23, 4   ;;  %s2617_s21 = sld [smem:[#allocation11_spill]] }
 0x9a3   : > { %s2618_s22 = sld [smem:[#allocation12_spill]]  ;;  %s2619_s18 = smov %s2095_s19 }
 0x9a4   : > { %s2620_s19 = smov %s2099_s20  ;;  %30 = sbr.rel (!%p28_p6) target bundleno = 10 (0xa), region = 130 }
 0x9a7   : > { %s2621_s20 = smov %s2616_s16 }
 0x9ab   :  { %1607 = vsyncpa [#allocation5], 1 }
 0x9ac   :  { %1609 = vsyncpa [#allocation5 + $0x1], 1 }
 0x9ad   :  { %1610 = vsyncpa [#allocation6], 1 }
 0x9ae   :  { %1612 = vsyncpa [#allocation6 + $0x1], 1 }

// kernel: tpu_custom_call.1
= control target key start
LH: loop header
LB: loop body
LE: loop exit
PB: predicated region body
PF: predicated region fallthrough
CT: control target
= control target key end

     0   :  { %s2574_s0 = inlined_call_operand.hbm [shape: bf16[2,8,32], index: 0, kind: input, shape index: {}]   ;;  %s2575_s1 = inlined_call_operand.vmem [shape: f32[1,32], index: 1, kind: input, shape index: {}]   ;;  %s2576_s2 = inlined_call_operand.vmem [shape: f32[1,32], index: 2, kind: input, shape index: {}]   ;;  %s2577_s3 = inlined_call_operand.vmem [shape: bf16[32,32], index: 3, kind: input, shape index: {}]   ;;  %s2578_s4 = inlined_call_operand.vmem [shape: bf16[32,64], index: 4, kind: input, shape index: {}]   ;;  %s2579_s5 = inlined_call_operand.vmem [shape: bf16[32,32], index: 5, kind: input, shape index: {}]   ;;  %s2580_s6 = inlined_call_operand.vmem [shape: f32[1,32], index: 6, kind: input, shape index: {}]   ;;  %s2581_s7 = inlined_call_operand.vmem [shape: f32[1,32], index: 7, kind: input, shape index: {}]   ;;  %s2582_s8 = inlined_call_operand.vmem [shape: f32[1,32], index: 8, kind: input, shape index: {}]   ;;  %s2583_s9 = inlined_call_operand.vmem [shape: bf16[1,32,128], index: 9, kind: input, shape index: {}]   ;;  %s2584_s10 = inlined_call_operand.vmem [shape: f32[1,1,128], index: 10, kind: input, shape index: {}]   ;;  %s2585_s11 = inlined_call_operand.vmem [shape: bf16[1,32,128], index: 11, kind: input, shape index: {}]   ;;  %s2586_s12 = inlined_call_operand.vmem [shape: f32[1,1,128], index: 12, kind: input, shape index: {}]   ;;  %s2587_s13 = inlined_call_operand.vmem [shape: bf16[1,128,32], index: 13, kind: input, shape index: {}]   ;;  %s2588_s14 = inlined_call_operand.vmem [shape: f32[1,32], index: 14, kind: input, shape index: {}]   ;;  %s2589_s15 = inlined_call_operand.hbm [shape: bf16[2,8,32], index: 15, kind: output, shape index: {}]  }
   0x1   :  { %2595 = sst [smem:[#allocation14_spill]] %s2584_s10 }
   0x2   :  { %2596 = sst [smem:[#allocation15_spill]] %s2588_s14 }
   0x3   :  { %2597 = sst [smem:[#allocation16_spill]] %s2589_s15 }
   0x4   :  { %20 = vsyncpa [#allocation5], 0 }
   0x5   :  { %22 = vsyncpa [#allocation5 + $0x1], 0 }
   0x6   :  { %23 = vsyncpa [#allocation6], 0 }
   0x7   :  { %25 = vsyncpa [#allocation6 + $0x1], 0  ;;  %s2204_s18 = smov 0   ;;  %s2206_s19 = smov 0  }
   0x8   :  { %s2208_s20 = smov 0   ;;  %s2210_s21 = smov 0  }
   0x9   :  { %s2212_s22 = smov 0   ;;  %s2214_s23 = smov 0  }
   0xa LB: > { %2598 = sst [smem:[#allocation10_spill]] %s2091_s18  ;;  %s1670_s24 = sadd.s32 4294967295, %s2111_s23   ;;  %s2111_s23 = sphi %s2214_s23, %s31_s23   ;;  %s2107_s22 = sphi %s2212_s22, %s2618_s22   ;;  %s2103_s21 = sphi %s2210_s21, %s2617_s21   ;;  %s2099_s20 = sphi %s2208_s20, %s2621_s20   ;;  %s2095_s19 = sphi %s2206_s19, %s2620_s19   ;;  %s2091_s18 = sphi %s2204_s18, %s2619_s18  }
   0xb   : > { %2599 = sst [smem:[#allocation11_spill]] %s2107_s22  ;;  %s1671_s25 = sadd.s32 4294967294, %s2111_s23  }
   0xc   : > { %s43_s26 = sadd.s32 1, %s2107_s22  ;;  %s50_s27 = sadd.s32 1, %s2099_s20 }
   0xd   : > { %p45_p0 = scmp.ge.s32.totalorder %s43_s26, 2  ;;  %p57_p1 = scmp.ne.s32.totalorder %s2099_s20, %s2095_s19 }
   0xe   : > { %p58_p2 = scmp.eq.s32.totalorder %s2111_s23, 0  ;;  %p63_p3 = scmp.ne.s32.totalorder %s2095_s19, %s2091_s18 }
   0xf   : > { %s2623_s26 = smov (%p45_p0, %s43_s26), 0  ;;  %p64_p5 = scmp.eq.s32.totalorder %s1670_s24, 0 }
  0x10   : > { %2600 = sst [smem:[#allocation12_spill]] %s2623_s26  ;;  %p2245_p4 = por %p58_p2, %p57_p1 }
  0x11   : > { %s47_s29 = ssub.s32 %s2107_s22, %s2623_s26  ;;  %p383_p6 = scmp.eq.s32.totalorder %s1670_s24, 1 }
  0x12   : > { %p48_p7 = scmp.eq.s32.totalorder %s47_s29, 0  ;;  %p2251_p8 = por %p64_p5, %p63_p3 }
  0x13   : > { %p2255_p9 = por %p383_p6, %p57_p1  ;;  %p389_p10 = scmp.eq.s32.totalorder %s1671_s25, 1 }
  0x14   : > { %s2260_s17 = scalar_select %p48_p7, %s2099_s20, %s50_s27  }
  0x15   : > { %s2603_s16 = scalar_select %p2255_p9, 1, 0 }
  0x16   : > { %2604 = sst [smem:[#allocation13_spill]] %s2260_s17  ;;  %p2262_p11 = por %p389_p10, %p63_p3 }
  0x17   : > { %p1888_p13 = scmp.lt.s32.totalorder %s2111_s23, 2  ;;  %s451_s24 = sand.u32 1, %s2099_s20  }
  0x18   : > { %s2605_s18 = scalar_select %p2262_p11, 1, 0 }
  0x19   : > { %s1674_s29 = sshll.u32 %s451_s24, 2  ;;  %s1675_s26 = sshll.u32 %s2107_s22, 6 }
  0x1a   : > { %s2273_s10 = scalar_lea.hbm %s2574_s0, %s1675_s26  ;;  %s455_s25 = scalar_lea.vmem [#allocation4], %s1674_s29 }
  0x1b   : > { %s462_s27 = sshll.u32 %s455_s25, 4  ;;  %p2279_p0 = pnand %p1888_p13, %p2245_p4  ;;  %s2275_s27 = int_to_ptr.vmem [resolvable:$true] %s462_s27 }
  0x1c   : > { %s452_s14 = scalar_lea.sflag [#allocation5], %s451_s24  ;;  %s1999_s15 = scalar_lea.hbm %s2273_s10, 64 }
  0x1d   : > { %p2000_p3 = scmp.ne.s32.totalorder %s2273_s10, %s1999_s15  ;;  %p2001_p5 = pneg %p2279_p0 }
  0x1e   : > { %s2004_s28 = scalar_lea.hbm %s2574_s0, 128  ;;  %p2005_p4 = scmp.lt.u32.totalorder %s2273_s10, %s2574_s0 }
  0x1f   : > { %p2002_p6 = pnand %p2001_p5, %p2000_p3  ;;  %p2006_p10 = scmp.lt.u32.totalorder %s2004_s28, %s1999_s15 }
  0x20   : > { %p2008_p12 = scmp.lt.u32.totalorder %s1999_s15, %s2273_s10 }
  0x21   : > { %p2003_p7 = pneg %p2002_p6  ;;  %p2007_p13 = por %p2006_p10, %p2005_p4 }
  0x23   : > { %p2009_p1 = por %p2008_p12, %p2007_p13 }
  0x25   : > { %p2010_p2 = pnand %p2009_p1, %p2003_p7 }
  0x27   : > { %2013 = shalt.err (!%p2010_p2)
}
  0x28   : > { %s2014_s24 = scalar_lea.vmem %s2275_s27, 64  ;;  %s2113_s26 = smov [#allocation4]  }
  0x29   : > { %p2015_p3 = scmp.ne.s32.totalorder %s2275_s27, %s2014_s24  ;;  %s2019_s29 = sshll.u32 %s2113_s26, 4  ;;  %s2020_s29 = int_to_ptr.vmem [resolvable:$false] %s2019_s29 }
  0x2a   : > { %s2021_s22 = scalar_lea.vmem %s2020_s29, 128  ;;  %p2022_p9 = scmp.lt.s32.totalorder %s2275_s27, %s2020_s29 }
  0x2b   : > { %p2017_p6 = pnand %p2015_p3, %p2001_p5  ;;  %p2023_p4 = scmp.lt.s32.totalorder %s2021_s22, %s2014_s24 }
  0x2d   : > { %p2018_p11 = pneg %p2017_p6  ;;  %p2024_p10 = por %p2023_p4, %p2022_p9 }
  0x2f   : > { %p2025_p12 = pnand %p2024_p10, %p2018_p11 }
  0x31   : > { %2028 = shalt.err (!%p2025_p12)
}
  0x32   : > { %1883 = dma.hbm_to_vmem [thread:$0]  (!%p2279_p0), %s2273_s10, 64, %s2275_s27, %s452_s14  }
  0x33   : > { %p2607_p1 = scmp.lt.s32.totalorder %s2111_s23, 3  ;;  %p2608_p2 = scmp.ge.s32.totalorder %s2111_s23, 1 }
  0x35   : > { %p468_p5 = pnand %p2608_p2, %p2607_p1 }
  0x36   : > { %s2315_s15 = sand.u32 (!%p468_p5), 1, %s2095_s19  }
  0x37   : > { %471 = sbr.rel (%p468_p5) target bundleno = 2456 (0x998), region = 80  ;;  %s1677_s28 = sshll.u32 (!%p468_p5), %s2315_s15, 2 }
  0x38   : > { %s474_s25 = scalar_lea.sflag (!%p468_p5), [#allocation5], %s2315_s15  ;;  %s477_s17 = scalar_lea.vmem (!%p468_p5), [#allocation4], %s1677_s28 }
  0x3e   : > { %2082 = dma.done.wait (%p2251_p8), %s474_s25, 64  }
  0x3f   : > { %2084 = vsyncadd (%p2251_p8), %s474_s25, 4294967232  ;;  %vm531_vm0 = vcmask 261120   ;;  %v529_v0 = vld [vmem:[%s477_s17] sm:$0xf]  ;;  %v1947_v16 = vld [vmem:[%s2578_s4] sm:$0xff]   ;;  %v2114_v17 = vmov 0.0  }
  0x40   : > { %v637_v1 = vld [vmem:[%s477_s17] sm:$0xf]  ;;  %v530_v2 = vunpack.c.l.bf16 %v529_v0  ;;  %1768 = vmatprep.subr.bf16.mxu0 %v2114_v17  ;;  %1790 = vmatprep.subr.bf16.mxu1 %v2114_v17  ;;  %vm2115_vm1 = vmmov 0   ;;  %v1679_v26 = vld [vmem:[%s2575_s1] ss:$0 sm:$0xff]  ;;  %vm623_vm2 = vcmask 257024  }
  0x41   : > { %v2325_v3 = vunpack.c.l.bf16 %v637_v1  ;;  %1769 = vmatpush3.bf16.msra.mxu0 %v1947_v16  ;;  %v1948_v18 = vld [vmem:[%s2578_s4 + $0x8] sm:$0xff]   ;;  %1772 = vmatprep.mubr.msk.bf16.mxu0 %vm2115_vm1, %v2114_v17  ;;  %v1680_v28 = vld [vmem:[%s2576_s2] ss:$0 sm:$0xff]  ;;  %vm733_vm3 = vcmask 64512   ;;  %s2116_s27 = smov 120   ;;  %s2117_s14 = smov 112  }
  0x42   : > { %v532_v4 = vsel %vm531_vm0, %v530_v2, 0.0  ;;  %1770 = vmatprep.subr.bf16.mxu0 %v2114_v17  ;;  %1792 = vmatprep.mubr.msk.bf16.mxu1 %vm2115_vm1, %v2114_v17  ;;  %v1949_v33 = vld [vmem:[%s2577_s3] sm:$0xff]   ;;  %v1950_v36 = vld [vmem:[%s2577_s3 + $0x8] sm:$0xff]   ;;  %s2118_s24 = smov 104   ;;  %s2119_s26 = smov 96   ;;  %vm798_vm4 = vcmask 1043456  }
  0x43   : > { %v640_v5 = vsel %vm531_vm0, %v2325_v3, 0.0  ;;  %533 = vadd.xlane.f32.xlu0 %v532_v4  ;;  %s2120_s10 = smov 8   ;;  %s2121_s30 = smov 16   ;;  %vm1216_vm5 = vcmask 130048   ;;  %vm1219_vm6 = vcmask 195584  }
  0x44   : > { %s2609_s22 = sld [smem:[#allocation14_spill]]  ;;  %s2611_s29 = sld [smem:[#allocation16_spill]] }
  0x45   : > { %1771 = vmatpush3.bf16.msra.mxu0 %v1948_v18  ;;  %s1575_s25 = scalar_lea.sflag [#allocation6], %s2315_s15  ;;  %p2612_p9 = scmp.ne.s32.totalorder %s2603_s16, 0 }
  0x46   : > { %1776 = vmatprep.subr.bf16.mxu0 %v2114_v17 }
  0x47   : > { %641 = vadd.xlane.f32.xlu0 %v640_v5 }
  0xd0   : > { %v534_v6 = vpop.xlane.xlu0 %533 }
  0xd1   : > { %v536_v7 = vmul.f32 0.03125, %v534_v6 }
  0xd3   : > { %v537_v8 = vsub.f32 %v530_v2, %v536_v7 }
  0xd4   : > { %v642_v9 = vpop.xlane.xlu0 %641 }
  0xd5   : > { %v644_v10 = vmul.f32 0.03125, %v642_v9  ;;  %v538_v11 = vmul.f32 %v537_v8, %v537_v8 }
  0xd7   : > { %v645_v12 = vsub.f32 %v2325_v3, %v644_v10  ;;  %v539_v13 = vsel %vm531_vm0, %v538_v11, 0.0 }
  0xd8   : > { %540 = vadd.xlane.f32.xlu1 %v539_v13 }
  0xd9   : > { %v646_v14 = vmul.f32 %v645_v12, %v645_v12 }
  0xdb   : > { %v647_v15 = vsel %vm531_vm0, %v646_v14, 0.0 }
  0xdc   : > { %648 = vadd.xlane.f32.xlu1 %v647_v15 }
 0x165   : > { %v541_v19 = vpop.xlane.xlu1 %540 }
 0x166   : > { %v542_v20 = vmul.f32 0.03125, %v541_v19 }
 0x168   : > { %v543_v21 = vadd.f32 1e-05, %v542_v20 }
 0x169   : > { %v649_v22 = vpop.xlane.xlu1 %648 }
 0x16a   : > { %1967 = vrsqrt.f32 %v543_v21  ;;  %v650_v23 = vmul.f32 0.03125, %v649_v22 }
 0x16c   : > { %v651_v24 = vadd.f32 1e-05, %v650_v23 }
 0x16e   : > { %1969 = vrsqrt.f32 %v651_v24 }
 0x174   : > { %v1968_v25 = vpop.eup %1967 }
 0x175   : > { %v545_v27 = vmul.f32 %v1968_v25, %v537_v8 }
 0x177   : > { %v553_v29 = vmul.f32 %v1679_v26, %v545_v27 }
 0x178   : > { %v1970_v30 = vpop.eup %1969 }
 0x179   : > { %v653_v31 = vmul.f32 %v1970_v30, %v645_v12  ;;  %v561_v32 = vadd.f32 %v1680_v28, %v553_v29 }
 0x17b   : > { %v562_v34 = vpack.c.bf16 %v561_v32, %v561_v32  ;;  %v661_v35 = vmul.f32 %v1679_v26, %v653_v31 }
 0x17d   : > { %1773 = vmatmul.mubr.msk.bf16.vlgmr.msra.gmra.mrb[0].mxu0 %vm531_vm0, %v562_v34  ;;  %v669_v37 = vadd.f32 %v1680_v28, %v661_v35 }
 0x17e   : > { %1777 = vmatpush3.bf16.msra.mxu0 %v1949_v33  ;;  %1780 = vmatprep.mubr.msk.bf16.mxu0 %vm2115_vm1, %v2114_v17 }
 0x17f   : > { %1778 = vmatprep.subr.bf16.mxu0 %v2114_v17  ;;  %v670_v38 = vpack.c.bf16 %v669_v37, %v669_v37 }
 0x182   : > { %1779 = vmatpush3.bf16.msra.mxu0 %v1950_v36 }
 0x183   : > { %1784 = vmatprep.subr.bf16.mxu0 %v2114_v17 }
 0x185   : > { %1781 = vmatmul.mubr.msk.bf16.vlgmr.msra.gmra.mrb[4].mxu0 %vm531_vm0, %v670_v38 }
 0x186   : > { %1786 = vmatprep.mubr.msk.bf16.mxu0 %vm2115_vm1, %v2114_v17 }
 0x250   : > { %v616_v39 = vpop.f32.mrb[0].mxu0 }
 0x251   : > { %v622_v40 = vpack.c.bf16 %v616_v39, %v616_v39  ;;  %v1774_v41 = vpop.f32.mrb[1].mxu0 }
 0x252   : > { %v619_v42 = vpop.f32.mrb[2].mxu0 }
 0x253   : > { %624 = vst.msk [vmem:[#allocation2] sm:$0xf] %vm623_vm2, %v622_v40  ;;  %v1775_v43 = vpop.f32.mrb[3].mxu0 }
 0x258   : > { %v724_v44 = vpop.f32.mrb[4].mxu0 }
 0x259   : > { %v730_v45 = vpack.c.bf16 %v724_v44, %v724_v44  ;;  %v1782_v46 = vpop.f32.mrb[5].mxu0 }
 0x25a   : > { %v727_v47 = vpop.f32.mrb[6].mxu0  ;;  %v731_v48 = vld [vmem:[#allocation2] sm:$0xf] }
 0x25b   : > { %847 = vrot.lane.b32.xlu1 %v730_v45, %s2116_s27  ;;  %v1783_v49 = vpop.f32.mrb[7].mxu0  ;;  %v738_v50 = vsel %vm733_vm3, %v731_v48, 0  ;;  %v1692_v51 = vcombine.low %v731_v48, %v731_v48 }
 0x25c   : > { %1785 = vmatpush3.bf16.xpose.msra.mxu0 %v738_v50 }
 0x25d   : > { %852 = vrot.lane.b32.xlu0 %v1692_v51, %s2116_s27  ;;  %1796 = vmatprep.subr.bf16.mxu0 %v2114_v17 }
 0x25f   : > { %972 = vrot.lane.b32.xlu1 %v1692_v51, %s2117_s14 }
 0x261   : > { %1089 = vrot.lane.b32.xlu0 %v1692_v51, %s2118_s24 }
 0x263   : > { %970 = vrot.lane.b32.xlu1 %v730_v45, %s2117_s14  ;;  %1787 = vmatmul.mubr.msk.bf16.vlgmr.msra.gmra.mrb[8].mxu0 %vm733_vm3, %v730_v45 }
 0x264   : > { %1798 = vmatprep.mubr.msk.bf16.mxu0 %vm2115_vm1, %v2114_v17 }
 0x265   : > { %628 = vrot.lane.b32.xlu0 %v622_v40, %s2119_s26 }
 0x267   : > { %1087 = vrot.lane.b32.xlu1 %v730_v45, %s2118_s24 }
 0x2cd   : > { %v848_v52 = vpop.permute.xlu1 %847 }
 0x2cf   : > { %v853_v53 = vpop.permute.xlu0 %852 }
 0x2d0   : > { %v858_v54 = vsel %vm733_vm3, %v853_v53, 0 }
 0x2d1   : > { %1797 = vmatpush3.bf16.xpose.msra.mxu0 %v858_v54  ;;  %v973_v56 = vpop.permute.xlu1 %972 }
 0x2d2   : > { %1808 = vmatprep.subr.bf16.mxu0 %v2114_v17  ;;  %v978_v58 = vsel %vm733_vm3, %v973_v56, 0 }
 0x2d3   : > { %v1090_v55 = vpop.permute.xlu0 %1089 }
 0x2d4   : > { %v1095_v61 = vsel %vm733_vm3, %v1090_v55, 0 }
 0x2d5   : > { %v971_v59 = vpop.permute.xlu1 %970 }
 0x2d7   : > { %v629_v57 = vpop.permute.xlu0 %628 }
 0x2d8   : > { %631 = vst.msk [vmem:[#allocation3] sm:$0xf] %vm623_vm2, %v629_v57  ;;  %1799 = vmatmul.mubr.msk.bf16.vlgmr.msra.gmra.mrb[12].mxu0 %vm733_vm3, %v848_v52 }
 0x2d9   : > { %1809 = vmatpush3.bf16.xpose.msra.mxu0 %v978_v58  ;;  %1810 = vmatprep.mubr.msk.bf16.mxu0 %vm2115_vm1, %v2114_v17  ;;  %v1088_v63 = vpop.permute.xlu1 %1087 }
 0x2da   : > { %1820 = vmatprep.subr.bf16.mxu0 %v2114_v17 }
 0x2df   : > { %v732_v60 = vld [vmem:[#allocation3] sm:$0xf] }
 0x2e0   : > { %1811 = vmatmul.mubr.msk.bf16.vlgmr.msra.gmra.mrb[16].mxu0 %vm733_vm3, %v971_v59  ;;  %v800_v62 = vsel %vm798_vm4, %v732_v60, 0  ;;  %v1694_v6 = vcombine.low %v732_v60, %v732_v60 }
 0x2e1   : > { %1791 = vmatpush3.bf16.msra.mxu1 %v800_v62  ;;  %1821 = vmatpush3.bf16.xpose.msra.mxu0 %v1095_v61 }
 0x2e2   : > { %1822 = vmatprep.mubr.msk.bf16.mxu0 %vm2115_vm1, %v2114_v17  ;;  %1802 = vmatprep.subr.bf16.mxu1 %v2114_v17 }
 0x2e3   : > { %1832 = vmatprep.subr.bf16.mxu0 %v2114_v17 }
 0x2e8   : > { %1823 = vmatmul.mubr.msk.bf16.vlgmr.msra.gmra.mrb[20].mxu0 %vm733_vm3, %v1088_v63 }
 0x2e9   : > { %1836 = vmatprep.mubr.msk.bf16.mxu0 %vm2115_vm1, %v2114_v17 }
 0x336   : > { %v774_v0 = vpop.f32.mrb[8].mxu0 }
 0x337   : > { %v1788_v1 = vpop.f32.mrb[9].mxu0  ;;  %v780_v2 = vsel %vm733_vm3, %v774_v0, -inf }
 0x338   : > { %781 = vmax.xlane.f32.xlu1 %v780_v2  ;;  %v777_v4 = vpop.f32.mrb[10].mxu0 }
 0x339   : > { %v1789_v5 = vpop.f32.mrb[11].mxu0 }
 0x349   : > { %918 = vrot.lane.b32.xlu1 %v1694_v6, %s2116_s27  ;;  %s2122_s27 = smov 24  }
 0x34d   : > { %1152 = vrot.lane.b32.xlu1 %v1694_v6, %s2118_s24 }
 0x3ab   : > { %v894_v7 = vpop.f32.mrb[12].mxu0 }
 0x3ac   : > { %v1800_v8 = vpop.f32.mrb[13].mxu0  ;;  %v900_v9 = vsel %vm733_vm3, %v894_v7, -inf }
 0x3ad   : > { %901 = vmax.xlane.f32.xlu0 %v900_v9  ;;  %v897_v10 = vpop.f32.mrb[14].mxu0 }
 0x3ae   : > { %v1801_v11 = vpop.f32.mrb[15].mxu0 }
 0x3b3   : > { %v1014_v12 = vpop.f32.mrb[16].mxu0 }
 0x3b4   : > { %v1812_v13 = vpop.f32.mrb[17].mxu0  ;;  %v1020_v14 = vsel %vm733_vm3, %v1014_v12, -inf }
 0x3b5   : > { %1021 = vmax.xlane.f32.xlu0 %v1020_v14  ;;  %v1017_v15 = vpop.f32.mrb[18].mxu0 }
 0x3b6   : > { %v1813_v16 = vpop.f32.mrb[19].mxu0 }
 0x3bb   : > { %v1131_v18 = vpop.f32.mrb[20].mxu0 }
 0x3bc   : > { %v1824_v19 = vpop.f32.mrb[21].mxu0  ;;  %v1137_v20 = vsel %vm733_vm3, %v1131_v18, -inf }
 0x3bd   : > { %1138 = vmax.xlane.f32.xlu0 %v1137_v20  ;;  %v1134_v21 = vpop.f32.mrb[22].mxu0 }
 0x3be   : > { %v1825_v22 = vpop.f32.mrb[23].mxu0 }
 0x3c5   : > { %v782_v23 = vpop.xlane.xlu1 %781 }
 0x3c6   : > { %v786_v24 = vsub.f32 %v774_v0, %v782_v23  ;;  %v783_v53 = vsub.f32 -inf, %v782_v23 }
 0x3c8   : > { %v787_v25 = vmul.f32 1.442695, %v786_v24  ;;  %v784_v54 = vmul.f32 1.442695, %v783_v53 }
 0x3c9   : > { %v919_v27 = vpop.permute.xlu1 %918 }
 0x3ca   : > { %1971 = vpow2.f32 %v787_v25  ;;  %v924_v29 = vsel %vm798_vm4, %v919_v27, 0 }
 0x3cd   : > { %v1153_v46 = vpop.permute.xlu1 %1152 }
 0x3ce   : > { %v1158_v49 = vsel %vm798_vm4, %v1153_v46, 0 }
 0x3d3   : > { %1035 = vrot.lane.b32.xlu0 %v1694_v6, %s2117_s14 }
 0x3d4   : > { %v1972_v26 = vpop.eup %1971 }
 0x3d5   : > { %v794_v28 = vpack.c.bf16 %v1972_v26, %v1972_v26  ;;  %v790_v44 = vsel %vm733_vm3, %v1972_v26, 0.0  ;;  %v1953_v26 = vld [vmem:[%s2579_s5] sm:$0xff]  }
 0x3d6   : > { %1833 = vmatpush3.bf16.msra.mxu0 %v1953_v26  ;;  %v1966_v26 = vld [vmem:[%s2587_s13 + $0x38] sm:$0xff]  }
 0x3d7   : > { %1793 = vmatmul.mubr.msk.bf16.vlgmr.msra.gmra.mrb[0].mxu1 %vm733_vm3, %v794_v28  ;;  %1834 = vmatprep.subr.bf16.mxu0 %v2114_v17 }
 0x3d8   : > { %1803 = vmatpush3.bf16.msra.mxu1 %v924_v29  ;;  %1804 = vmatprep.mubr.msk.bf16.mxu1 %vm2115_vm1, %v2114_v17 }
 0x3d9   : > { %1814 = vmatprep.subr.bf16.mxu1 %v2114_v17 }
 0x43a   : > { %v902_v30 = vpop.xlane.xlu0 %901 }
 0x43b   : > { %v906_v31 = vsub.f32 %v894_v7, %v902_v30  ;;  %v903_v4 = vsub.f32 -inf, %v902_v30  ;;  %v1954_v30 = vld [vmem:[%s2579_s5 + $0x8] sm:$0xff]  }
 0x43c   : > { %1835 = vmatpush3.bf16.msra.mxu0 %v1954_v30 }
 0x43d   : > { %v907_v32 = vmul.f32 1.442695, %v906_v31  ;;  %v904_v5 = vmul.f32 1.442695, %v903_v4  ;;  %1848 = vmatprep.subr.bf16.mxu0 %v2114_v17 }
 0x43f   : > { %1973 = vpow2.f32 %v907_v32 }
 0x442   : > { %v1022_v33 = vpop.xlane.xlu0 %1021 }
 0x443   : > { %v1026_v34 = vsub.f32 %v1014_v12, %v1022_v33  ;;  %v1023_v6 = vsub.f32 -inf, %v1022_v33 }
 0x445   : > { %v1027_v35 = vmul.f32 1.442695, %v1026_v34  ;;  %v1024_v7 = vmul.f32 1.442695, %v1023_v6  ;;  %v1957_v6 = vld [vmem:[%s2583_s9 + $0x8] sm:$0xff]  }
 0x447   : > { %1975 = vpow2.f32 %v1027_v35 }
 0x449   : > { %v1974_v36 = vpop.eup %1973 }
 0x44a   : > { %v1139_v37 = vpop.xlane.xlu0 %1138  ;;  %v910_v39 = vsel %vm733_vm3, %v1974_v36, 0.0  ;;  %v914_v40 = vpack.c.bf16 %v1974_v36, %v1974_v36 }
 0x44b   : > { %v1143_v38 = vsub.f32 %v1131_v18, %v1139_v37  ;;  %911 = vadd.xlane.f32.xlu1 %v910_v39  ;;  %v1140_v8 = vsub.f32 -inf, %v1139_v37 }
 0x44c   : > { %1805 = vmatmul.mubr.msk.bf16.vlgmr.msra.gmra.mrb[4].mxu1 %vm733_vm3, %v914_v40 }
 0x44d   : > { %v1144_v41 = vmul.f32 1.442695, %v1143_v38  ;;  %1816 = vmatprep.mubr.msk.bf16.mxu1 %vm2115_vm1, %v2114_v17  ;;  %v1141_v10 = vmul.f32 1.442695, %v1140_v8 }
 0x44e   : > { %v1036_v42 = vpop.permute.xlu0 %1035 }
 0x44f   : > { %v1041_v43 = vsel %vm798_vm4, %v1036_v42, 0  ;;  %1977 = vpow2.f32 %v1144_v41  ;;  %791 = vadd.xlane.f32.xlu1 %v790_v44 }
 0x450   : > { %1815 = vmatpush3.bf16.msra.mxu1 %v1041_v43  ;;  %1979 = vpow2.f32 %v784_v54 }
 0x451   : > { %1826 = vmatprep.subr.bf16.mxu1 %v2114_v17  ;;  %v1976_v45 = vpop.eup %1975 }
 0x452   : > { %v1030_v47 = vsel %vm733_vm3, %v1976_v45, 0.0  ;;  %v1034_v48 = vpack.c.bf16 %v1976_v45, %v1976_v45 }
 0x453   : > { %1031 = vadd.xlane.f32.xlu0 %v1030_v47 }
 0x454   : > { %1817 = vmatmul.mubr.msk.bf16.vlgmr.msra.gmra.mrb[8].mxu1 %vm733_vm3, %v1034_v48 }
 0x455   : > { %1827 = vmatpush3.bf16.msra.mxu1 %v1158_v49  ;;  %1828 = vmatprep.mubr.msk.bf16.mxu1 %vm2115_vm1, %v2114_v17 }
 0x456   : > { %1840 = vmatprep.subr.bf16.mxu1 %v2114_v17 }
 0x459   : > { %v1978_v50 = vpop.eup %1977 }
 0x45a   : > { %v1147_v51 = vsel %vm733_vm3, %v1978_v50, 0.0  ;;  %v1151_v52 = vpack.c.bf16 %v1978_v50, %v1978_v50  ;;  %v1980_v55 = vpop.eup %1979 }
 0x45b   : > { %1148 = vadd.xlane.f32.xlu0 %v1147_v51  ;;  %v789_v56 = vmul.f32 0.0, %v1980_v55  ;;  %v1700_v55 = vld [vmem:[%s2580_s6] ss:$0 sm:$0xff] }
 0x45c   : > { %1829 = vmatmul.mubr.msk.bf16.vlgmr.msra.gmra.mrb[12].mxu1 %vm733_vm3, %v1151_v52 }
 0x45d   : > { %1844 = vmatprep.mubr.msk.bf16.mxu1 %vm2115_vm1, %v2114_v17 }
 0x4aa   : > { %v836_v57 = vpop.f32.mrb[0].mxu1 }
 0x4ab   : > { %v842_v58 = vadd.f32 %v836_v57, %v789_v56  ;;  %v1794_v59 = vpop.f32.mrb[1].mxu1 }
 0x4ac   : > { %v839_v60 = vpop.f32.mrb[2].mxu1 }
 0x4ad   : > { %v1795_v61 = vpop.f32.mrb[3].mxu1 }
 0x4d8   : > { %v912_v62 = vpop.xlane.xlu1 %911 }
 0x4dc   : > { %v792_v63 = vpop.xlane.xlu1 %791 }
 0x4dd   : > { %v793_v0 = vadd.f32 %v792_v63, %v789_v56 }
 0x4df   : > { %1981 = vrcp.f32 %v793_v0 }
 0x4e0   : > { %1983 = vpow2.f32 %v904_v5  ;;  %v1032_v14 = vpop.xlane.xlu0 %1031  ;;  %v1955_v5 = vld [vmem:[%s2583_s9] sm:$0xff]  }
 0x4e1   : > { %1985 = vpow2.f32 %v1024_v7  ;;  %1841 = vmatpush3.bf16.msra.mxu1 %v1955_v5  ;;  %v1958_v7 = vld [vmem:[%s2585_s11 + $0x8] sm:$0xff]  }
 0x4e2   : > { %1987 = vpow2.f32 %v1141_v10  ;;  %1842 = vmatprep.subr.bf16.mxu1 %v2114_v17 }
 0x4e5   : > { %1843 = vmatpush3.bf16.msra.mxu1 %v1957_v6 }
 0x4e6   : > { %1856 = vmatprep.subr.bf16.mxu1 %v2114_v17 }
 0x4e8   : > { %v1149_v20 = vpop.xlane.xlu0 %1148 }
 0x4e9   : > { %v1982_v1 = vpop.eup %1981 }
 0x4ea   : > { %v2426_v2 = vmul.f32 %v1982_v1, %v842_v58  ;;  %v1984_v9 = vpop.eup %1983 }
 0x4eb   : > { %v909_v11 = vmul.f32 0.0, %v1984_v9  ;;  %v1986_v13 = vpop.eup %1985 }
 0x4ec   : > { %v1029_v15 = vmul.f32 0.0, %v1986_v13  ;;  %v1988_v18 = vpop.eup %1987  ;;  %v845_v50 = vpack.c.bf16 %v2426_v2, %v2426_v2 }
 0x4ed   : > { %v913_v12 = vadd.f32 %v912_v62, %v909_v11  ;;  %v1146_v24 = vmul.f32 0.0, %v1988_v18 }
 0x4ee   : > { %v1033_v16 = vadd.f32 %v1032_v14, %v1029_v15  ;;  %v1705_v14 = vld [vmem:[%s2582_s8] ss:$0 sm:$0xff] }
 0x4ef   : > { %1989 = vrcp.f32 %v913_v12  ;;  %v1150_v29 = vadd.f32 %v1149_v20, %v1146_v24  ;;  %v1704_v12 = vld [vmem:[%s2581_s7] ss:$0 sm:$0xff]  ;;  %v1960_v20 = vld [vmem:[%s2587_s13 + $0x8] sm:$0xff]  }
 0x4f0   : > { %1991 = vrcp.f32 %v1033_v16 }
 0x4f1   : > { %1993 = vrcp.f32 %v1150_v29 }
 0x4f9   : > { %v1990_v23 = vpop.eup %1989 }
 0x4fa   : > { %v1992_v35 = vpop.eup %1991 }
 0x4fb   : > { %v1994_v43 = vpop.eup %1993 }
 0x51f   : > { %v960_v19 = vpop.f32.mrb[4].mxu1 }
 0x520   : > { %v966_v21 = vadd.f32 %v960_v19, %v909_v11  ;;  %v1806_v22 = vpop.f32.mrb[5].mxu1  ;;  %v1959_v19 = vld [vmem:[%s2587_s13] sm:$0xff]  }
 0x521   : > { %v963_v25 = vpop.f32.mrb[6].mxu1  ;;  %v1962_v22 = vld [vmem:[%s2587_s13 + $0x18] sm:$0xff]  }
 0x522   : > { %v968_v27 = vmul.f32 %v1990_v23, %v966_v21  ;;  %v1807_v28 = vpop.f32.mrb[7].mxu1  ;;  %v1961_v21 = vld [vmem:[%s2587_s13 + $0x10] sm:$0xff]   ;;  %v1963_v23 = vld [vmem:[%s2587_s13 + $0x20] sm:$0xff]  }
 0x523   : > { %v1965_v25 = vld [vmem:[%s2587_s13 + $0x30] sm:$0xff]  }
 0x524   : > { %v969_v31 = vpack.c.bf16 %v968_v27, %v968_v27  ;;  %v1710_v27 = vld [vmem:[%s2586_s12] ss:$0 sm:$0xff] }
 0x526   : > { %1205 = vrot.lane.b32.xlu0 %v969_v31, %s2120_s10  ;;  %s2610_s10 = sld [smem:[#allocation15_spill]] }
 0x527   : > { %v1077_v32 = vpop.f32.mrb[8].mxu1 }
 0x528   : > { %v1083_v33 = vadd.f32 %v1077_v32, %v1029_v15  ;;  %v1818_v34 = vpop.f32.mrb[9].mxu1 }
 0x529   : > { %v1080_v36 = vpop.f32.mrb[10].mxu1 }
 0x52a   : > { %v1085_v37 = vmul.f32 %v1992_v35, %v1083_v33  ;;  %v1819_v38 = vpop.f32.mrb[11].mxu1 }
 0x52c   : > { %v1086_v39 = vpack.c.bf16 %v1085_v37, %v1085_v37 }
 0x52e   : > { %1208 = vrot.lane.b32.xlu1 %v1086_v39, %s2121_s30  ;;  %s1724_s30 = sshll.u32 %s2103_s21, 6 }
 0x52f   : > { %v1194_v40 = vpop.f32.mrb[12].mxu1 }
 0x530   : > { %v1200_v41 = vadd.f32 %v1194_v40, %v1146_v24  ;;  %v1830_v42 = vpop.f32.mrb[13].mxu1  ;;  %v1964_v24 = vld [vmem:[%s2587_s13 + $0x28] sm:$0xff]  }
 0x531   : > { %v1197_v44 = vpop.f32.mrb[14].mxu1  ;;  %v1706_v42 = vld [vmem:[%s2609_s22] ss:$0 sm:$0xff]  ;;  %s2524_s22 = scalar_lea.hbm %s2611_s29, %s1724_s30 }
 0x532   : > { %v1202_v45 = vmul.f32 %v1994_v43, %v1200_v41  ;;  %v1831_v46 = vpop.f32.mrb[15].mxu1 }
 0x534   : > { %v1203_v47 = vpack.c.bf16 %v1202_v45, %v1202_v45 }
 0x536   : > { %1211 = vrot.lane.b32.xlu1 %v1203_v47, %s2122_s27  ;;  %s523_s27 = scalar_lea.vmem [#allocation7], %s1677_s28  ;;  %s2123_s28 = smov [#allocation7]  }
 0x537   : > { %s1589_s14 = sshll.u32 %s523_s27, 4  ;;  %s2033_s17 = sshll.u32 %s2123_s28, 4  ;;  %s2526_s14 = int_to_ptr.vmem [resolvable:$true] %s1589_s14  ;;  %s2034_s17 = int_to_ptr.vmem [resolvable:$false] %s2033_s17 }
 0x538   : > { %s2029_s21 = scalar_lea.vmem %s2526_s14, 64  ;;  %p2036_p7 = scmp.lt.s32.totalorder %s2526_s14, %s2034_s17 }
 0x539   : > { %p2030_p8 = scmp.ne.s32.totalorder %s2526_s14, %s2029_s21 }
 0x53b   : > { %p2031_p11 = pnand %p2030_p8, %p2612_p9 }
 0x53d   : > { %p2032_p0 = pneg %p2031_p11 }
 0x598   : > { %v1206_v48 = vpop.permute.xlu0 %1205 }
 0x599   : > { %v1215_v51 = vsel %vm733_vm3, %v845_v50, %v1206_v48  ;;  %v1722_v50 = vld [vmem:[%s2610_s10] ss:$0 sm:$0xff]  ;;  %s2035_s10 = scalar_lea.vmem %s2034_s17, 128 }
 0x59a   : > { %p2037_p13 = scmp.lt.s32.totalorder %s2035_s10, %s2029_s21 }
 0x59c   : > { %p2038_p3 = por %p2037_p13, %p2036_p7 }
 0x59e   : > { %p2039_p6 = pnand %p2038_p3, %p2032_p0 }
 0x5a0   : > { %v1209_v49 = vpop.permute.xlu1 %1208 }
 0x5a1   : > { %v1218_v52 = vsel %vm1216_vm5, %v1215_v51, %v1209_v49 }
 0x5a8   : > { %v1212_v53 = vpop.permute.xlu1 %1211 }
 0x5a9   : > { %v1221_v54 = vsel %vm1219_vm6, %v1218_v52, %v1212_v53 }
 0x5aa   : > { %1837 = vmatmul.mubr.msk.bf16.vlgmr.msra.gmra.mrb[24].mxu0 %vm531_vm0, %v1221_v54 }
 0x5ab   : > { %1852 = vmatprep.mubr.msk.bf16.mxu0 %vm2115_vm1, %v2114_v17 }
 0x67d   : > { %v1281_v56 = vpop.f32.mrb[24].mxu0 }
 0x67e   : > { %v1282_v57 = vadd.f32 %v1700_v55, %v1281_v56  ;;  %v1838_v58 = vpop.f32.mrb[25].mxu0 }
 0x67f   : > { %v1284_v59 = vpop.f32.mrb[26].mxu0 }
 0x680   : > { %v2446_v60 = vadd.f32 %v1282_v57, %v2325_v3  ;;  %v1839_v61 = vpop.f32.mrb[27].mxu0  ;;  %v1956_v3 = vld [vmem:[%s2585_s11] sm:$0xff]  }
 0x681   : > { %1849 = vmatpush3.bf16.msra.mxu0 %v1956_v3 }
 0x682   : > { %v1288_v62 = vsel %vm531_vm0, %v2446_v60, 0.0  ;;  %1850 = vmatprep.subr.bf16.mxu0 %v2114_v17 }
 0x683   : > { %1289 = vadd.xlane.f32.xlu1 %v1288_v62 }
 0x685   : > { %1851 = vmatpush3.bf16.msra.mxu0 %v1958_v7 }
 0x710   : > { %v1290_v63 = vpop.xlane.xlu1 %1289 }
 0x711   : > { %v1291_v0 = vmul.f32 0.03125, %v1290_v63 }
 0x713   : > { %v1292_v1 = vsub.f32 %v2446_v60, %v1291_v0 }
 0x715   : > { %v1293_v2 = vmul.f32 %v1292_v1, %v1292_v1 }
 0x717   : > { %v1294_v4 = vsel %vm531_vm0, %v1293_v2, 0.0 }
 0x718   : > { %1295 = vadd.xlane.f32.xlu0 %v1294_v4 }
 0x7a5   : > { %v1296_v8 = vpop.xlane.xlu0 %1295 }
 0x7a6   : > { %v1297_v9 = vmul.f32 0.03125, %v1296_v8 }
 0x7a8   : > { %v1298_v10 = vadd.f32 1e-05, %v1297_v9 }
 0x7aa   : > { %1995 = vrsqrt.f32 %v1298_v10 }
 0x7b4   : > { %v1996_v11 = vpop.eup %1995 }
 0x7b5   : > { %v1300_v13 = vmul.f32 %v1996_v11, %v1292_v1 }
 0x7b7   : > { %v1308_v15 = vmul.f32 %v1704_v12, %v1300_v13 }
 0x7b9   : > { %v1316_v16 = vadd.f32 %v1705_v14, %v1308_v15 }
 0x7bb   : > { %v1317_v18 = vpack.c.bf16 %v1316_v16, %v1316_v16 }
 0x7bd   : > { %1845 = vmatmul.mubr.msk.bf16.vlgmr.msra.gmra.mrb[16].mxu1 %vm531_vm0, %v1317_v18  ;;  %1853 = vmatmul.mubr.msk.bf16.vlgmr.msra.gmra.mrb[28].mxu0 %vm531_vm0, %v1317_v18 }
 0x7be   : > { %1872 = vmatprep.mubr.msk.bf16.mxu1 %vm2115_vm1, %v2114_v17  ;;  %1857 = vmatpush3.bf16.msra.mxu1 %v1959_v19 }
 0x7bf   : > { %1858 = vmatprep.subr.bf16.mxu1 %v2114_v17 }
 0x7c2   : > { %1859 = vmatpush3.bf16.msra.mxu1 %v1960_v20 }
 0x7c3   : > { %1860 = vmatprep.subr.bf16.mxu1 %v2114_v17 }
 0x7c6   : > { %1861 = vmatpush3.bf16.msra.mxu1 %v1961_v21 }
 0x7c7   : > { %1862 = vmatprep.subr.bf16.mxu1 %v2114_v17 }
 0x7ca   : > { %1863 = vmatpush3.bf16.msra.mxu1 %v1962_v22 }
 0x7cb   : > { %1864 = vmatprep.subr.bf16.mxu1 %v2114_v17 }
 0x7ce   : > { %1865 = vmatpush3.bf16.msra.mxu1 %v1963_v23 }
 0x7cf   : > { %1866 = vmatprep.subr.bf16.mxu1 %v2114_v17 }
 0x7d2   : > { %1867 = vmatpush3.bf16.msra.mxu1 %v1964_v24 }
 0x7d3   : > { %1868 = vmatprep.subr.bf16.mxu1 %v2114_v17 }
 0x7d6   : > { %1869 = vmatpush3.bf16.msra.mxu1 %v1965_v25 }
 0x7d7   : > { %1870 = vmatprep.subr.bf16.mxu1 %v2114_v17 }
 0x7da   : > { %1871 = vmatpush3.bf16.msra.mxu1 %v1966_v26 }
 0x890   : > { %v1378_v28 = vpop.f32.mrb[16].mxu1  ;;  %v1441_v29 = vpop.f32.mrb[28].mxu0 }
 0x891   : > { %v1442_v30 = vadd.f32 %v1710_v27, %v1441_v29  ;;  %v1846_v31 = vpop.f32.mrb[17].mxu1  ;;  %v1854_v32 = vpop.f32.mrb[29].mxu0  ;;  %v1379_v45 = vadd.f32 %v1706_v42, %v1378_v28 }
 0x892   : > { %v1381_v33 = vpop.f32.mrb[18].mxu1  ;;  %v1444_v34 = vpop.f32.mrb[30].mxu0 }
 0x893   : > { %v1448_v35 = vmul.f32 0.044715, %v1442_v30  ;;  %v1847_v36 = vpop.f32.mrb[19].mxu1  ;;  %v1855_v37 = vpop.f32.mrb[31].mxu0  ;;  %v1447_v43 = vmul.f32 0.5, %v1442_v30 }
 0x895   : > { %v1449_v38 = vmul.f32 %v1448_v35, %v1442_v30 }
 0x897   : > { %v1450_v39 = vmul.f32 %v1449_v38, %v1442_v30 }
 0x899   : > { %v1451_v40 = vadd.f32 %v1450_v39, %v1442_v30 }
 0x89b   : > { %v1452_v41 = vmul.f32 0.7978846, %v1451_v40 }
 0x89d   : > { %1997 = vtanh.f32 %v1452_v41 }
 0x8a7   : > { %v1998_v17 = vpop.eup %1997 }
 0x8a8   : > { %v1454_v44 = vadd.f32 1.0, %v1998_v17 }
 0x8aa   : > { %v1455_v46 = vmul.f32 %v1454_v44, %v1447_v43 }
 0x8ac   : > { %v1456_v47 = vmul.f32 %v1455_v46, %v1379_v45 }
 0x8ae   : > { %v1457_v48 = vpack.c.bf16 %v1456_v47, %v1456_v47 }
 0x8b0   : > { %1873 = vmatmul.mubr.bf16.vlgmr.msra.gmra.mrb[20].mxu1 %v1457_v48 }
 0x983   : > { %v1556_v49 = vpop.f32.mrb[20].mxu1 }
 0x984   : > { %v1562_v51 = vadd.f32 %v1556_v49, %v2446_v60  ;;  %v1874_v52 = vpop.f32.mrb[21].mxu1 }
 0x985   : > { %v1559_v53 = vpop.f32.mrb[22].mxu1 }
 0x986   : > { %v1570_v54 = vadd.f32 %v1722_v50, %v1562_v51  ;;  %v1875_v55 = vpop.f32.mrb[23].mxu1 }
 0x988   : > { %v1571_v56 = vpack.c.bf16 %v1570_v54, %v1570_v54 }
 0x98a   : > { %1573 = vst.msk [vmem:[%s523_s27] sm:$0xf] %vm623_vm2, %v1571_v56 }
 0x98b   : > { %2042 = shalt.err (!%p2039_p6)
}
 0x98c   : > { %s2043_s15 = scalar_lea.hbm %s2524_s22, 64  ;;  %s2047_s24 = scalar_lea.hbm %s2611_s29, 128 }
 0x98d   : > { %p2044_p4 = scmp.ne.s32.totalorder %s2524_s22, %s2043_s15  ;;  %p2048_p1 = scmp.lt.u32.totalorder %s2524_s22, %s2611_s29 }
 0x98e   : > { %p2049_p2 = scmp.lt.u32.totalorder %s2047_s24, %s2043_s15  ;;  %p2051_p8 = scmp.lt.u32.totalorder %s2043_s15, %s2524_s22 }
 0x98f   : > { %p2045_p10 = pnand %p2044_p4, %p2612_p9 }
 0x990   : > { %p2050_p5 = por %p2049_p2, %p2048_p1 }
 0x991   : > { %p2046_p12 = pneg %p2045_p10 }
 0x992   : > { %p2052_p11 = por %p2051_p8, %p2050_p5 }
 0x994   : > { %p2053_p0 = pnand %p2052_p11, %p2046_p12 }
 0x996   : > { %2056 = shalt.err (!%p2053_p0)
}
 0x997   : > { %1878 = dma.vmem_to_hbm [thread:$0]  (%p2612_p9), %s2526_s14, 64, %s2524_s22, %s1575_s25  }
 0x998 PF: > { %s2613_s21 = sld [smem:[#allocation10_spill]]  ;;  %p2614_p7 = scmp.ne.s32.totalorder %s2605_s18, 0 }
 0x999   : > { %p2615_p13 = scmp.ge.s32.totalorder %s2111_s23, 2 }
 0x99b   : > { %p1885_p3 = pnand %p2615_p13, %p2614_p7 }
 0x99e   : > { %s1601_s17 = sand.u32 1, %s2613_s21  }
 0x99f   : > { %s1602_s10 = scalar_lea.sflag [#allocation6], %s1601_s17 }
 0x9a0   : > { %2086 = dma.done.wait (!%p1885_p3), %s1602_s10, 64  }
 0x9a1   : > { %2088 = vsyncadd (!%p1885_p3), %s1602_s10, 4294967232  ;;  %s31_s23 = sadd.s32 1, %s2111_s23   ;;  %s2616_s16 = sld [smem:[#allocation13_spill]] }
 0x9a2   : > { %p28_p6 = scmp.ge.s32.totalorder %s31_s23, 4   ;;  %s2617_s21 = sld [smem:[#allocation11_spill]] }
 0x9a3   : > { %s2618_s22 = sld [smem:[#allocation12_spill]]  ;;  %s2619_s18 = smov %s2095_s19 }
 0x9a4   : > { %s2620_s19 = smov %s2099_s20  ;;  %30 = sbr.rel (!%p28_p6) target bundleno = 10 (0xa), region = 130 }
 0x9a7   : > { %s2621_s20 = smov %s2616_s16 }
 0x9ab   :  { %1607 = vsyncpa [#allocation5], 1 }
 0x9ac   :  { %1609 = vsyncpa [#allocation5 + $0x1], 1 }
 0x9ad   :  { %1610 = vsyncpa [#allocation6], 1 }
 0x9ae   :  { %1612 = vsyncpa [#allocation6 + $0x1], 1 }

</bundles_post_ra>
